<compile_context>
chip_gen: v7x
topology: tpu7x:2x2x1
jax: 0.10.0
libtpu: 0.0.40
codegen_flags: <defaults>
</compile_context>

<pallas_src>
import math
import functools

import numpy as np
import jax
import jax.numpy as jnp
from jax.experimental import pallas as pl
from jax.experimental.pallas import tpu as pltpu


# ----------------------------------------------------------------------------
# In-kernel helpers (traced inside the single fused Pallas kernel body)
# ----------------------------------------------------------------------------

def _layernorm(x, g, b, eps=1e-5):
    mu = jnp.mean(x, axis=-1, keepdims=True)
    xc = x - mu
    var = jnp.mean(xc * xc, axis=-1, keepdims=True)
    return xc * jax.lax.rsqrt(var + eps) * g + b


def _softmax_rows(s):
    s = s - jnp.max(s, axis=-1, keepdims=True)
    p = jnp.exp(s)
    return p * pl.reciprocal(jnp.sum(p, axis=-1, keepdims=True), approx=True)


def _ffn(x, w1, b1, w2, b2):
    h = jnp.maximum(
        jnp.dot(x, w1, preferred_element_type=jnp.float32) + b1, 0.0)
    return jnp.dot(h, w2, preferred_element_type=jnp.float32) + b2


def _causal_mask(T):
    # period == max_seq_len and T <= period  =>  ALiBi term is exactly zero;
    # the biased mask reduces to a plain causal mask.
    ri = jax.lax.broadcasted_iota(jnp.int32, (T, T), 0)
    ci = jax.lax.broadcasted_iota(jnp.int32, (T, T), 1)
    return jnp.where(ci <= ri, 0.0, -1e9)


def _self_mha(x, wqkv, bqkv, wo, bo, nhead, mask):
    """Self-attention (xq == xkv): one fused (T,D)x(D,3D) QKV matmul.
    Per-head outputs are folded directly into the out-projection (no concat,
    no VMEM scratch): out = bo + sum_h (P_h @ V_h) @ Wo[h*dh:(h+1)*dh, :]."""
    T, D = x.shape
    dh = D // nhead
    scale = 1.0 / math.sqrt(dh)
    qkv = jnp.dot(x, wqkv, preferred_element_type=jnp.float32) + bqkv
    out = jnp.zeros((T, D), jnp.float32) + bo
    for h in range(nhead):                                    # static -> unrolled
        qh = qkv[:, h * dh:(h + 1) * dh]
        kh = qkv[:, D + h * dh:D + (h + 1) * dh]
        vh = qkv[:, 2 * D + h * dh:2 * D + (h + 1) * dh]
        s = jax.lax.dot_general(qh, kh, (((1,), (1,)), ((), ())),
                                preferred_element_type=jnp.float32) * scale
        if mask is not None:
            s = s + mask
        p = _softmax_rows(s)
        oh = jnp.dot(p, vh, preferred_element_type=jnp.float32)
        out = out + jnp.dot(oh, wo[h * dh:(h + 1) * dh, :],
                            preferred_element_type=jnp.float32)
    return out


def _cross_mha(xq, xkv, wqkv, bqkv, wo, bo, nhead):
    """Cross-attention (no mask), same register-resident head assembly."""
    Tq, D = xq.shape
    dh = D // nhead
    scale = 1.0 / math.sqrt(dh)
    q = jnp.dot(xq, wqkv[:, :D], preferred_element_type=jnp.float32) + bqkv[:, :D]
    kv = jnp.dot(xkv, wqkv[:, D:], preferred_element_type=jnp.float32) + bqkv[:, D:]
    out = jnp.zeros((Tq, D), jnp.float32) + bo
    for h in range(nhead):
        qh = q[:, h * dh:(h + 1) * dh]
        kh = kv[:, h * dh:(h + 1) * dh]
        vh = kv[:, D + h * dh:D + (h + 1) * dh]
        s = jax.lax.dot_general(qh, kh, (((1,), (1,)), ((), ())),
                                preferred_element_type=jnp.float32) * scale
        p = _softmax_rows(s)
        oh = jnp.dot(p, vh, preferred_element_type=jnp.float32)
        out = out + jnp.dot(oh, wo[h * dh:(h + 1) * dh, :],
                            preferred_element_type=jnp.float32)
    return out


def _token_attn(tok, xfeat, wqkv, bqkv, wo, bo, nhead):
    """Encoder self-attention with QUERIES restricted to the 2 token rows
    (only rows 0:2 of the encoder output are ever used). Keys/values are the
    logical concat [tok; xfeat], handled as two blocks with a joint softmax,
    so the (T+2, D) input never has to be assembled (no sublane concat, no
    scratch)."""
    Tt, D = tok.shape
    dh = D // nhead
    scale = 1.0 / math.sqrt(dh)
    qkv_t = jnp.dot(tok, wqkv, preferred_element_type=jnp.float32) + bqkv    # (2, 3D)
    kv_f = jnp.dot(xfeat, wqkv[:, D:],
                   preferred_element_type=jnp.float32) + bqkv[:, D:]         # (T, 2D)
    out = jnp.zeros((Tt, D), jnp.float32) + bo
    for h in range(nhead):
        qh = qkv_t[:, h * dh:(h + 1) * dh]
        kth = qkv_t[:, D + h * dh:D + (h + 1) * dh]
        vth = qkv_t[:, 2 * D + h * dh:2 * D + (h + 1) * dh]
        kfh = kv_f[:, h * dh:(h + 1) * dh]
        vfh = kv_f[:, D + h * dh:D + (h + 1) * dh]
        st = jax.lax.dot_general(qh, kth, (((1,), (1,)), ((), ())),
                                 preferred_element_type=jnp.float32) * scale
        sf = jax.lax.dot_general(qh, kfh, (((1,), (1,)), ((), ())),
                                 preferred_element_type=jnp.float32) * scale
        m = jnp.maximum(jnp.max(st, axis=-1, keepdims=True),
                        jnp.max(sf, axis=-1, keepdims=True))
        et = jnp.exp(st - m)
        ef = jnp.exp(sf - m)
        den = (jnp.sum(et, axis=-1, keepdims=True)
               + jnp.sum(ef, axis=-1, keepdims=True))
        oh = (jnp.dot(et, vth, preferred_element_type=jnp.float32)
              + jnp.dot(ef, vfh, preferred_element_type=jnp.float32)
              ) * pl.reciprocal(den, approx=True)
        out = out + jnp.dot(oh, wo[h * dh:(h + 1) * dh, :],
                            preferred_element_type=jnp.float32)
    return out


# ----------------------------------------------------------------------------
# The single fused kernel: VAE + encoder layer + decoder_1 + decoder_2 + heads
# ----------------------------------------------------------------------------

def _decoder_fused_kernel(
        feat_ref, eps_ref, tq_ref,
        # VAE front
        v_tok_ref, v_wv_ref, v_bv_ref,
        # TransformerEncoderLayer
        e_wqkv_ref, e_bqkv_ref, e_wo_ref, e_bo_ref,
        e_n1g_ref, e_n1b_ref, e_w1_ref, e_b1_ref, e_w2_ref, e_b2_ref,
        e_n2g_ref, e_n2b_ref,
        # TransformerDecoderLayer (shared by decoder_1 / decoder_2)
        d_sa_wqkv_ref, d_sa_bqkv_ref, d_sa_wo_ref, d_sa_bo_ref,
        d_n1g_ref, d_n1b_ref,
        d_ca_wqkv_ref, d_ca_bqkv_ref, d_ca_wo_ref, d_ca_bo_ref,
        d_n2g_ref, d_n2b_ref,
        d_w1_ref, d_b1_ref, d_w2_ref, d_b2_ref,
        d_n3g_ref, d_n3b_ref,
        # output heads
        h_w3d_ref, h_b3d_ref, h_we1a_ref, h_we1b_ref, h_be1_ref,
        h_we2_ref, h_be2_ref,
        # outputs
        mu_std_ref, head_ref,
        *, nhead):
    D = feat_ref.shape[-1]

    # -------- VAEModel: input linear + [mu;logvar] tokens + encoder layer ---
    tok = v_tok_ref[...]                                         # (2, D)
    x_feat = (jnp.dot(feat_ref[...], v_wv_ref[...],
                      preferred_element_type=jnp.float32) + v_bv_ref[...])
    sa = _token_attn(tok, x_feat, e_wqkv_ref[...], e_bqkv_ref[...],
                     e_wo_ref[...], e_bo_ref[...], nhead)
    x2 = _layernorm(tok + sa, e_n1g_ref[...], e_n1b_ref[...])
    x2 = _layernorm(x2 + _ffn(x2, e_w1_ref[...], e_b1_ref[...],
                              e_w2_ref[...], e_b2_ref[...]),
                    e_n2g_ref[...], e_n2b_ref[...])
    mu = x2[0:1, :]                                              # (1, D)
    logvar = x2[1:2, :]
    std = jnp.exp(0.5 * logvar)                                  # logvar.exp()**0.5
    motion = mu + std * eps_ref[...]                             # Normal.rsample()
    mu_std_ref[0:1, :] = mu
    mu_std_ref[1:2, :] = std

    # -------- decoder layer 1: tgt = PE time queries, memory = motion -------
    tq = tq_ref[...]                                             # (TL, D), batch-invariant
    TL = tq.shape[0]
    mask = _causal_mask(TL)                # shared by all heads & both layers
    x = _layernorm(
        tq + _self_mha(tq, d_sa_wqkv_ref[...], d_sa_bqkv_ref[...],
                       d_sa_wo_ref[...], d_sa_bo_ref[...], nhead, mask),
        d_n1g_ref[...], d_n1b_ref[...])
    # single-key memory: softmax over one key == 1, so
    # cross-attn == broadcast(out_proj(v_proj(memory)))
    ca_wqkv = d_ca_wqkv_ref[...]
    ca_bqkv = d_ca_bqkv_ref[...]
    v_mem = (jnp.dot(motion, ca_wqkv[:, 2 * D:],
                     preferred_element_type=jnp.float32) + ca_bqkv[:, 2 * D:])
    ca_row = (jnp.dot(v_mem, d_ca_wo_ref[...],
                      preferred_element_type=jnp.float32) + d_ca_bo_ref[...])
    x = _layernorm(x + ca_row, d_n2g_ref[...], d_n2b_ref[...])
    lr1 = _layernorm(x + _ffn(x, d_w1_ref[...], d_b1_ref[...],
                              d_w2_ref[...], d_b2_ref[...]),
                     d_n3g_ref[...], d_n3b_ref[...])

    # -------- decoder layer 2: tgt = memory = lr1 (shared params) -----------
    x = _layernorm(
        lr1 + _self_mha(lr1, d_sa_wqkv_ref[...], d_sa_bqkv_ref[...],
                        d_sa_wo_ref[...], d_sa_bo_ref[...], nhead, mask),
        d_n1g_ref[...], d_n1b_ref[...])
    x = _layernorm(
        x + _cross_mha(x, lr1, ca_wqkv, ca_bqkv,
                       d_ca_wo_ref[...], d_ca_bo_ref[...], nhead),
        d_n2g_ref[...], d_n2b_ref[...])
    x = _layernorm(x + _ffn(x, d_w1_ref[...], d_b1_ref[...],
                            d_w2_ref[...], d_b2_ref[...]),
                   d_n3g_ref[...], d_n3b_ref[...])

    # -------- heads: 3DMM map + emotion MLP (concat folded into weights) ----
    od3 = h_w3d_ref.shape[1]
    o3 = (jnp.dot(x, h_w3d_ref[...], preferred_element_type=jnp.float32)
          + h_b3d_ref[...])
    # Linear(cat([o3, x], -1)) == o3 @ We1[:out3d] + x @ We1[out3d:]
    h1 = (jnp.dot(o3, h_we1a_ref[...], preferred_element_type=jnp.float32)
          + jnp.dot(x, h_we1b_ref[...], preferred_element_type=jnp.float32)
          + h_be1_ref[...])
    emo = (jnp.dot(h1, h_we2_ref[...], preferred_element_type=jnp.float32)
           + h_be2_ref[...])
    head_ref[:, 0:od3] = o3
    head_ref[:, od3:] = emo


def _const_spec(w):
    """Full-block spec for a small (batch-invariant) weight tensor."""
    return pl.BlockSpec(w.shape, lambda b, _nd=w.ndim: (0,) * _nd)


# ----------------------------------------------------------------------------
# Fixed buffers & parameters (pre-transposed / pre-cast once at init)
# ----------------------------------------------------------------------------

def sinusoidal_pe(max_len, d_model):
    pos = np.arange(max_len, dtype=np.float32)[:, None]
    div = np.exp(np.arange(0, d_model, 2, dtype=np.float32)
                 * (-math.log(10000.0) / d_model))
    pe = np.zeros((max_len, d_model), dtype=np.float32)
    pe[:, 0::2] = np.sin(pos * div)
    pe[:, 1::2] = np.cos(pos * div)
    return jnp.asarray(pe)


def init_params(key, D, out3d, out_emo):
    keys = iter(jax.random.split(key, 64))

    def w(shape, scale=0.05):
        return scale * jax.random.normal(next(keys), shape, jnp.float32)

    def ln():
        return jnp.ones((1, D), jnp.float32), jnp.zeros((1, D), jnp.float32)

    def mha():
        # Pre-transposed layouts: wqkv (D, 3D), wo (D, D); biases as (1, N).
        return w((D, 3 * D)), w((1, 3 * D)), w((D, D)), w((1, D))

    e_wqkv, e_bqkv, e_wo, e_bo = mha()
    s_wqkv, s_bqkv, s_wo, s_bo = mha()
    c_wqkv, c_bqkv, c_wo, c_bo = mha()
    e_n1g, e_n1b = ln(); e_n2g, e_n2b = ln()
    d_n1g, d_n1b = ln(); d_n2g, d_n2b = ln(); d_n3g, d_n3b = ln()

    return dict(
        vae=dict(wv=w((D, D)), bv=w((1, D)),
                 tokens=w((2, D), 1.0)),        # rows: [mu_token, logvar_token]
        enc=dict(wqkv=e_wqkv, bqkv=e_bqkv, wo=e_wo, bo=e_bo,
                 n1g=e_n1g, n1b=e_n1b,
                 w1=w((D, 2 * D)), b1=w((1, 2 * D)),
                 w2=w((2 * D, D)), b2=w((1, D)),
                 n2g=e_n2g, n2b=e_n2b),
        # decoder_1 and decoder_2 share this layer (deepcopy of same instance)
        dec=dict(sa_wqkv=s_wqkv, sa_bqkv=s_bqkv, sa_wo=s_wo, sa_bo=s_bo,
                 n1g=d_n1g, n1b=d_n1b,
                 ca_wqkv=c_wqkv, ca_bqkv=c_bqkv, ca_wo=c_wo, ca_bo=c_bo,
                 n2g=d_n2g, n2b=d_n2b,
                 w1=w((D, 2 * D)), b1=w((1, 2 * D)),
                 w2=w((2 * D, D)), b2=w((1, D)),
                 n3g=d_n3g, n3b=d_n3b),
        head=dict(w3d=w((D, out3d)), b3d=w((1, out3d)),
                  we1a=w((out3d, D)), we1b=w((D, D)), be1=w((1, D)),
                  we2=w((D, out_emo)), be2=w((1, out_emo))),
    )


# ----------------------------------------------------------------------------
# Decoder.forward (offline path: online=False, past_reaction_* = None)
# ----------------------------------------------------------------------------

def decoder_forward(params, encoded_feature, sample_key, *, nhead=4, max_seq_len=16):
    B, T, D = encoded_feature.shape
    TL = T                                       # offline: TL == TS
    # The in-kernel mask assumes T <= period (ALiBi term is exactly zero),
    # which is always true in the reference (period == max_seq_len).
    assert TL <= max_seq_len, "TL must be <= max_seq_len (== ALiBi period)"

    time_queries = sinusoidal_pe(max_seq_len, D)[:TL]       # PE(zeros) == PE
    eps = jax.random.normal(sample_key, (B, 1, D), jnp.float32)

    vae, enc, dec, head = params["vae"], params["enc"], params["dec"], params["head"]
    consts = [
        vae["tokens"], vae["wv"], vae["bv"],
        enc["wqkv"], enc["bqkv"], enc["wo"], enc["bo"],
        enc["n1g"], enc["n1b"], enc["w1"], enc["b1"], enc["w2"], enc["b2"],
        enc["n2g"], enc["n2b"],
        dec["sa_wqkv"], dec["sa_bqkv"], dec["sa_wo"], dec["sa_bo"],
        dec["n1g"], dec["n1b"],
        dec["ca_wqkv"], dec["ca_bqkv"], dec["ca_wo"], dec["ca_bo"],
        dec["n2g"], dec["n2b"],
        dec["w1"], dec["b1"], dec["w2"], dec["b2"],
        dec["n3g"], dec["n3b"],
        head["w3d"], head["b3d"], head["we1a"], head["we1b"], head["be1"],
        head["we2"], head["be2"],
    ]
    out3d_dim = head["w3d"].shape[1]
    emo_dim = head["we2"].shape[1]

    mu_std, head_out = pl.pallas_call(
        functools.partial(_decoder_fused_kernel, nhead=nhead),
        out_shape=(jax.ShapeDtypeStruct((B, 2, D), jnp.float32),
                   jax.ShapeDtypeStruct((B, TL, out3d_dim + emo_dim), jnp.float32)),
        grid=(B,),
        in_specs=[pl.BlockSpec((None, T, D), lambda b: (b, 0, 0)),     # feat[b]
                  pl.BlockSpec((None, 1, D), lambda b: (b, 0, 0)),     # eps[b]
                  pl.BlockSpec((TL, D), lambda b: (0, 0))]             # time queries
                 + [_const_spec(w) for w in consts],
        out_specs=(pl.BlockSpec((None, 2, D), lambda b: (b, 0, 0)),
                   pl.BlockSpec((None, TL, out3d_dim + emo_dim),
                                lambda b: (b, 0, 0))),
        compiler_params=pltpu.CompilerParams(
            dimension_semantics=("parallel",)),
    )(encoded_feature, eps, time_queries, *consts)

    mu = mu_std[:, 0]
    std = mu_std[:, 1]
    out3d = head_out[:, :, :out3d_dim]
    emo = head_out[:, :, out3d_dim:]
    # dist returned as (mu, std) instead of a torch.distributions.Normal object.
    return out3d, emo, (mu, std)


# ----------------------------------------------------------------------------

if __name__ == "__main__":
    B, T = 2, 8
    FEATURE_DIM = 32          # feature_dim (d_model), 4 heads -> head_dim 8
    NHEAD = 4
    OUT_3DMM = 12             # output_3dmm_dim (small synthetic size)
    OUT_EMO = 6               # output_emotion_dim (small synthetic size)
    MAX_SEQ_LEN = 16

    key = jax.random.PRNGKey(0)
    pkey, xkey, skey = jax.random.split(key, 3)
    params = init_params(pkey, FEATURE_DIM, OUT_3DMM, OUT_EMO)
    encoded_feature = jax.random.normal(xkey, (B, T, FEATURE_DIM), jnp.float32)

    fwd = jax.jit(functools.partial(decoder_forward, nhead=NHEAD,
                                    max_seq_len=MAX_SEQ_LEN))
    out3d, emo, (mu, std) = fwd(params, encoded_feature, skey)
    jax.block_until_ready((out3d, emo, mu, std))

    assert out3d.shape == (B, T, OUT_3DMM)
    assert emo.shape == (B, T, OUT_EMO)
    assert mu.shape == (B, FEATURE_DIM) and std.shape == (B, FEATURE_DIM)
    assert bool(jnp.all(jnp.isfinite(out3d))) and bool(jnp.all(jnp.isfinite(emo)))
    assert bool(jnp.all(jnp.isfinite(mu))) and bool(jnp.all(std > 0))
    print("KERNEL_OK")
</pallas_src>

<mosaic_0001>
module attributes {stable_mosaic.version = 11 : i64} {
  func.func @_decoder_fused_kernel(%arg0: i32, %arg1: memref<1x8x32xf32, #tpu.memory_space<vmem>>, %arg2: memref<1x1x32xf32, #tpu.memory_space<vmem>>, %arg3: memref<8x32xf32, #tpu.memory_space<vmem>>, %arg4: memref<2x32xf32, #tpu.memory_space<vmem>>, %arg5: memref<32x32xf32, #tpu.memory_space<vmem>>, %arg6: memref<1x32xf32, #tpu.memory_space<vmem>>, %arg7: memref<32x96xf32, #tpu.memory_space<vmem>>, %arg8: memref<1x96xf32, #tpu.memory_space<vmem>>, %arg9: memref<32x32xf32, #tpu.memory_space<vmem>>, %arg10: memref<1x32xf32, #tpu.memory_space<vmem>>, %arg11: memref<1x32xf32, #tpu.memory_space<vmem>>, %arg12: memref<1x32xf32, #tpu.memory_space<vmem>>, %arg13: memref<32x64xf32, #tpu.memory_space<vmem>>, %arg14: memref<1x64xf32, #tpu.memory_space<vmem>>, %arg15: memref<64x32xf32, #tpu.memory_space<vmem>>, %arg16: memref<1x32xf32, #tpu.memory_space<vmem>>, %arg17: memref<1x32xf32, #tpu.memory_space<vmem>>, %arg18: memref<1x32xf32, #tpu.memory_space<vmem>>, %arg19: memref<32x96xf32, #tpu.memory_space<vmem>>, %arg20: memref<1x96xf32, #tpu.memory_space<vmem>>, %arg21: memref<32x32xf32, #tpu.memory_space<vmem>>, %arg22: memref<1x32xf32, #tpu.memory_space<vmem>>, %arg23: memref<1x32xf32, #tpu.memory_space<vmem>>, %arg24: memref<1x32xf32, #tpu.memory_space<vmem>>, %arg25: memref<32x96xf32, #tpu.memory_space<vmem>>, %arg26: memref<1x96xf32, #tpu.memory_space<vmem>>, %arg27: memref<32x32xf32, #tpu.memory_space<vmem>>, %arg28: memref<1x32xf32, #tpu.memory_space<vmem>>, %arg29: memref<1x32xf32, #tpu.memory_space<vmem>>, %arg30: memref<1x32xf32, #tpu.memory_space<vmem>>, %arg31: memref<32x64xf32, #tpu.memory_space<vmem>>, %arg32: memref<1x64xf32, #tpu.memory_space<vmem>>, %arg33: memref<64x32xf32, #tpu.memory_space<vmem>>, %arg34: memref<1x32xf32, #tpu.memory_space<vmem>>, %arg35: memref<1x32xf32, #tpu.memory_space<vmem>>, %arg36: memref<1x32xf32, #tpu.memory_space<vmem>>, %arg37: memref<32x12xf32, #tpu.memory_space<vmem>>, %arg38: memref<1x12xf32, #tpu.memory_space<vmem>>, %arg39: memref<12x32xf32, #tpu.memory_space<vmem>>, %arg40: memref<32x32xf32, #tpu.memory_space<vmem>>, %arg41: memref<1x32xf32, #tpu.memory_space<vmem>>, %arg42: memref<32x6xf32, #tpu.memory_space<vmem>>, %arg43: memref<1x6xf32, #tpu.memory_space<vmem>>, %arg44: memref<1x2x32xf32, #tpu.memory_space<vmem>>, %arg45: memref<1x8x18xf32, #tpu.memory_space<vmem>>) attributes {dimension_semantics = [#tpu.dimension_semantics<parallel>], iteration_bounds = array<i64: 2>, scalar_prefetch = 0 : i64, scratch_operands = 0 : i64, tpu.core_type = #tpu.core_type<tc>, window_params = [{transform_indices = @transform_0, window_bounds = array<i64: 1, 8, 32>}, {transform_indices = @transform_1, window_bounds = array<i64: 1, 1, 32>}, {pipeline_mode = #tpu.pipeline_mode<synchronous>, transform_indices = @transform_2, window_bounds = array<i64: 8, 32>}, {pipeline_mode = #tpu.pipeline_mode<synchronous>, transform_indices = @transform_3, window_bounds = array<i64: 2, 32>}, {pipeline_mode = #tpu.pipeline_mode<synchronous>, transform_indices = @transform_4, window_bounds = array<i64: 32, 32>}, {pipeline_mode = #tpu.pipeline_mode<synchronous>, transform_indices = @transform_5, window_bounds = array<i64: 1, 32>}, {pipeline_mode = #tpu.pipeline_mode<synchronous>, transform_indices = @transform_6, window_bounds = array<i64: 32, 96>}, {pipeline_mode = #tpu.pipeline_mode<synchronous>, transform_indices = @transform_7, window_bounds = array<i64: 1, 96>}, {pipeline_mode = #tpu.pipeline_mode<synchronous>, transform_indices = @transform_8, window_bounds = array<i64: 32, 32>}, {pipeline_mode = #tpu.pipeline_mode<synchronous>, transform_indices = @transform_9, window_bounds = array<i64: 1, 32>}, {pipeline_mode = #tpu.pipeline_mode<synchronous>, transform_indices = @transform_10, window_bounds = array<i64: 1, 32>}, {pipeline_mode = #tpu.pipeline_mode<synchronous>, transform_indices = @transform_11, window_bounds = array<i64: 1, 32>}, {pipeline_mode = #tpu.pipeline_mode<synchronous>, transform_indices = @transform_12, window_bounds = array<i64: 32, 64>}, {pipeline_mode = #tpu.pipeline_mode<synchronous>, transform_indices = @transform_13, window_bounds = array<i64: 1, 64>}, {pipeline_mode = #tpu.pipeline_mode<synchronous>, transform_indices = @transform_14, window_bounds = array<i64: 64, 32>}, {pipeline_mode = #tpu.pipeline_mode<synchronous>, transform_indices = @transform_15, window_bounds = array<i64: 1, 32>}, {pipeline_mode = #tpu.pipeline_mode<synchronous>, transform_indices = @transform_16, window_bounds = array<i64: 1, 32>}, {pipeline_mode = #tpu.pipeline_mode<synchronous>, transform_indices = @transform_17, window_bounds = array<i64: 1, 32>}, {pipeline_mode = #tpu.pipeline_mode<synchronous>, transform_indices = @transform_18, window_bounds = array<i64: 32, 96>}, {pipeline_mode = #tpu.pipeline_mode<synchronous>, transform_indices = @transform_19, window_bounds = array<i64: 1, 96>}, {pipeline_mode = #tpu.pipeline_mode<synchronous>, transform_indices = @transform_20, window_bounds = array<i64: 32, 32>}, {pipeline_mode = #tpu.pipeline_mode<synchronous>, transform_indices = @transform_21, window_bounds = array<i64: 1, 32>}, {pipeline_mode = #tpu.pipeline_mode<synchronous>, transform_indices = @transform_22, window_bounds = array<i64: 1, 32>}, {pipeline_mode = #tpu.pipeline_mode<synchronous>, transform_indices = @transform_23, window_bounds = array<i64: 1, 32>}, {pipeline_mode = #tpu.pipeline_mode<synchronous>, transform_indices = @transform_24, window_bounds = array<i64: 32, 96>}, {pipeline_mode = #tpu.pipeline_mode<synchronous>, transform_indices = @transform_25, window_bounds = array<i64: 1, 96>}, {pipeline_mode = #tpu.pipeline_mode<synchronous>, transform_indices = @transform_26, window_bounds = array<i64: 32, 32>}, {pipeline_mode = #tpu.pipeline_mode<synchronous>, transform_indices = @transform_27, window_bounds = array<i64: 1, 32>}, {pipeline_mode = #tpu.pipeline_mode<synchronous>, transform_indices = @transform_28, window_bounds = array<i64: 1, 32>}, {pipeline_mode = #tpu.pipeline_mode<synchronous>, transform_indices = @transform_29, window_bounds = array<i64: 1, 32>}, {pipeline_mode = #tpu.pipeline_mode<synchronous>, transform_indices = @transform_30, window_bounds = array<i64: 32, 64>}, {pipeline_mode = #tpu.pipeline_mode<synchronous>, transform_indices = @transform_31, window_bounds = array<i64: 1, 64>}, {pipeline_mode = #tpu.pipeline_mode<synchronous>, transform_indices = @transform_32, window_bounds = array<i64: 64, 32>}, {pipeline_mode = #tpu.pipeline_mode<synchronous>, transform_indices = @transform_33, window_bounds = array<i64: 1, 32>}, {pipeline_mode = #tpu.pipeline_mode<synchronous>, transform_indices = @transform_34, window_bounds = array<i64: 1, 32>}, {pipeline_mode = #tpu.pipeline_mode<synchronous>, transform_indices = @transform_35, window_bounds = array<i64: 1, 32>}, {pipeline_mode = #tpu.pipeline_mode<synchronous>, transform_indices = @transform_36, window_bounds = array<i64: 32, 12>}, {pipeline_mode = #tpu.pipeline_mode<synchronous>, transform_indices = @transform_37, window_bounds = array<i64: 1, 12>}, {pipeline_mode = #tpu.pipeline_mode<synchronous>, transform_indices = @transform_38, window_bounds = array<i64: 12, 32>}, {pipeline_mode = #tpu.pipeline_mode<synchronous>, transform_indices = @transform_39, window_bounds = array<i64: 32, 32>}, {pipeline_mode = #tpu.pipeline_mode<synchronous>, transform_indices = @transform_40, window_bounds = array<i64: 1, 32>}, {pipeline_mode = #tpu.pipeline_mode<synchronous>, transform_indices = @transform_41, window_bounds = array<i64: 32, 6>}, {pipeline_mode = #tpu.pipeline_mode<synchronous>, transform_indices = @transform_42, window_bounds = array<i64: 1, 6>}, {transform_indices = @transform_43, window_bounds = array<i64: 1, 2, 32>}, {transform_indices = @transform_44, window_bounds = array<i64: 1, 8, 18>}]} {
    %c0 = arith.constant 0 : index
    %c0_0 = arith.constant 0 : index
    %0 = vector.load %arg4[%c0, %c0_0] : memref<2x32xf32, #tpu.memory_space<vmem>>, vector<2x32xf32>
    %c0_1 = arith.constant 0 : index
    %c0_2 = arith.constant 0 : index
    %c0_3 = arith.constant 0 : index
    %1 = vector.load %arg1[%c0_1, %c0_2, %c0_3] : memref<1x8x32xf32, #tpu.memory_space<vmem>>, vector<1x8x32xf32>
    %2 = vector.shape_cast %1 : vector<1x8x32xf32> to vector<8x32xf32>
    %c0_4 = arith.constant 0 : index
    %c0_5 = arith.constant 0 : index
    %3 = vector.load %arg5[%c0_4, %c0_5] : memref<32x32xf32, #tpu.memory_space<vmem>>, vector<32x32xf32>
    %cst = arith.constant dense<0.000000e+00> : vector<8x32xf32>
    %4 = tpu.matmul %2, %3, %cst {dimension_numbers = #tpu.dot_dimension_numbers<[1], [0], [0], [1], [0, 0, 1, 1], [], []>} : vector<8x32xf32>, vector<32x32xf32>, vector<8x32xf32> -> vector<8x32xf32>
    %c0_6 = arith.constant 0 : index
    %c0_7 = arith.constant 0 : index
    %5 = vector.load %arg6[%c0_6, %c0_7] : memref<1x32xf32, #tpu.memory_space<vmem>>, vector<1x32xf32>
    %6 = vector.broadcast %5 : vector<1x32xf32> to vector<8x32xf32>
    %7 = arith.addf %4, %6 : vector<8x32xf32>
    %c0_8 = arith.constant 0 : index
    %c0_9 = arith.constant 0 : index
    %8 = vector.load %arg7[%c0_8, %c0_9] : memref<32x96xf32, #tpu.memory_space<vmem>>, vector<32x96xf32>
    %c0_10 = arith.constant 0 : index
    %c0_11 = arith.constant 0 : index
    %9 = vector.load %arg8[%c0_10, %c0_11] : memref<1x96xf32, #tpu.memory_space<vmem>>, vector<1x96xf32>
    %c0_12 = arith.constant 0 : index
    %c0_13 = arith.constant 0 : index
    %10 = vector.load %arg9[%c0_12, %c0_13] : memref<32x32xf32, #tpu.memory_space<vmem>>, vector<32x32xf32>
    %c0_14 = arith.constant 0 : index
    %c0_15 = arith.constant 0 : index
    %11 = vector.load %arg10[%c0_14, %c0_15] : memref<1x32xf32, #tpu.memory_space<vmem>>, vector<1x32xf32>
    %cst_16 = arith.constant dense<0.000000e+00> : vector<2x96xf32>
    %12 = tpu.matmul %0, %8, %cst_16 {dimension_numbers = #tpu.dot_dimension_numbers<[1], [0], [0], [1], [0, 0, 1, 1], [], []>} : vector<2x32xf32>, vector<32x96xf32>, vector<2x96xf32> -> vector<2x96xf32>
    %13 = vector.broadcast %9 : vector<1x96xf32> to vector<2x96xf32>
    %14 = arith.addf %12, %13 : vector<2x96xf32>
    %15 = vector.extract_strided_slice %8 {offsets = [0, 32], sizes = [32, 64], strides = [1, 1]} : vector<32x96xf32> to vector<32x64xf32>
    %cst_17 = arith.constant dense<0.000000e+00> : vector<8x64xf32>
    %16 = tpu.matmul %7, %15, %cst_17 {dimension_numbers = #tpu.dot_dimension_numbers<[1], [0], [0], [1], [0, 0, 1, 1], [], []>} : vector<8x32xf32>, vector<32x64xf32>, vector<8x64xf32> -> vector<8x64xf32>
    %17 = vector.extract_strided_slice %9 {offsets = [0, 32], sizes = [1, 64], strides = [1, 1]} : vector<1x96xf32> to vector<1x64xf32>
    %18 = vector.broadcast %17 : vector<1x64xf32> to vector<8x64xf32>
    %19 = arith.addf %16, %18 : vector<8x64xf32>
    %cst_18 = arith.constant 0.000000e+00 : f32
    %20 = vector.broadcast %cst_18 : f32 to vector<2x32xf32>
    %21 = vector.broadcast %11 : vector<1x32xf32> to vector<2x32xf32>
    %22 = arith.addf %20, %21 : vector<2x32xf32>
    %23 = vector.extract_strided_slice %14 {offsets = [0, 0], sizes = [2, 8], strides = [1, 1]} : vector<2x96xf32> to vector<2x8xf32>
    %24 = vector.extract_strided_slice %14 {offsets = [0, 32], sizes = [2, 8], strides = [1, 1]} : vector<2x96xf32> to vector<2x8xf32>
    %25 = vector.extract_strided_slice %14 {offsets = [0, 64], sizes = [2, 8], strides = [1, 1]} : vector<2x96xf32> to vector<2x8xf32>
    %26 = vector.extract_strided_slice %19 {offsets = [0, 0], sizes = [8, 8], strides = [1, 1]} : vector<8x64xf32> to vector<8x8xf32>
    %27 = vector.extract_strided_slice %19 {offsets = [0, 32], sizes = [8, 8], strides = [1, 1]} : vector<8x64xf32> to vector<8x8xf32>
    %cst_19 = arith.constant dense<0.000000e+00> : vector<2x2xf32>
    %28 = tpu.matmul %23, %24, %cst_19 {dimension_numbers = #tpu.dot_dimension_numbers<[1], [1], [0], [0], [0, 0, 1, 0], [], []>} : vector<2x8xf32>, vector<2x8xf32>, vector<2x2xf32> -> vector<2x2xf32>
    %cst_20 = arith.constant 0.353553385 : f32
    %29 = vector.broadcast %cst_20 : f32 to vector<2x2xf32>
    %30 = arith.mulf %28, %29 : vector<2x2xf32>
    %cst_21 = arith.constant dense<0.000000e+00> : vector<2x8xf32>
    %31 = tpu.matmul %23, %26, %cst_21 {dimension_numbers = #tpu.dot_dimension_numbers<[1], [1], [0], [0], [0, 0, 1, 0], [], []>} : vector<2x8xf32>, vector<8x8xf32>, vector<2x8xf32> -> vector<2x8xf32>
    %cst_22 = arith.constant 0.353553385 : f32
    %32 = vector.broadcast %cst_22 : f32 to vector<2x8xf32>
    %33 = arith.mulf %31, %32 : vector<2x8xf32>
    %cst_23 = arith.constant dense<0xFF800000> : vector<2xf32>
    %34 = vector.multi_reduction <maximumf>, %30, %cst_23 [1] : vector<2x2xf32> to vector<2xf32>
    %35 = vector.shape_cast %34 : vector<2xf32> to vector<2x1xf32>
    %cst_24 = arith.constant dense<0xFF800000> : vector<2xf32>
    %36 = vector.multi_reduction <maximumf>, %33, %cst_24 [1] : vector<2x8xf32> to vector<2xf32>
    %37 = vector.shape_cast %36 : vector<2xf32> to vector<2x1xf32>
    %38 = arith.maximumf %35, %37 : vector<2x1xf32>
    %39 = vector.broadcast %38 : vector<2x1xf32> to vector<2x2xf32>
    %40 = arith.subf %30, %39 : vector<2x2xf32>
    %41 = math.exp %40 : vector<2x2xf32>
    %42 = vector.broadcast %38 : vector<2x1xf32> to vector<2x8xf32>
    %43 = arith.subf %33, %42 : vector<2x8xf32>
    %44 = math.exp %43 : vector<2x8xf32>
    %cst_25 = arith.constant dense<0.000000e+00> : vector<2xf32>
    %45 = vector.multi_reduction <add>, %41, %cst_25 [1] : vector<2x2xf32> to vector<2xf32>
    %46 = vector.shape_cast %45 : vector<2xf32> to vector<2x1xf32>
    %cst_26 = arith.constant dense<0.000000e+00> : vector<2xf32>
    %47 = vector.multi_reduction <add>, %44, %cst_26 [1] : vector<2x8xf32> to vector<2xf32>
    %48 = vector.shape_cast %47 : vector<2xf32> to vector<2x1xf32>
    %49 = arith.addf %46, %48 : vector<2x1xf32>
    %cst_27 = arith.constant dense<0.000000e+00> : vector<2x8xf32>
    %50 = tpu.matmul %41, %25, %cst_27 {dimension_numbers = #tpu.dot_dimension_numbers<[1], [0], [0], [1], [0, 0, 1, 1], [], []>} : vector<2x2xf32>, vector<2x8xf32>, vector<2x8xf32> -> vector<2x8xf32>
    %cst_28 = arith.constant dense<0.000000e+00> : vector<2x8xf32>
    %51 = tpu.matmul %44, %27, %cst_28 {dimension_numbers = #tpu.dot_dimension_numbers<[1], [0], [0], [1], [0, 0, 1, 1], [], []>} : vector<2x8xf32>, vector<8x8xf32>, vector<2x8xf32> -> vector<2x8xf32>
    %52 = arith.addf %50, %51 : vector<2x8xf32>
    %53 = tpu.reciprocal %49 {approx = true} : vector<2x1xf32> -> vector<2x1xf32>
    %54 = vector.broadcast %53 : vector<2x1xf32> to vector<2x8xf32>
    %55 = arith.mulf %52, %54 : vector<2x8xf32>
    %56 = vector.extract_strided_slice %10 {offsets = [0, 0], sizes = [8, 32], strides = [1, 1]} : vector<32x32xf32> to vector<8x32xf32>
    %cst_29 = arith.constant dense<0.000000e+00> : vector<2x32xf32>
    %57 = tpu.matmul %55, %56, %cst_29 {dimension_numbers = #tpu.dot_dimension_numbers<[1], [0], [0], [1], [0, 0, 1, 1], [], []>} : vector<2x8xf32>, vector<8x32xf32>, vector<2x32xf32> -> vector<2x32xf32>
    %58 = arith.addf %22, %57 : vector<2x32xf32>
    %59 = vector.extract_strided_slice %14 {offsets = [0, 8], sizes = [2, 8], strides = [1, 1]} : vector<2x96xf32> to vector<2x8xf32>
    %60 = vector.extract_strided_slice %14 {offsets = [0, 40], sizes = [2, 8], strides = [1, 1]} : vector<2x96xf32> to vector<2x8xf32>
    %61 = vector.extract_strided_slice %14 {offsets = [0, 72], sizes = [2, 8], strides = [1, 1]} : vector<2x96xf32> to vector<2x8xf32>
    %62 = vector.extract_strided_slice %19 {offsets = [0, 8], sizes = [8, 8], strides = [1, 1]} : vector<8x64xf32> to vector<8x8xf32>
    %63 = vector.extract_strided_slice %19 {offsets = [0, 40], sizes = [8, 8], strides = [1, 1]} : vector<8x64xf32> to vector<8x8xf32>
    %cst_30 = arith.constant dense<0.000000e+00> : vector<2x2xf32>
    %64 = tpu.matmul %59, %60, %cst_30 {dimension_numbers = #tpu.dot_dimension_numbers<[1], [1], [0], [0], [0, 0, 1, 0], [], []>} : vector<2x8xf32>, vector<2x8xf32>, vector<2x2xf32> -> vector<2x2xf32>
    %cst_31 = arith.constant 0.353553385 : f32
    %65 = vector.broadcast %cst_31 : f32 to vector<2x2xf32>
    %66 = arith.mulf %64, %65 : vector<2x2xf32>
    %cst_32 = arith.constant dense<0.000000e+00> : vector<2x8xf32>
    %67 = tpu.matmul %59, %62, %cst_32 {dimension_numbers = #tpu.dot_dimension_numbers<[1], [1], [0], [0], [0, 0, 1, 0], [], []>} : vector<2x8xf32>, vector<8x8xf32>, vector<2x8xf32> -> vector<2x8xf32>
    %cst_33 = arith.constant 0.353553385 : f32
    %68 = vector.broadcast %cst_33 : f32 to vector<2x8xf32>
    %69 = arith.mulf %67, %68 : vector<2x8xf32>
    %cst_34 = arith.constant dense<0xFF800000> : vector<2xf32>
    %70 = vector.multi_reduction <maximumf>, %66, %cst_34 [1] : vector<2x2xf32> to vector<2xf32>
    %71 = vector.shape_cast %70 : vector<2xf32> to vector<2x1xf32>
    %cst_35 = arith.constant dense<0xFF800000> : vector<2xf32>
    %72 = vector.multi_reduction <maximumf>, %69, %cst_35 [1] : vector<2x8xf32> to vector<2xf32>
    %73 = vector.shape_cast %72 : vector<2xf32> to vector<2x1xf32>
    %74 = arith.maximumf %71, %73 : vector<2x1xf32>
    %75 = vector.broadcast %74 : vector<2x1xf32> to vector<2x2xf32>
    %76 = arith.subf %66, %75 : vector<2x2xf32>
    %77 = math.exp %76 : vector<2x2xf32>
    %78 = vector.broadcast %74 : vector<2x1xf32> to vector<2x8xf32>
    %79 = arith.subf %69, %78 : vector<2x8xf32>
    %80 = math.exp %79 : vector<2x8xf32>
    %cst_36 = arith.constant dense<0.000000e+00> : vector<2xf32>
    %81 = vector.multi_reduction <add>, %77, %cst_36 [1] : vector<2x2xf32> to vector<2xf32>
    %82 = vector.shape_cast %81 : vector<2xf32> to vector<2x1xf32>
    %cst_37 = arith.constant dense<0.000000e+00> : vector<2xf32>
    %83 = vector.multi_reduction <add>, %80, %cst_37 [1] : vector<2x8xf32> to vector<2xf32>
    %84 = vector.shape_cast %83 : vector<2xf32> to vector<2x1xf32>
    %85 = arith.addf %82, %84 : vector<2x1xf32>
    %cst_38 = arith.constant dense<0.000000e+00> : vector<2x8xf32>
    %86 = tpu.matmul %77, %61, %cst_38 {dimension_numbers = #tpu.dot_dimension_numbers<[1], [0], [0], [1], [0, 0, 1, 1], [], []>} : vector<2x2xf32>, vector<2x8xf32>, vector<2x8xf32> -> vector<2x8xf32>
    %cst_39 = arith.constant dense<0.000000e+00> : vector<2x8xf32>
    %87 = tpu.matmul %80, %63, %cst_39 {dimension_numbers = #tpu.dot_dimension_numbers<[1], [0], [0], [1], [0, 0, 1, 1], [], []>} : vector<2x8xf32>, vector<8x8xf32>, vector<2x8xf32> -> vector<2x8xf32>
    %88 = arith.addf %86, %87 : vector<2x8xf32>
    %89 = tpu.reciprocal %85 {approx = true} : vector<2x1xf32> -> vector<2x1xf32>
    %90 = vector.broadcast %89 : vector<2x1xf32> to vector<2x8xf32>
    %91 = arith.mulf %88, %90 : vector<2x8xf32>
    %92 = vector.extract_strided_slice %10 {offsets = [8, 0], sizes = [8, 32], strides = [1, 1]} : vector<32x32xf32> to vector<8x32xf32>
    %cst_40 = arith.constant dense<0.000000e+00> : vector<2x32xf32>
    %93 = tpu.matmul %91, %92, %cst_40 {dimension_numbers = #tpu.dot_dimension_numbers<[1], [0], [0], [1], [0, 0, 1, 1], [], []>} : vector<2x8xf32>, vector<8x32xf32>, vector<2x32xf32> -> vector<2x32xf32>
    %94 = arith.addf %58, %93 : vector<2x32xf32>
    %95 = vector.extract_strided_slice %14 {offsets = [0, 16], sizes = [2, 8], strides = [1, 1]} : vector<2x96xf32> to vector<2x8xf32>
    %96 = vector.extract_strided_slice %14 {offsets = [0, 48], sizes = [2, 8], strides = [1, 1]} : vector<2x96xf32> to vector<2x8xf32>
    %97 = vector.extract_strided_slice %14 {offsets = [0, 80], sizes = [2, 8], strides = [1, 1]} : vector<2x96xf32> to vector<2x8xf32>
    %98 = vector.extract_strided_slice %19 {offsets = [0, 16], sizes = [8, 8], strides = [1, 1]} : vector<8x64xf32> to vector<8x8xf32>
    %99 = vector.extract_strided_slice %19 {offsets = [0, 48], sizes = [8, 8], strides = [1, 1]} : vector<8x64xf32> to vector<8x8xf32>
    %cst_41 = arith.constant dense<0.000000e+00> : vector<2x2xf32>
    %100 = tpu.matmul %95, %96, %cst_41 {dimension_numbers = #tpu.dot_dimension_numbers<[1], [1], [0], [0], [0, 0, 1, 0], [], []>} : vector<2x8xf32>, vector<2x8xf32>, vector<2x2xf32> -> vector<2x2xf32>
    %cst_42 = arith.constant 0.353553385 : f32
    %101 = vector.broadcast %cst_42 : f32 to vector<2x2xf32>
    %102 = arith.mulf %100, %101 : vector<2x2xf32>
    %cst_43 = arith.constant dense<0.000000e+00> : vector<2x8xf32>
    %103 = tpu.matmul %95, %98, %cst_43 {dimension_numbers = #tpu.dot_dimension_numbers<[1], [1], [0], [0], [0, 0, 1, 0], [], []>} : vector<2x8xf32>, vector<8x8xf32>, vector<2x8xf32> -> vector<2x8xf32>
    %cst_44 = arith.constant 0.353553385 : f32
    %104 = vector.broadcast %cst_44 : f32 to vector<2x8xf32>
    %105 = arith.mulf %103, %104 : vector<2x8xf32>
    %cst_45 = arith.constant dense<0xFF800000> : vector<2xf32>
    %106 = vector.multi_reduction <maximumf>, %102, %cst_45 [1] : vector<2x2xf32> to vector<2xf32>
    %107 = vector.shape_cast %106 : vector<2xf32> to vector<2x1xf32>
    %cst_46 = arith.constant dense<0xFF800000> : vector<2xf32>
    %108 = vector.multi_reduction <maximumf>, %105, %cst_46 [1] : vector<2x8xf32> to vector<2xf32>
    %109 = vector.shape_cast %108 : vector<2xf32> to vector<2x1xf32>
    %110 = arith.maximumf %107, %109 : vector<2x1xf32>
    %111 = vector.broadcast %110 : vector<2x1xf32> to vector<2x2xf32>
    %112 = arith.subf %102, %111 : vector<2x2xf32>
    %113 = math.exp %112 : vector<2x2xf32>
    %114 = vector.broadcast %110 : vector<2x1xf32> to vector<2x8xf32>
    %115 = arith.subf %105, %114 : vector<2x8xf32>
    %116 = math.exp %115 : vector<2x8xf32>
    %cst_47 = arith.constant dense<0.000000e+00> : vector<2xf32>
    %117 = vector.multi_reduction <add>, %113, %cst_47 [1] : vector<2x2xf32> to vector<2xf32>
    %118 = vector.shape_cast %117 : vector<2xf32> to vector<2x1xf32>
    %cst_48 = arith.constant dense<0.000000e+00> : vector<2xf32>
    %119 = vector.multi_reduction <add>, %116, %cst_48 [1] : vector<2x8xf32> to vector<2xf32>
    %120 = vector.shape_cast %119 : vector<2xf32> to vector<2x1xf32>
    %121 = arith.addf %118, %120 : vector<2x1xf32>
    %cst_49 = arith.constant dense<0.000000e+00> : vector<2x8xf32>
    %122 = tpu.matmul %113, %97, %cst_49 {dimension_numbers = #tpu.dot_dimension_numbers<[1], [0], [0], [1], [0, 0, 1, 1], [], []>} : vector<2x2xf32>, vector<2x8xf32>, vector<2x8xf32> -> vector<2x8xf32>
    %cst_50 = arith.constant dense<0.000000e+00> : vector<2x8xf32>
    %123 = tpu.matmul %116, %99, %cst_50 {dimension_numbers = #tpu.dot_dimension_numbers<[1], [0], [0], [1], [0, 0, 1, 1], [], []>} : vector<2x8xf32>, vector<8x8xf32>, vector<2x8xf32> -> vector<2x8xf32>
    %124 = arith.addf %122, %123 : vector<2x8xf32>
    %125 = tpu.reciprocal %121 {approx = true} : vector<2x1xf32> -> vector<2x1xf32>
    %126 = vector.broadcast %125 : vector<2x1xf32> to vector<2x8xf32>
    %127 = arith.mulf %124, %126 : vector<2x8xf32>
    %128 = vector.extract_strided_slice %10 {offsets = [16, 0], sizes = [8, 32], strides = [1, 1]} : vector<32x32xf32> to vector<8x32xf32>
    %cst_51 = arith.constant dense<0.000000e+00> : vector<2x32xf32>
    %129 = tpu.matmul %127, %128, %cst_51 {dimension_numbers = #tpu.dot_dimension_numbers<[1], [0], [0], [1], [0, 0, 1, 1], [], []>} : vector<2x8xf32>, vector<8x32xf32>, vector<2x32xf32> -> vector<2x32xf32>
    %130 = arith.addf %94, %129 : vector<2x32xf32>
    %131 = vector.extract_strided_slice %14 {offsets = [0, 24], sizes = [2, 8], strides = [1, 1]} : vector<2x96xf32> to vector<2x8xf32>
    %132 = vector.extract_strided_slice %14 {offsets = [0, 56], sizes = [2, 8], strides = [1, 1]} : vector<2x96xf32> to vector<2x8xf32>
    %133 = vector.extract_strided_slice %14 {offsets = [0, 88], sizes = [2, 8], strides = [1, 1]} : vector<2x96xf32> to vector<2x8xf32>
    %134 = vector.extract_strided_slice %19 {offsets = [0, 24], sizes = [8, 8], strides = [1, 1]} : vector<8x64xf32> to vector<8x8xf32>
    %135 = vector.extract_strided_slice %19 {offsets = [0, 56], sizes = [8, 8], strides = [1, 1]} : vector<8x64xf32> to vector<8x8xf32>
    %cst_52 = arith.constant dense<0.000000e+00> : vector<2x2xf32>
    %136 = tpu.matmul %131, %132, %cst_52 {dimension_numbers = #tpu.dot_dimension_numbers<[1], [1], [0], [0], [0, 0, 1, 0], [], []>} : vector<2x8xf32>, vector<2x8xf32>, vector<2x2xf32> -> vector<2x2xf32>
    %cst_53 = arith.constant 0.353553385 : f32
    %137 = vector.broadcast %cst_53 : f32 to vector<2x2xf32>
    %138 = arith.mulf %136, %137 : vector<2x2xf32>
    %cst_54 = arith.constant dense<0.000000e+00> : vector<2x8xf32>
    %139 = tpu.matmul %131, %134, %cst_54 {dimension_numbers = #tpu.dot_dimension_numbers<[1], [1], [0], [0], [0, 0, 1, 0], [], []>} : vector<2x8xf32>, vector<8x8xf32>, vector<2x8xf32> -> vector<2x8xf32>
    %cst_55 = arith.constant 0.353553385 : f32
    %140 = vector.broadcast %cst_55 : f32 to vector<2x8xf32>
    %141 = arith.mulf %139, %140 : vector<2x8xf32>
    %cst_56 = arith.constant dense<0xFF800000> : vector<2xf32>
    %142 = vector.multi_reduction <maximumf>, %138, %cst_56 [1] : vector<2x2xf32> to vector<2xf32>
    %143 = vector.shape_cast %142 : vector<2xf32> to vector<2x1xf32>
    %cst_57 = arith.constant dense<0xFF800000> : vector<2xf32>
    %144 = vector.multi_reduction <maximumf>, %141, %cst_57 [1] : vector<2x8xf32> to vector<2xf32>
    %145 = vector.shape_cast %144 : vector<2xf32> to vector<2x1xf32>
    %146 = arith.maximumf %143, %145 : vector<2x1xf32>
    %147 = vector.broadcast %146 : vector<2x1xf32> to vector<2x2xf32>
    %148 = arith.subf %138, %147 : vector<2x2xf32>
    %149 = math.exp %148 : vector<2x2xf32>
    %150 = vector.broadcast %146 : vector<2x1xf32> to vector<2x8xf32>
    %151 = arith.subf %141, %150 : vector<2x8xf32>
    %152 = math.exp %151 : vector<2x8xf32>
    %cst_58 = arith.constant dense<0.000000e+00> : vector<2xf32>
    %153 = vector.multi_reduction <add>, %149, %cst_58 [1] : vector<2x2xf32> to vector<2xf32>
    %154 = vector.shape_cast %153 : vector<2xf32> to vector<2x1xf32>
    %cst_59 = arith.constant dense<0.000000e+00> : vector<2xf32>
    %155 = vector.multi_reduction <add>, %152, %cst_59 [1] : vector<2x8xf32> to vector<2xf32>
    %156 = vector.shape_cast %155 : vector<2xf32> to vector<2x1xf32>
    %157 = arith.addf %154, %156 : vector<2x1xf32>
    %cst_60 = arith.constant dense<0.000000e+00> : vector<2x8xf32>
    %158 = tpu.matmul %149, %133, %cst_60 {dimension_numbers = #tpu.dot_dimension_numbers<[1], [0], [0], [1], [0, 0, 1, 1], [], []>} : vector<2x2xf32>, vector<2x8xf32>, vector<2x8xf32> -> vector<2x8xf32>
    %cst_61 = arith.constant dense<0.000000e+00> : vector<2x8xf32>
    %159 = tpu.matmul %152, %135, %cst_61 {dimension_numbers = #tpu.dot_dimension_numbers<[1], [0], [0], [1], [0, 0, 1, 1], [], []>} : vector<2x8xf32>, vector<8x8xf32>, vector<2x8xf32> -> vector<2x8xf32>
    %160 = arith.addf %158, %159 : vector<2x8xf32>
    %161 = tpu.reciprocal %157 {approx = true} : vector<2x1xf32> -> vector<2x1xf32>
    %162 = vector.broadcast %161 : vector<2x1xf32> to vector<2x8xf32>
    %163 = arith.mulf %160, %162 : vector<2x8xf32>
    %164 = vector.extract_strided_slice %10 {offsets = [24, 0], sizes = [8, 32], strides = [1, 1]} : vector<32x32xf32> to vector<8x32xf32>
    %cst_62 = arith.constant dense<0.000000e+00> : vector<2x32xf32>
    %165 = tpu.matmul %163, %164, %cst_62 {dimension_numbers = #tpu.dot_dimension_numbers<[1], [0], [0], [1], [0, 0, 1, 1], [], []>} : vector<2x8xf32>, vector<8x32xf32>, vector<2x32xf32> -> vector<2x32xf32>
    %166 = arith.addf %130, %165 : vector<2x32xf32>
    %167 = arith.addf %0, %166 : vector<2x32xf32>
    %c0_63 = arith.constant 0 : index
    %c0_64 = arith.constant 0 : index
    %168 = vector.load %arg11[%c0_63, %c0_64] : memref<1x32xf32, #tpu.memory_space<vmem>>, vector<1x32xf32>
    %c0_65 = arith.constant 0 : index
    %c0_66 = arith.constant 0 : index
    %169 = vector.load %arg12[%c0_65, %c0_66] : memref<1x32xf32, #tpu.memory_space<vmem>>, vector<1x32xf32>
    %cst_67 = arith.constant dense<0.000000e+00> : vector<2xf32>
    %170 = vector.multi_reduction <add>, %167, %cst_67 [1] : vector<2x32xf32> to vector<2xf32>
    %171 = vector.shape_cast %170 : vector<2xf32> to vector<2x1xf32>
    %cst_68 = arith.constant 3.200000e+01 : f32
    %172 = vector.broadcast %cst_68 : f32 to vector<2x1xf32>
    %173 = arith.divf %171, %172 : vector<2x1xf32>
    %174 = vector.broadcast %173 : vector<2x1xf32> to vector<2x32xf32>
    %175 = arith.subf %167, %174 : vector<2x32xf32>
    %176 = arith.mulf %175, %175 : vector<2x32xf32>
    %cst_69 = arith.constant dense<0.000000e+00> : vector<2xf32>
    %177 = vector.multi_reduction <add>, %176, %cst_69 [1] : vector<2x32xf32> to vector<2xf32>
    %178 = vector.shape_cast %177 : vector<2xf32> to vector<2x1xf32>
    %cst_70 = arith.constant 3.200000e+01 : f32
    %179 = vector.broadcast %cst_70 : f32 to vector<2x1xf32>
    %180 = arith.divf %178, %179 : vector<2x1xf32>
    %cst_71 = arith.constant 9.99999974E-6 : f32
    %181 = vector.broadcast %cst_71 : f32 to vector<2x1xf32>
    %182 = arith.addf %180, %181 : vector<2x1xf32>
    %183 = math.rsqrt %182 : vector<2x1xf32>
    %184 = vector.broadcast %183 : vector<2x1xf32> to vector<2x32xf32>
    %185 = arith.mulf %175, %184 : vector<2x32xf32>
    %186 = vector.broadcast %168 : vector<1x32xf32> to vector<2x32xf32>
    %187 = arith.mulf %185, %186 : vector<2x32xf32>
    %188 = vector.broadcast %169 : vector<1x32xf32> to vector<2x32xf32>
    %189 = arith.addf %187, %188 : vector<2x32xf32>
    %c0_72 = arith.constant 0 : index
    %c0_73 = arith.constant 0 : index
    %190 = vector.load %arg13[%c0_72, %c0_73] : memref<32x64xf32, #tpu.memory_space<vmem>>, vector<32x64xf32>
    %c0_74 = arith.constant 0 : index
    %c0_75 = arith.constant 0 : index
    %191 = vector.load %arg14[%c0_74, %c0_75] : memref<1x64xf32, #tpu.memory_space<vmem>>, vector<1x64xf32>
    %c0_76 = arith.constant 0 : index
    %c0_77 = arith.constant 0 : index
    %192 = vector.load %arg15[%c0_76, %c0_77] : memref<64x32xf32, #tpu.memory_space<vmem>>, vector<64x32xf32>
    %c0_78 = arith.constant 0 : index
    %c0_79 = arith.constant 0 : index
    %193 = vector.load %arg16[%c0_78, %c0_79] : memref<1x32xf32, #tpu.memory_space<vmem>>, vector<1x32xf32>
    %cst_80 = arith.constant dense<0.000000e+00> : vector<2x64xf32>
    %194 = tpu.matmul %189, %190, %cst_80 {dimension_numbers = #tpu.dot_dimension_numbers<[1], [0], [0], [1], [0, 0, 1, 1], [], []>} : vector<2x32xf32>, vector<32x64xf32>, vector<2x64xf32> -> vector<2x64xf32>
    %195 = vector.broadcast %191 : vector<1x64xf32> to vector<2x64xf32>
    %196 = arith.addf %194, %195 : vector<2x64xf32>
    %cst_81 = arith.constant 0.000000e+00 : f32
    %197 = vector.broadcast %cst_81 : f32 to vector<2x64xf32>
    %198 = arith.maximumf %196, %197 : vector<2x64xf32>
    %cst_82 = arith.constant dense<0.000000e+00> : vector<2x32xf32>
    %199 = tpu.matmul %198, %192, %cst_82 {dimension_numbers = #tpu.dot_dimension_numbers<[1], [0], [0], [1], [0, 0, 1, 1], [], []>} : vector<2x64xf32>, vector<64x32xf32>, vector<2x32xf32> -> vector<2x32xf32>
    %200 = vector.broadcast %193 : vector<1x32xf32> to vector<2x32xf32>
    %201 = arith.addf %199, %200 : vector<2x32xf32>
    %202 = arith.addf %189, %201 : vector<2x32xf32>
    %c0_83 = arith.constant 0 : index
    %c0_84 = arith.constant 0 : index
    %203 = vector.load %arg17[%c0_83, %c0_84] : memref<1x32xf32, #tpu.memory_space<vmem>>, vector<1x32xf32>
    %c0_85 = arith.constant 0 : index
    %c0_86 = arith.constant 0 : index
    %204 = vector.load %arg18[%c0_85, %c0_86] : memref<1x32xf32, #tpu.memory_space<vmem>>, vector<1x32xf32>
    %cst_87 = arith.constant dense<0.000000e+00> : vector<2xf32>
    %205 = vector.multi_reduction <add>, %202, %cst_87 [1] : vector<2x32xf32> to vector<2xf32>
    %206 = vector.shape_cast %205 : vector<2xf32> to vector<2x1xf32>
    %cst_88 = arith.constant 3.200000e+01 : f32
    %207 = vector.broadcast %cst_88 : f32 to vector<2x1xf32>
    %208 = arith.divf %206, %207 : vector<2x1xf32>
    %209 = vector.broadcast %208 : vector<2x1xf32> to vector<2x32xf32>
    %210 = arith.subf %202, %209 : vector<2x32xf32>
    %211 = arith.mulf %210, %210 : vector<2x32xf32>
    %cst_89 = arith.constant dense<0.000000e+00> : vector<2xf32>
    %212 = vector.multi_reduction <add>, %211, %cst_89 [1] : vector<2x32xf32> to vector<2xf32>
    %213 = vector.shape_cast %212 : vector<2xf32> to vector<2x1xf32>
    %cst_90 = arith.constant 3.200000e+01 : f32
    %214 = vector.broadcast %cst_90 : f32 to vector<2x1xf32>
    %215 = arith.divf %213, %214 : vector<2x1xf32>
    %cst_91 = arith.constant 9.99999974E-6 : f32
    %216 = vector.broadcast %cst_91 : f32 to vector<2x1xf32>
    %217 = arith.addf %215, %216 : vector<2x1xf32>
    %218 = math.rsqrt %217 : vector<2x1xf32>
    %219 = vector.broadcast %218 : vector<2x1xf32> to vector<2x32xf32>
    %220 = arith.mulf %210, %219 : vector<2x32xf32>
    %221 = vector.broadcast %203 : vector<1x32xf32> to vector<2x32xf32>
    %222 = arith.mulf %220, %221 : vector<2x32xf32>
    %223 = vector.broadcast %204 : vector<1x32xf32> to vector<2x32xf32>
    %224 = arith.addf %222, %223 : vector<2x32xf32>
    %225 = vector.extract_strided_slice %224 {offsets = [0, 0], sizes = [1, 32], strides = [1, 1]} : vector<2x32xf32> to vector<1x32xf32>
    %226 = vector.extract_strided_slice %224 {offsets = [1, 0], sizes = [1, 32], strides = [1, 1]} : vector<2x32xf32> to vector<1x32xf32>
    %cst_92 = arith.constant 5.000000e-01 : f32
    %227 = vector.broadcast %cst_92 : f32 to vector<1x32xf32>
    %228 = arith.mulf %227, %226 : vector<1x32xf32>
    %229 = math.exp %228 : vector<1x32xf32>
    %c0_93 = arith.constant 0 : index
    %c0_94 = arith.constant 0 : index
    %c0_95 = arith.constant 0 : index
    %230 = vector.load %arg2[%c0_93, %c0_94, %c0_95] : memref<1x1x32xf32, #tpu.memory_space<vmem>>, vector<1x1x32xf32>
    %231 = vector.shape_cast %230 : vector<1x1x32xf32> to vector<1x32xf32>
    %232 = arith.mulf %229, %231 : vector<1x32xf32>
    %233 = arith.addf %225, %232 : vector<1x32xf32>
    %c0_96 = arith.constant 0 : index
    %c0_97 = arith.constant 0 : index
    %c0_98 = arith.constant 0 : index
    %234 = vector.load %arg44[%c0_96, %c0_97, %c0_98] : memref<1x2x32xf32, #tpu.memory_space<vmem>>, vector<1x1x32xf32>
    %235 = vector.shape_cast %234 : vector<1x1x32xf32> to vector<1x32xf32>
    %236 = vector.shape_cast %225 : vector<1x32xf32> to vector<1x1x32xf32>
    tpu.vector_store %arg44[%c0_96, %c0_97, %c0_98], %236 {strides = array<i32>} : memref<1x2x32xf32, #tpu.memory_space<vmem>>, vector<1x1x32xf32>,
    %c0_99 = arith.constant 0 : index
    %c1 = arith.constant 1 : index
    %c0_100 = arith.constant 0 : index
    %237 = vector.load %arg44[%c0_99, %c1, %c0_100] : memref<1x2x32xf32, #tpu.memory_space<vmem>>, vector<1x1x32xf32>
    %238 = vector.shape_cast %237 : vector<1x1x32xf32> to vector<1x32xf32>
    %239 = vector.shape_cast %229 : vector<1x32xf32> to vector<1x1x32xf32>
    tpu.vector_store %arg44[%c0_99, %c1, %c0_100], %239 {strides = array<i32>} : memref<1x2x32xf32, #tpu.memory_space<vmem>>, vector<1x1x32xf32>,
    %c0_101 = arith.constant 0 : index
    %c0_102 = arith.constant 0 : index
    %240 = vector.load %arg3[%c0_101, %c0_102] : memref<8x32xf32, #tpu.memory_space<vmem>>, vector<8x32xf32>
    %241 = tpu.iota {dimensions = array<i32: 0>} : vector<8x8xi32>
    %242 = tpu.iota {dimensions = array<i32: 1>} : vector<8x8xi32>
    %243 = arith.cmpi sle, %242, %241 : vector<8x8xi32>
    %cst_103 = arith.constant 0.000000e+00 : f32
    %cst_104 = arith.constant -1.000000e+09 : f32
    %244 = vector.broadcast %cst_103 : f32 to vector<8x8xf32>
    %245 = vector.broadcast %cst_104 : f32 to vector<8x8xf32>
    %246 = arith.select %243, %244, %245 : vector<8x8xi1>, vector<8x8xf32>
    %c0_105 = arith.constant 0 : index
    %c0_106 = arith.constant 0 : index
    %247 = vector.load %arg19[%c0_105, %c0_106] : memref<32x96xf32, #tpu.memory_space<vmem>>, vector<32x96xf32>
    %c0_107 = arith.constant 0 : index
    %c0_108 = arith.constant 0 : index
    %248 = vector.load %arg20[%c0_107, %c0_108] : memref<1x96xf32, #tpu.memory_space<vmem>>, vector<1x96xf32>
    %c0_109 = arith.constant 0 : index
    %c0_110 = arith.constant 0 : index
    %249 = vector.load %arg21[%c0_109, %c0_110] : memref<32x32xf32, #tpu.memory_space<vmem>>, vector<32x32xf32>
    %c0_111 = arith.constant 0 : index
    %c0_112 = arith.constant 0 : index
    %250 = vector.load %arg22[%c0_111, %c0_112] : memref<1x32xf32, #tpu.memory_space<vmem>>, vector<1x32xf32>
    %cst_113 = arith.constant dense<0.000000e+00> : vector<8x96xf32>
    %251 = tpu.matmul %240, %247, %cst_113 {dimension_numbers = #tpu.dot_dimension_numbers<[1], [0], [0], [1], [0, 0, 1, 1], [], []>} : vector<8x32xf32>, vector<32x96xf32>, vector<8x96xf32> -> vector<8x96xf32>
    %252 = vector.broadcast %248 : vector<1x96xf32> to vector<8x96xf32>
    %253 = arith.addf %251, %252 : vector<8x96xf32>
    %cst_114 = arith.constant 0.000000e+00 : f32
    %254 = vector.broadcast %cst_114 : f32 to vector<8x32xf32>
    %255 = vector.broadcast %250 : vector<1x32xf32> to vector<8x32xf32>
    %256 = arith.addf %254, %255 : vector<8x32xf32>
    %257 = vector.extract_strided_slice %253 {offsets = [0, 0], sizes = [8, 8], strides = [1, 1]} : vector<8x96xf32> to vector<8x8xf32>
    %258 = vector.extract_strided_slice %253 {offsets = [0, 32], sizes = [8, 8], strides = [1, 1]} : vector<8x96xf32> to vector<8x8xf32>
    %259 = vector.extract_strided_slice %253 {offsets = [0, 64], sizes = [8, 8], strides = [1, 1]} : vector<8x96xf32> to vector<8x8xf32>
    %cst_115 = arith.constant dense<0.000000e+00> : vector<8x8xf32>
    %260 = tpu.matmul %257, %258, %cst_115 {dimension_numbers = #tpu.dot_dimension_numbers<[1], [1], [0], [0], [0, 0, 1, 0], [], []>} : vector<8x8xf32>, vector<8x8xf32>, vector<8x8xf32> -> vector<8x8xf32>
    %cst_116 = arith.constant 0.353553385 : f32
    %261 = vector.broadcast %cst_116 : f32 to vector<8x8xf32>
    %262 = arith.mulf %260, %261 : vector<8x8xf32>
    %263 = arith.addf %262, %246 : vector<8x8xf32>
    %cst_117 = arith.constant dense<0xFF800000> : vector<8xf32>
    %264 = vector.multi_reduction <maximumf>, %263, %cst_117 [1] : vector<8x8xf32> to vector<8xf32>
    %265 = vector.shape_cast %264 : vector<8xf32> to vector<8x1xf32>
    %266 = vector.broadcast %265 : vector<8x1xf32> to vector<8x8xf32>
    %267 = arith.subf %263, %266 : vector<8x8xf32>
    %268 = math.exp %267 : vector<8x8xf32>
    %cst_118 = arith.constant dense<0.000000e+00> : vector<8xf32>
    %269 = vector.multi_reduction <add>, %268, %cst_118 [1] : vector<8x8xf32> to vector<8xf32>
    %270 = vector.shape_cast %269 : vector<8xf32> to vector<8x1xf32>
    %271 = tpu.reciprocal %270 {approx = true} : vector<8x1xf32> -> vector<8x1xf32>
    %272 = vector.broadcast %271 : vector<8x1xf32> to vector<8x8xf32>
    %273 = arith.mulf %268, %272 : vector<8x8xf32>
    %cst_119 = arith.constant dense<0.000000e+00> : vector<8x8xf32>
    %274 = tpu.matmul %273, %259, %cst_119 {dimension_numbers = #tpu.dot_dimension_numbers<[1], [0], [0], [1], [0, 0, 1, 1], [], []>} : vector<8x8xf32>, vector<8x8xf32>, vector<8x8xf32> -> vector<8x8xf32>
    %275 = vector.extract_strided_slice %249 {offsets = [0, 0], sizes = [8, 32], strides = [1, 1]} : vector<32x32xf32> to vector<8x32xf32>
    %cst_120 = arith.constant dense<0.000000e+00> : vector<8x32xf32>
    %276 = tpu.matmul %274, %275, %cst_120 {dimension_numbers = #tpu.dot_dimension_numbers<[1], [0], [0], [1], [0, 0, 1, 1], [], []>} : vector<8x8xf32>, vector<8x32xf32>, vector<8x32xf32> -> vector<8x32xf32>
    %277 = arith.addf %256, %276 : vector<8x32xf32>
    %278 = vector.extract_strided_slice %253 {offsets = [0, 8], sizes = [8, 8], strides = [1, 1]} : vector<8x96xf32> to vector<8x8xf32>
    %279 = vector.extract_strided_slice %253 {offsets = [0, 40], sizes = [8, 8], strides = [1, 1]} : vector<8x96xf32> to vector<8x8xf32>
    %280 = vector.extract_strided_slice %253 {offsets = [0, 72], sizes = [8, 8], strides = [1, 1]} : vector<8x96xf32> to vector<8x8xf32>
    %cst_121 = arith.constant dense<0.000000e+00> : vector<8x8xf32>
    %281 = tpu.matmul %278, %279, %cst_121 {dimension_numbers = #tpu.dot_dimension_numbers<[1], [1], [0], [0], [0, 0, 1, 0], [], []>} : vector<8x8xf32>, vector<8x8xf32>, vector<8x8xf32> -> vector<8x8xf32>
    %cst_122 = arith.constant 0.353553385 : f32
    %282 = vector.broadcast %cst_122 : f32 to vector<8x8xf32>
    %283 = arith.mulf %281, %282 : vector<8x8xf32>
    %284 = arith.addf %283, %246 : vector<8x8xf32>
    %cst_123 = arith.constant dense<0xFF800000> : vector<8xf32>
    %285 = vector.multi_reduction <maximumf>, %284, %cst_123 [1] : vector<8x8xf32> to vector<8xf32>
    %286 = vector.shape_cast %285 : vector<8xf32> to vector<8x1xf32>
    %287 = vector.broadcast %286 : vector<8x1xf32> to vector<8x8xf32>
    %288 = arith.subf %284, %287 : vector<8x8xf32>
    %289 = math.exp %288 : vector<8x8xf32>
    %cst_124 = arith.constant dense<0.000000e+00> : vector<8xf32>
    %290 = vector.multi_reduction <add>, %289, %cst_124 [1] : vector<8x8xf32> to vector<8xf32>
    %291 = vector.shape_cast %290 : vector<8xf32> to vector<8x1xf32>
    %292 = tpu.reciprocal %291 {approx = true} : vector<8x1xf32> -> vector<8x1xf32>
    %293 = vector.broadcast %292 : vector<8x1xf32> to vector<8x8xf32>
    %294 = arith.mulf %289, %293 : vector<8x8xf32>
    %cst_125 = arith.constant dense<0.000000e+00> : vector<8x8xf32>
    %295 = tpu.matmul %294, %280, %cst_125 {dimension_numbers = #tpu.dot_dimension_numbers<[1], [0], [0], [1], [0, 0, 1, 1], [], []>} : vector<8x8xf32>, vector<8x8xf32>, vector<8x8xf32> -> vector<8x8xf32>
    %296 = vector.extract_strided_slice %249 {offsets = [8, 0], sizes = [8, 32], strides = [1, 1]} : vector<32x32xf32> to vector<8x32xf32>
    %cst_126 = arith.constant dense<0.000000e+00> : vector<8x32xf32>
    %297 = tpu.matmul %295, %296, %cst_126 {dimension_numbers = #tpu.dot_dimension_numbers<[1], [0], [0], [1], [0, 0, 1, 1], [], []>} : vector<8x8xf32>, vector<8x32xf32>, vector<8x32xf32> -> vector<8x32xf32>
    %298 = arith.addf %277, %297 : vector<8x32xf32>
    %299 = vector.extract_strided_slice %253 {offsets = [0, 16], sizes = [8, 8], strides = [1, 1]} : vector<8x96xf32> to vector<8x8xf32>
    %300 = vector.extract_strided_slice %253 {offsets = [0, 48], sizes = [8, 8], strides = [1, 1]} : vector<8x96xf32> to vector<8x8xf32>
    %301 = vector.extract_strided_slice %253 {offsets = [0, 80], sizes = [8, 8], strides = [1, 1]} : vector<8x96xf32> to vector<8x8xf32>
    %cst_127 = arith.constant dense<0.000000e+00> : vector<8x8xf32>
    %302 = tpu.matmul %299, %300, %cst_127 {dimension_numbers = #tpu.dot_dimension_numbers<[1], [1], [0], [0], [0, 0, 1, 0], [], []>} : vector<8x8xf32>, vector<8x8xf32>, vector<8x8xf32> -> vector<8x8xf32>
    %cst_128 = arith.constant 0.353553385 : f32
    %303 = vector.broadcast %cst_128 : f32 to vector<8x8xf32>
    %304 = arith.mulf %302, %303 : vector<8x8xf32>
    %305 = arith.addf %304, %246 : vector<8x8xf32>
    %cst_129 = arith.constant dense<0xFF800000> : vector<8xf32>
    %306 = vector.multi_reduction <maximumf>, %305, %cst_129 [1] : vector<8x8xf32> to vector<8xf32>
    %307 = vector.shape_cast %306 : vector<8xf32> to vector<8x1xf32>
    %308 = vector.broadcast %307 : vector<8x1xf32> to vector<8x8xf32>
    %309 = arith.subf %305, %308 : vector<8x8xf32>
    %310 = math.exp %309 : vector<8x8xf32>
    %cst_130 = arith.constant dense<0.000000e+00> : vector<8xf32>
    %311 = vector.multi_reduction <add>, %310, %cst_130 [1] : vector<8x8xf32> to vector<8xf32>
    %312 = vector.shape_cast %311 : vector<8xf32> to vector<8x1xf32>
    %313 = tpu.reciprocal %312 {approx = true} : vector<8x1xf32> -> vector<8x1xf32>
    %314 = vector.broadcast %313 : vector<8x1xf32> to vector<8x8xf32>
    %315 = arith.mulf %310, %314 : vector<8x8xf32>
    %cst_131 = arith.constant dense<0.000000e+00> : vector<8x8xf32>
    %316 = tpu.matmul %315, %301, %cst_131 {dimension_numbers = #tpu.dot_dimension_numbers<[1], [0], [0], [1], [0, 0, 1, 1], [], []>} : vector<8x8xf32>, vector<8x8xf32>, vector<8x8xf32> -> vector<8x8xf32>
    %317 = vector.extract_strided_slice %249 {offsets = [16, 0], sizes = [8, 32], strides = [1, 1]} : vector<32x32xf32> to vector<8x32xf32>
    %cst_132 = arith.constant dense<0.000000e+00> : vector<8x32xf32>
    %318 = tpu.matmul %316, %317, %cst_132 {dimension_numbers = #tpu.dot_dimension_numbers<[1], [0], [0], [1], [0, 0, 1, 1], [], []>} : vector<8x8xf32>, vector<8x32xf32>, vector<8x32xf32> -> vector<8x32xf32>
    %319 = arith.addf %298, %318 : vector<8x32xf32>
    %320 = vector.extract_strided_slice %253 {offsets = [0, 24], sizes = [8, 8], strides = [1, 1]} : vector<8x96xf32> to vector<8x8xf32>
    %321 = vector.extract_strided_slice %253 {offsets = [0, 56], sizes = [8, 8], strides = [1, 1]} : vector<8x96xf32> to vector<8x8xf32>
    %322 = vector.extract_strided_slice %253 {offsets = [0, 88], sizes = [8, 8], strides = [1, 1]} : vector<8x96xf32> to vector<8x8xf32>
    %cst_133 = arith.constant dense<0.000000e+00> : vector<8x8xf32>
    %323 = tpu.matmul %320, %321, %cst_133 {dimension_numbers = #tpu.dot_dimension_numbers<[1], [1], [0], [0], [0, 0, 1, 0], [], []>} : vector<8x8xf32>, vector<8x8xf32>, vector<8x8xf32> -> vector<8x8xf32>
    %cst_134 = arith.constant 0.353553385 : f32
    %324 = vector.broadcast %cst_134 : f32 to vector<8x8xf32>
    %325 = arith.mulf %323, %324 : vector<8x8xf32>
    %326 = arith.addf %325, %246 : vector<8x8xf32>
    %cst_135 = arith.constant dense<0xFF800000> : vector<8xf32>
    %327 = vector.multi_reduction <maximumf>, %326, %cst_135 [1] : vector<8x8xf32> to vector<8xf32>
    %328 = vector.shape_cast %327 : vector<8xf32> to vector<8x1xf32>
    %329 = vector.broadcast %328 : vector<8x1xf32> to vector<8x8xf32>
    %330 = arith.subf %326, %329 : vector<8x8xf32>
    %331 = math.exp %330 : vector<8x8xf32>
    %cst_136 = arith.constant dense<0.000000e+00> : vector<8xf32>
    %332 = vector.multi_reduction <add>, %331, %cst_136 [1] : vector<8x8xf32> to vector<8xf32>
    %333 = vector.shape_cast %332 : vector<8xf32> to vector<8x1xf32>
    %334 = tpu.reciprocal %333 {approx = true} : vector<8x1xf32> -> vector<8x1xf32>
    %335 = vector.broadcast %334 : vector<8x1xf32> to vector<8x8xf32>
    %336 = arith.mulf %331, %335 : vector<8x8xf32>
    %cst_137 = arith.constant dense<0.000000e+00> : vector<8x8xf32>
    %337 = tpu.matmul %336, %322, %cst_137 {dimension_numbers = #tpu.dot_dimension_numbers<[1], [0], [0], [1], [0, 0, 1, 1], [], []>} : vector<8x8xf32>, vector<8x8xf32>, vector<8x8xf32> -> vector<8x8xf32>
    %338 = vector.extract_strided_slice %249 {offsets = [24, 0], sizes = [8, 32], strides = [1, 1]} : vector<32x32xf32> to vector<8x32xf32>
    %cst_138 = arith.constant dense<0.000000e+00> : vector<8x32xf32>
    %339 = tpu.matmul %337, %338, %cst_138 {dimension_numbers = #tpu.dot_dimension_numbers<[1], [0], [0], [1], [0, 0, 1, 1], [], []>} : vector<8x8xf32>, vector<8x32xf32>, vector<8x32xf32> -> vector<8x32xf32>
    %340 = arith.addf %319, %339 : vector<8x32xf32>
    %341 = arith.addf %240, %340 : vector<8x32xf32>
    %c0_139 = arith.constant 0 : index
    %c0_140 = arith.constant 0 : index
    %342 = vector.load %arg23[%c0_139, %c0_140] : memref<1x32xf32, #tpu.memory_space<vmem>>, vector<1x32xf32>
    %c0_141 = arith.constant 0 : index
    %c0_142 = arith.constant 0 : index
    %343 = vector.load %arg24[%c0_141, %c0_142] : memref<1x32xf32, #tpu.memory_space<vmem>>, vector<1x32xf32>
    %cst_143 = arith.constant dense<0.000000e+00> : vector<8xf32>
    %344 = vector.multi_reduction <add>, %341, %cst_143 [1] : vector<8x32xf32> to vector<8xf32>
    %345 = vector.shape_cast %344 : vector<8xf32> to vector<8x1xf32>
    %cst_144 = arith.constant 3.200000e+01 : f32
    %346 = vector.broadcast %cst_144 : f32 to vector<8x1xf32>
    %347 = arith.divf %345, %346 : vector<8x1xf32>
    %348 = vector.broadcast %347 : vector<8x1xf32> to vector<8x32xf32>
    %349 = arith.subf %341, %348 : vector<8x32xf32>
    %350 = arith.mulf %349, %349 : vector<8x32xf32>
    %cst_145 = arith.constant dense<0.000000e+00> : vector<8xf32>
    %351 = vector.multi_reduction <add>, %350, %cst_145 [1] : vector<8x32xf32> to vector<8xf32>
    %352 = vector.shape_cast %351 : vector<8xf32> to vector<8x1xf32>
    %cst_146 = arith.constant 3.200000e+01 : f32
    %353 = vector.broadcast %cst_146 : f32 to vector<8x1xf32>
    %354 = arith.divf %352, %353 : vector<8x1xf32>
    %cst_147 = arith.constant 9.99999974E-6 : f32
    %355 = vector.broadcast %cst_147 : f32 to vector<8x1xf32>
    %356 = arith.addf %354, %355 : vector<8x1xf32>
    %357 = math.rsqrt %356 : vector<8x1xf32>
    %358 = vector.broadcast %357 : vector<8x1xf32> to vector<8x32xf32>
    %359 = arith.mulf %349, %358 : vector<8x32xf32>
    %360 = vector.broadcast %342 : vector<1x32xf32> to vector<8x32xf32>
    %361 = arith.mulf %359, %360 : vector<8x32xf32>
    %362 = vector.broadcast %343 : vector<1x32xf32> to vector<8x32xf32>
    %363 = arith.addf %361, %362 : vector<8x32xf32>
    %c0_148 = arith.constant 0 : index
    %c0_149 = arith.constant 0 : index
    %364 = vector.load %arg25[%c0_148, %c0_149] : memref<32x96xf32, #tpu.memory_space<vmem>>, vector<32x96xf32>
    %c0_150 = arith.constant 0 : index
    %c0_151 = arith.constant 0 : index
    %365 = vector.load %arg26[%c0_150, %c0_151] : memref<1x96xf32, #tpu.memory_space<vmem>>, vector<1x96xf32>
    %366 = vector.extract_strided_slice %364 {offsets = [0, 64], sizes = [32, 32], strides = [1, 1]} : vector<32x96xf32> to vector<32x32xf32>
    %cst_152 = arith.constant dense<0.000000e+00> : vector<1x32xf32>
    %367 = tpu.matmul %233, %366, %cst_152 {dimension_numbers = #tpu.dot_dimension_numbers<[1], [0], [0], [1], [0, 0, 1, 1], [], []>} : vector<1x32xf32>, vector<32x32xf32>, vector<1x32xf32> -> vector<1x32xf32>
    %368 = vector.extract_strided_slice %365 {offsets = [0, 64], sizes = [1, 32], strides = [1, 1]} : vector<1x96xf32> to vector<1x32xf32>
    %369 = arith.addf %367, %368 : vector<1x32xf32>
    %c0_153 = arith.constant 0 : index
    %c0_154 = arith.constant 0 : index
    %370 = vector.load %arg27[%c0_153, %c0_154] : memref<32x32xf32, #tpu.memory_space<vmem>>, vector<32x32xf32>
    %cst_155 = arith.constant dense<0.000000e+00> : vector<1x32xf32>
    %371 = tpu.matmul %369, %370, %cst_155 {dimension_numbers = #tpu.dot_dimension_numbers<[1], [0], [0], [1], [0, 0, 1, 1], [], []>} : vector<1x32xf32>, vector<32x32xf32>, vector<1x32xf32> -> vector<1x32xf32>
    %c0_156 = arith.constant 0 : index
    %c0_157 = arith.constant 0 : index
    %372 = vector.load %arg28[%c0_156, %c0_157] : memref<1x32xf32, #tpu.memory_space<vmem>>, vector<1x32xf32>
    %373 = arith.addf %371, %372 : vector<1x32xf32>
    %374 = vector.broadcast %373 : vector<1x32xf32> to vector<8x32xf32>
    %375 = arith.addf %363, %374 : vector<8x32xf32>
    %c0_158 = arith.constant 0 : index
    %c0_159 = arith.constant 0 : index
    %376 = vector.load %arg29[%c0_158, %c0_159] : memref<1x32xf32, #tpu.memory_space<vmem>>, vector<1x32xf32>
    %c0_160 = arith.constant 0 : index
    %c0_161 = arith.constant 0 : index
    %377 = vector.load %arg30[%c0_160, %c0_161] : memref<1x32xf32, #tpu.memory_space<vmem>>, vector<1x32xf32>
    %cst_162 = arith.constant dense<0.000000e+00> : vector<8xf32>
    %378 = vector.multi_reduction <add>, %375, %cst_162 [1] : vector<8x32xf32> to vector<8xf32>
    %379 = vector.shape_cast %378 : vector<8xf32> to vector<8x1xf32>
    %cst_163 = arith.constant 3.200000e+01 : f32
    %380 = vector.broadcast %cst_163 : f32 to vector<8x1xf32>
    %381 = arith.divf %379, %380 : vector<8x1xf32>
    %382 = vector.broadcast %381 : vector<8x1xf32> to vector<8x32xf32>
    %383 = arith.subf %375, %382 : vector<8x32xf32>
    %384 = arith.mulf %383, %383 : vector<8x32xf32>
    %cst_164 = arith.constant dense<0.000000e+00> : vector<8xf32>
    %385 = vector.multi_reduction <add>, %384, %cst_164 [1] : vector<8x32xf32> to vector<8xf32>
    %386 = vector.shape_cast %385 : vector<8xf32> to vector<8x1xf32>
    %cst_165 = arith.constant 3.200000e+01 : f32
    %387 = vector.broadcast %cst_165 : f32 to vector<8x1xf32>
    %388 = arith.divf %386, %387 : vector<8x1xf32>
    %cst_166 = arith.constant 9.99999974E-6 : f32
    %389 = vector.broadcast %cst_166 : f32 to vector<8x1xf32>
    %390 = arith.addf %388, %389 : vector<8x1xf32>
    %391 = math.rsqrt %390 : vector<8x1xf32>
    %392 = vector.broadcast %391 : vector<8x1xf32> to vector<8x32xf32>
    %393 = arith.mulf %383, %392 : vector<8x32xf32>
    %394 = vector.broadcast %376 : vector<1x32xf32> to vector<8x32xf32>
    %395 = arith.mulf %393, %394 : vector<8x32xf32>
    %396 = vector.broadcast %377 : vector<1x32xf32> to vector<8x32xf32>
    %397 = arith.addf %395, %396 : vector<8x32xf32>
    %c0_167 = arith.constant 0 : index
    %c0_168 = arith.constant 0 : index
    %398 = vector.load %arg31[%c0_167, %c0_168] : memref<32x64xf32, #tpu.memory_space<vmem>>, vector<32x64xf32>
    %c0_169 = arith.constant 0 : index
    %c0_170 = arith.constant 0 : index
    %399 = vector.load %arg32[%c0_169, %c0_170] : memref<1x64xf32, #tpu.memory_space<vmem>>, vector<1x64xf32>
    %c0_171 = arith.constant 0 : index
    %c0_172 = arith.constant 0 : index
    %400 = vector.load %arg33[%c0_171, %c0_172] : memref<64x32xf32, #tpu.memory_space<vmem>>, vector<64x32xf32>
    %c0_173 = arith.constant 0 : index
    %c0_174 = arith.constant 0 : index
    %401 = vector.load %arg34[%c0_173, %c0_174] : memref<1x32xf32, #tpu.memory_space<vmem>>, vector<1x32xf32>
    %cst_175 = arith.constant dense<0.000000e+00> : vector<8x64xf32>
    %402 = tpu.matmul %397, %398, %cst_175 {dimension_numbers = #tpu.dot_dimension_numbers<[1], [0], [0], [1], [0, 0, 1, 1], [], []>} : vector<8x32xf32>, vector<32x64xf32>, vector<8x64xf32> -> vector<8x64xf32>
    %403 = vector.broadcast %399 : vector<1x64xf32> to vector<8x64xf32>
    %404 = arith.addf %402, %403 : vector<8x64xf32>
    %cst_176 = arith.constant 0.000000e+00 : f32
    %405 = vector.broadcast %cst_176 : f32 to vector<8x64xf32>
    %406 = arith.maximumf %404, %405 : vector<8x64xf32>
    %cst_177 = arith.constant dense<0.000000e+00> : vector<8x32xf32>
    %407 = tpu.matmul %406, %400, %cst_177 {dimension_numbers = #tpu.dot_dimension_numbers<[1], [0], [0], [1], [0, 0, 1, 1], [], []>} : vector<8x64xf32>, vector<64x32xf32>, vector<8x32xf32> -> vector<8x32xf32>
    %408 = vector.broadcast %401 : vector<1x32xf32> to vector<8x32xf32>
    %409 = arith.addf %407, %408 : vector<8x32xf32>
    %410 = arith.addf %397, %409 : vector<8x32xf32>
    %c0_178 = arith.constant 0 : index
    %c0_179 = arith.constant 0 : index
    %411 = vector.load %arg35[%c0_178, %c0_179] : memref<1x32xf32, #tpu.memory_space<vmem>>, vector<1x32xf32>
    %c0_180 = arith.constant 0 : index
    %c0_181 = arith.constant 0 : index
    %412 = vector.load %arg36[%c0_180, %c0_181] : memref<1x32xf32, #tpu.memory_space<vmem>>, vector<1x32xf32>
    %cst_182 = arith.constant dense<0.000000e+00> : vector<8xf32>
    %413 = vector.multi_reduction <add>, %410, %cst_182 [1] : vector<8x32xf32> to vector<8xf32>
    %414 = vector.shape_cast %413 : vector<8xf32> to vector<8x1xf32>
    %cst_183 = arith.constant 3.200000e+01 : f32
    %415 = vector.broadcast %cst_183 : f32 to vector<8x1xf32>
    %416 = arith.divf %414, %415 : vector<8x1xf32>
    %417 = vector.broadcast %416 : vector<8x1xf32> to vector<8x32xf32>
    %418 = arith.subf %410, %417 : vector<8x32xf32>
    %419 = arith.mulf %418, %418 : vector<8x32xf32>
    %cst_184 = arith.constant dense<0.000000e+00> : vector<8xf32>
    %420 = vector.multi_reduction <add>, %419, %cst_184 [1] : vector<8x32xf32> to vector<8xf32>
    %421 = vector.shape_cast %420 : vector<8xf32> to vector<8x1xf32>
    %cst_185 = arith.constant 3.200000e+01 : f32
    %422 = vector.broadcast %cst_185 : f32 to vector<8x1xf32>
    %423 = arith.divf %421, %422 : vector<8x1xf32>
    %cst_186 = arith.constant 9.99999974E-6 : f32
    %424 = vector.broadcast %cst_186 : f32 to vector<8x1xf32>
    %425 = arith.addf %423, %424 : vector<8x1xf32>
    %426 = math.rsqrt %425 : vector<8x1xf32>
    %427 = vector.broadcast %426 : vector<8x1xf32> to vector<8x32xf32>
    %428 = arith.mulf %418, %427 : vector<8x32xf32>
    %429 = vector.broadcast %411 : vector<1x32xf32> to vector<8x32xf32>
    %430 = arith.mulf %428, %429 : vector<8x32xf32>
    %431 = vector.broadcast %412 : vector<1x32xf32> to vector<8x32xf32>
    %432 = arith.addf %430, %431 : vector<8x32xf32>
    %c0_187 = arith.constant 0 : index
    %c0_188 = arith.constant 0 : index
    %433 = vector.load %arg19[%c0_187, %c0_188] : memref<32x96xf32, #tpu.memory_space<vmem>>, vector<32x96xf32>
    %c0_189 = arith.constant 0 : index
    %c0_190 = arith.constant 0 : index
    %434 = vector.load %arg20[%c0_189, %c0_190] : memref<1x96xf32, #tpu.memory_space<vmem>>, vector<1x96xf32>
    %c0_191 = arith.constant 0 : index
    %c0_192 = arith.constant 0 : index
    %435 = vector.load %arg21[%c0_191, %c0_192] : memref<32x32xf32, #tpu.memory_space<vmem>>, vector<32x32xf32>
    %c0_193 = arith.constant 0 : index
    %c0_194 = arith.constant 0 : index
    %436 = vector.load %arg22[%c0_193, %c0_194] : memref<1x32xf32, #tpu.memory_space<vmem>>, vector<1x32xf32>
    %cst_195 = arith.constant dense<0.000000e+00> : vector<8x96xf32>
    %437 = tpu.matmul %432, %433, %cst_195 {dimension_numbers = #tpu.dot_dimension_numbers<[1], [0], [0], [1], [0, 0, 1, 1], [], []>} : vector<8x32xf32>, vector<32x96xf32>, vector<8x96xf32> -> vector<8x96xf32>
    %438 = vector.broadcast %434 : vector<1x96xf32> to vector<8x96xf32>
    %439 = arith.addf %437, %438 : vector<8x96xf32>
    %cst_196 = arith.constant 0.000000e+00 : f32
    %440 = vector.broadcast %cst_196 : f32 to vector<8x32xf32>
    %441 = vector.broadcast %436 : vector<1x32xf32> to vector<8x32xf32>
    %442 = arith.addf %440, %441 : vector<8x32xf32>
    %443 = vector.extract_strided_slice %439 {offsets = [0, 0], sizes = [8, 8], strides = [1, 1]} : vector<8x96xf32> to vector<8x8xf32>
    %444 = vector.extract_strided_slice %439 {offsets = [0, 32], sizes = [8, 8], strides = [1, 1]} : vector<8x96xf32> to vector<8x8xf32>
    %445 = vector.extract_strided_slice %439 {offsets = [0, 64], sizes = [8, 8], strides = [1, 1]} : vector<8x96xf32> to vector<8x8xf32>
    %cst_197 = arith.constant dense<0.000000e+00> : vector<8x8xf32>
    %446 = tpu.matmul %443, %444, %cst_197 {dimension_numbers = #tpu.dot_dimension_numbers<[1], [1], [0], [0], [0, 0, 1, 0], [], []>} : vector<8x8xf32>, vector<8x8xf32>, vector<8x8xf32> -> vector<8x8xf32>
    %cst_198 = arith.constant 0.353553385 : f32
    %447 = vector.broadcast %cst_198 : f32 to vector<8x8xf32>
    %448 = arith.mulf %446, %447 : vector<8x8xf32>
    %449 = arith.addf %448, %246 : vector<8x8xf32>
    %cst_199 = arith.constant dense<0xFF800000> : vector<8xf32>
    %450 = vector.multi_reduction <maximumf>, %449, %cst_199 [1] : vector<8x8xf32> to vector<8xf32>
    %451 = vector.shape_cast %450 : vector<8xf32> to vector<8x1xf32>
    %452 = vector.broadcast %451 : vector<8x1xf32> to vector<8x8xf32>
    %453 = arith.subf %449, %452 : vector<8x8xf32>
    %454 = math.exp %453 : vector<8x8xf32>
    %cst_200 = arith.constant dense<0.000000e+00> : vector<8xf32>
    %455 = vector.multi_reduction <add>, %454, %cst_200 [1] : vector<8x8xf32> to vector<8xf32>
    %456 = vector.shape_cast %455 : vector<8xf32> to vector<8x1xf32>
    %457 = tpu.reciprocal %456 {approx = true} : vector<8x1xf32> -> vector<8x1xf32>
    %458 = vector.broadcast %457 : vector<8x1xf32> to vector<8x8xf32>
    %459 = arith.mulf %454, %458 : vector<8x8xf32>
    %cst_201 = arith.constant dense<0.000000e+00> : vector<8x8xf32>
    %460 = tpu.matmul %459, %445, %cst_201 {dimension_numbers = #tpu.dot_dimension_numbers<[1], [0], [0], [1], [0, 0, 1, 1], [], []>} : vector<8x8xf32>, vector<8x8xf32>, vector<8x8xf32> -> vector<8x8xf32>
    %461 = vector.extract_strided_slice %435 {offsets = [0, 0], sizes = [8, 32], strides = [1, 1]} : vector<32x32xf32> to vector<8x32xf32>
    %cst_202 = arith.constant dense<0.000000e+00> : vector<8x32xf32>
    %462 = tpu.matmul %460, %461, %cst_202 {dimension_numbers = #tpu.dot_dimension_numbers<[1], [0], [0], [1], [0, 0, 1, 1], [], []>} : vector<8x8xf32>, vector<8x32xf32>, vector<8x32xf32> -> vector<8x32xf32>
    %463 = arith.addf %442, %462 : vector<8x32xf32>
    %464 = vector.extract_strided_slice %439 {offsets = [0, 8], sizes = [8, 8], strides = [1, 1]} : vector<8x96xf32> to vector<8x8xf32>
    %465 = vector.extract_strided_slice %439 {offsets = [0, 40], sizes = [8, 8], strides = [1, 1]} : vector<8x96xf32> to vector<8x8xf32>
    %466 = vector.extract_strided_slice %439 {offsets = [0, 72], sizes = [8, 8], strides = [1, 1]} : vector<8x96xf32> to vector<8x8xf32>
    %cst_203 = arith.constant dense<0.000000e+00> : vector<8x8xf32>
    %467 = tpu.matmul %464, %465, %cst_203 {dimension_numbers = #tpu.dot_dimension_numbers<[1], [1], [0], [0], [0, 0, 1, 0], [], []>} : vector<8x8xf32>, vector<8x8xf32>, vector<8x8xf32> -> vector<8x8xf32>
    %cst_204 = arith.constant 0.353553385 : f32
    %468 = vector.broadcast %cst_204 : f32 to vector<8x8xf32>
    %469 = arith.mulf %467, %468 : vector<8x8xf32>
    %470 = arith.addf %469, %246 : vector<8x8xf32>
    %cst_205 = arith.constant dense<0xFF800000> : vector<8xf32>
    %471 = vector.multi_reduction <maximumf>, %470, %cst_205 [1] : vector<8x8xf32> to vector<8xf32>
    %472 = vector.shape_cast %471 : vector<8xf32> to vector<8x1xf32>
    %473 = vector.broadcast %472 : vector<8x1xf32> to vector<8x8xf32>
    %474 = arith.subf %470, %473 : vector<8x8xf32>
    %475 = math.exp %474 : vector<8x8xf32>
    %cst_206 = arith.constant dense<0.000000e+00> : vector<8xf32>
    %476 = vector.multi_reduction <add>, %475, %cst_206 [1] : vector<8x8xf32> to vector<8xf32>
    %477 = vector.shape_cast %476 : vector<8xf32> to vector<8x1xf32>
    %478 = tpu.reciprocal %477 {approx = true} : vector<8x1xf32> -> vector<8x1xf32>
    %479 = vector.broadcast %478 : vector<8x1xf32> to vector<8x8xf32>
    %480 = arith.mulf %475, %479 : vector<8x8xf32>
    %cst_207 = arith.constant dense<0.000000e+00> : vector<8x8xf32>
    %481 = tpu.matmul %480, %466, %cst_207 {dimension_numbers = #tpu.dot_dimension_numbers<[1], [0], [0], [1], [0, 0, 1, 1], [], []>} : vector<8x8xf32>, vector<8x8xf32>, vector<8x8xf32> -> vector<8x8xf32>
    %482 = vector.extract_strided_slice %435 {offsets = [8, 0], sizes = [8, 32], strides = [1, 1]} : vector<32x32xf32> to vector<8x32xf32>
    %cst_208 = arith.constant dense<0.000000e+00> : vector<8x32xf32>
    %483 = tpu.matmul %481, %482, %cst_208 {dimension_numbers = #tpu.dot_dimension_numbers<[1], [0], [0], [1], [0, 0, 1, 1], [], []>} : vector<8x8xf32>, vector<8x32xf32>, vector<8x32xf32> -> vector<8x32xf32>
    %484 = arith.addf %463, %483 : vector<8x32xf32>
    %485 = vector.extract_strided_slice %439 {offsets = [0, 16], sizes = [8, 8], strides = [1, 1]} : vector<8x96xf32> to vector<8x8xf32>
    %486 = vector.extract_strided_slice %439 {offsets = [0, 48], sizes = [8, 8], strides = [1, 1]} : vector<8x96xf32> to vector<8x8xf32>
    %487 = vector.extract_strided_slice %439 {offsets = [0, 80], sizes = [8, 8], strides = [1, 1]} : vector<8x96xf32> to vector<8x8xf32>
    %cst_209 = arith.constant dense<0.000000e+00> : vector<8x8xf32>
    %488 = tpu.matmul %485, %486, %cst_209 {dimension_numbers = #tpu.dot_dimension_numbers<[1], [1], [0], [0], [0, 0, 1, 0], [], []>} : vector<8x8xf32>, vector<8x8xf32>, vector<8x8xf32> -> vector<8x8xf32>
    %cst_210 = arith.constant 0.353553385 : f32
    %489 = vector.broadcast %cst_210 : f32 to vector<8x8xf32>
    %490 = arith.mulf %488, %489 : vector<8x8xf32>
    %491 = arith.addf %490, %246 : vector<8x8xf32>
    %cst_211 = arith.constant dense<0xFF800000> : vector<8xf32>
    %492 = vector.multi_reduction <maximumf>, %491, %cst_211 [1] : vector<8x8xf32> to vector<8xf32>
    %493 = vector.shape_cast %492 : vector<8xf32> to vector<8x1xf32>
    %494 = vector.broadcast %493 : vector<8x1xf32> to vector<8x8xf32>
    %495 = arith.subf %491, %494 : vector<8x8xf32>
    %496 = math.exp %495 : vector<8x8xf32>
    %cst_212 = arith.constant dense<0.000000e+00> : vector<8xf32>
    %497 = vector.multi_reduction <add>, %496, %cst_212 [1] : vector<8x8xf32> to vector<8xf32>
    %498 = vector.shape_cast %497 : vector<8xf32> to vector<8x1xf32>
    %499 = tpu.reciprocal %498 {approx = true} : vector<8x1xf32> -> vector<8x1xf32>
    %500 = vector.broadcast %499 : vector<8x1xf32> to vector<8x8xf32>
    %501 = arith.mulf %496, %500 : vector<8x8xf32>
    %cst_213 = arith.constant dense<0.000000e+00> : vector<8x8xf32>
    %502 = tpu.matmul %501, %487, %cst_213 {dimension_numbers = #tpu.dot_dimension_numbers<[1], [0], [0], [1], [0, 0, 1, 1], [], []>} : vector<8x8xf32>, vector<8x8xf32>, vector<8x8xf32> -> vector<8x8xf32>
    %503 = vector.extract_strided_slice %435 {offsets = [16, 0], sizes = [8, 32], strides = [1, 1]} : vector<32x32xf32> to vector<8x32xf32>
    %cst_214 = arith.constant dense<0.000000e+00> : vector<8x32xf32>
    %504 = tpu.matmul %502, %503, %cst_214 {dimension_numbers = #tpu.dot_dimension_numbers<[1], [0], [0], [1], [0, 0, 1, 1], [], []>} : vector<8x8xf32>, vector<8x32xf32>, vector<8x32xf32> -> vector<8x32xf32>
    %505 = arith.addf %484, %504 : vector<8x32xf32>
    %506 = vector.extract_strided_slice %439 {offsets = [0, 24], sizes = [8, 8], strides = [1, 1]} : vector<8x96xf32> to vector<8x8xf32>
    %507 = vector.extract_strided_slice %439 {offsets = [0, 56], sizes = [8, 8], strides = [1, 1]} : vector<8x96xf32> to vector<8x8xf32>
    %508 = vector.extract_strided_slice %439 {offsets = [0, 88], sizes = [8, 8], strides = [1, 1]} : vector<8x96xf32> to vector<8x8xf32>
    %cst_215 = arith.constant dense<0.000000e+00> : vector<8x8xf32>
    %509 = tpu.matmul %506, %507, %cst_215 {dimension_numbers = #tpu.dot_dimension_numbers<[1], [1], [0], [0], [0, 0, 1, 0], [], []>} : vector<8x8xf32>, vector<8x8xf32>, vector<8x8xf32> -> vector<8x8xf32>
    %cst_216 = arith.constant 0.353553385 : f32
    %510 = vector.broadcast %cst_216 : f32 to vector<8x8xf32>
    %511 = arith.mulf %509, %510 : vector<8x8xf32>
    %512 = arith.addf %511, %246 : vector<8x8xf32>
    %cst_217 = arith.constant dense<0xFF800000> : vector<8xf32>
    %513 = vector.multi_reduction <maximumf>, %512, %cst_217 [1] : vector<8x8xf32> to vector<8xf32>
    %514 = vector.shape_cast %513 : vector<8xf32> to vector<8x1xf32>
    %515 = vector.broadcast %514 : vector<8x1xf32> to vector<8x8xf32>
    %516 = arith.subf %512, %515 : vector<8x8xf32>
    %517 = math.exp %516 : vector<8x8xf32>
    %cst_218 = arith.constant dense<0.000000e+00> : vector<8xf32>
    %518 = vector.multi_reduction <add>, %517, %cst_218 [1] : vector<8x8xf32> to vector<8xf32>
    %519 = vector.shape_cast %518 : vector<8xf32> to vector<8x1xf32>
    %520 = tpu.reciprocal %519 {approx = true} : vector<8x1xf32> -> vector<8x1xf32>
    %521 = vector.broadcast %520 : vector<8x1xf32> to vector<8x8xf32>
    %522 = arith.mulf %517, %521 : vector<8x8xf32>
    %cst_219 = arith.constant dense<0.000000e+00> : vector<8x8xf32>
    %523 = tpu.matmul %522, %508, %cst_219 {dimension_numbers = #tpu.dot_dimension_numbers<[1], [0], [0], [1], [0, 0, 1, 1], [], []>} : vector<8x8xf32>, vector<8x8xf32>, vector<8x8xf32> -> vector<8x8xf32>
    %524 = vector.extract_strided_slice %435 {offsets = [24, 0], sizes = [8, 32], strides = [1, 1]} : vector<32x32xf32> to vector<8x32xf32>
    %cst_220 = arith.constant dense<0.000000e+00> : vector<8x32xf32>
    %525 = tpu.matmul %523, %524, %cst_220 {dimension_numbers = #tpu.dot_dimension_numbers<[1], [0], [0], [1], [0, 0, 1, 1], [], []>} : vector<8x8xf32>, vector<8x32xf32>, vector<8x32xf32> -> vector<8x32xf32>
    %526 = arith.addf %505, %525 : vector<8x32xf32>
    %527 = arith.addf %432, %526 : vector<8x32xf32>
    %c0_221 = arith.constant 0 : index
    %c0_222 = arith.constant 0 : index
    %528 = vector.load %arg23[%c0_221, %c0_222] : memref<1x32xf32, #tpu.memory_space<vmem>>, vector<1x32xf32>
    %c0_223 = arith.constant 0 : index
    %c0_224 = arith.constant 0 : index
    %529 = vector.load %arg24[%c0_223, %c0_224] : memref<1x32xf32, #tpu.memory_space<vmem>>, vector<1x32xf32>
    %cst_225 = arith.constant dense<0.000000e+00> : vector<8xf32>
    %530 = vector.multi_reduction <add>, %527, %cst_225 [1] : vector<8x32xf32> to vector<8xf32>
    %531 = vector.shape_cast %530 : vector<8xf32> to vector<8x1xf32>
    %cst_226 = arith.constant 3.200000e+01 : f32
    %532 = vector.broadcast %cst_226 : f32 to vector<8x1xf32>
    %533 = arith.divf %531, %532 : vector<8x1xf32>
    %534 = vector.broadcast %533 : vector<8x1xf32> to vector<8x32xf32>
    %535 = arith.subf %527, %534 : vector<8x32xf32>
    %536 = arith.mulf %535, %535 : vector<8x32xf32>
    %cst_227 = arith.constant dense<0.000000e+00> : vector<8xf32>
    %537 = vector.multi_reduction <add>, %536, %cst_227 [1] : vector<8x32xf32> to vector<8xf32>
    %538 = vector.shape_cast %537 : vector<8xf32> to vector<8x1xf32>
    %cst_228 = arith.constant 3.200000e+01 : f32
    %539 = vector.broadcast %cst_228 : f32 to vector<8x1xf32>
    %540 = arith.divf %538, %539 : vector<8x1xf32>
    %cst_229 = arith.constant 9.99999974E-6 : f32
    %541 = vector.broadcast %cst_229 : f32 to vector<8x1xf32>
    %542 = arith.addf %540, %541 : vector<8x1xf32>
    %543 = math.rsqrt %542 : vector<8x1xf32>
    %544 = vector.broadcast %543 : vector<8x1xf32> to vector<8x32xf32>
    %545 = arith.mulf %535, %544 : vector<8x32xf32>
    %546 = vector.broadcast %528 : vector<1x32xf32> to vector<8x32xf32>
    %547 = arith.mulf %545, %546 : vector<8x32xf32>
    %548 = vector.broadcast %529 : vector<1x32xf32> to vector<8x32xf32>
    %549 = arith.addf %547, %548 : vector<8x32xf32>
    %c0_230 = arith.constant 0 : index
    %c0_231 = arith.constant 0 : index
    %550 = vector.load %arg27[%c0_230, %c0_231] : memref<32x32xf32, #tpu.memory_space<vmem>>, vector<32x32xf32>
    %c0_232 = arith.constant 0 : index
    %c0_233 = arith.constant 0 : index
    %551 = vector.load %arg28[%c0_232, %c0_233] : memref<1x32xf32, #tpu.memory_space<vmem>>, vector<1x32xf32>
    %552 = vector.extract_strided_slice %364 {offsets = [0, 0], sizes = [32, 32], strides = [1, 1]} : vector<32x96xf32> to vector<32x32xf32>
    %cst_234 = arith.constant dense<0.000000e+00> : vector<8x32xf32>
    %553 = tpu.matmul %549, %552, %cst_234 {dimension_numbers = #tpu.dot_dimension_numbers<[1], [0], [0], [1], [0, 0, 1, 1], [], []>} : vector<8x32xf32>, vector<32x32xf32>, vector<8x32xf32> -> vector<8x32xf32>
    %554 = vector.extract_strided_slice %365 {offsets = [0, 0], sizes = [1, 32], strides = [1, 1]} : vector<1x96xf32> to vector<1x32xf32>
    %555 = vector.broadcast %554 : vector<1x32xf32> to vector<8x32xf32>
    %556 = arith.addf %553, %555 : vector<8x32xf32>
    %557 = vector.extract_strided_slice %364 {offsets = [0, 32], sizes = [32, 64], strides = [1, 1]} : vector<32x96xf32> to vector<32x64xf32>
    %cst_235 = arith.constant dense<0.000000e+00> : vector<8x64xf32>
    %558 = tpu.matmul %432, %557, %cst_235 {dimension_numbers = #tpu.dot_dimension_numbers<[1], [0], [0], [1], [0, 0, 1, 1], [], []>} : vector<8x32xf32>, vector<32x64xf32>, vector<8x64xf32> -> vector<8x64xf32>
    %559 = vector.extract_strided_slice %365 {offsets = [0, 32], sizes = [1, 64], strides = [1, 1]} : vector<1x96xf32> to vector<1x64xf32>
    %560 = vector.broadcast %559 : vector<1x64xf32> to vector<8x64xf32>
    %561 = arith.addf %558, %560 : vector<8x64xf32>
    %cst_236 = arith.constant 0.000000e+00 : f32
    %562 = vector.broadcast %cst_236 : f32 to vector<8x32xf32>
    %563 = vector.broadcast %551 : vector<1x32xf32> to vector<8x32xf32>
    %564 = arith.addf %562, %563 : vector<8x32xf32>
    %565 = vector.extract_strided_slice %556 {offsets = [0, 0], sizes = [8, 8], strides = [1, 1]} : vector<8x32xf32> to vector<8x8xf32>
    %566 = vector.extract_strided_slice %561 {offsets = [0, 0], sizes = [8, 8], strides = [1, 1]} : vector<8x64xf32> to vector<8x8xf32>
    %567 = vector.extract_strided_slice %561 {offsets = [0, 32], sizes = [8, 8], strides = [1, 1]} : vector<8x64xf32> to vector<8x8xf32>
    %cst_237 = arith.constant dense<0.000000e+00> : vector<8x8xf32>
    %568 = tpu.matmul %565, %566, %cst_237 {dimension_numbers = #tpu.dot_dimension_numbers<[1], [1], [0], [0], [0, 0, 1, 0], [], []>} : vector<8x8xf32>, vector<8x8xf32>, vector<8x8xf32> -> vector<8x8xf32>
    %cst_238 = arith.constant 0.353553385 : f32
    %569 = vector.broadcast %cst_238 : f32 to vector<8x8xf32>
    %570 = arith.mulf %568, %569 : vector<8x8xf32>
    %cst_239 = arith.constant dense<0xFF800000> : vector<8xf32>
    %571 = vector.multi_reduction <maximumf>, %570, %cst_239 [1] : vector<8x8xf32> to vector<8xf32>
    %572 = vector.shape_cast %571 : vector<8xf32> to vector<8x1xf32>
    %573 = vector.broadcast %572 : vector<8x1xf32> to vector<8x8xf32>
    %574 = arith.subf %570, %573 : vector<8x8xf32>
    %575 = math.exp %574 : vector<8x8xf32>
    %cst_240 = arith.constant dense<0.000000e+00> : vector<8xf32>
    %576 = vector.multi_reduction <add>, %575, %cst_240 [1] : vector<8x8xf32> to vector<8xf32>
    %577 = vector.shape_cast %576 : vector<8xf32> to vector<8x1xf32>
    %578 = tpu.reciprocal %577 {approx = true} : vector<8x1xf32> -> vector<8x1xf32>
    %579 = vector.broadcast %578 : vector<8x1xf32> to vector<8x8xf32>
    %580 = arith.mulf %575, %579 : vector<8x8xf32>
    %cst_241 = arith.constant dense<0.000000e+00> : vector<8x8xf32>
    %581 = tpu.matmul %580, %567, %cst_241 {dimension_numbers = #tpu.dot_dimension_numbers<[1], [0], [0], [1], [0, 0, 1, 1], [], []>} : vector<8x8xf32>, vector<8x8xf32>, vector<8x8xf32> -> vector<8x8xf32>
    %582 = vector.extract_strided_slice %550 {offsets = [0, 0], sizes = [8, 32], strides = [1, 1]} : vector<32x32xf32> to vector<8x32xf32>
    %cst_242 = arith.constant dense<0.000000e+00> : vector<8x32xf32>
    %583 = tpu.matmul %581, %582, %cst_242 {dimension_numbers = #tpu.dot_dimension_numbers<[1], [0], [0], [1], [0, 0, 1, 1], [], []>} : vector<8x8xf32>, vector<8x32xf32>, vector<8x32xf32> -> vector<8x32xf32>
    %584 = arith.addf %564, %583 : vector<8x32xf32>
    %585 = vector.extract_strided_slice %556 {offsets = [0, 8], sizes = [8, 8], strides = [1, 1]} : vector<8x32xf32> to vector<8x8xf32>
    %586 = vector.extract_strided_slice %561 {offsets = [0, 8], sizes = [8, 8], strides = [1, 1]} : vector<8x64xf32> to vector<8x8xf32>
    %587 = vector.extract_strided_slice %561 {offsets = [0, 40], sizes = [8, 8], strides = [1, 1]} : vector<8x64xf32> to vector<8x8xf32>
    %cst_243 = arith.constant dense<0.000000e+00> : vector<8x8xf32>
    %588 = tpu.matmul %585, %586, %cst_243 {dimension_numbers = #tpu.dot_dimension_numbers<[1], [1], [0], [0], [0, 0, 1, 0], [], []>} : vector<8x8xf32>, vector<8x8xf32>, vector<8x8xf32> -> vector<8x8xf32>
    %cst_244 = arith.constant 0.353553385 : f32
    %589 = vector.broadcast %cst_244 : f32 to vector<8x8xf32>
    %590 = arith.mulf %588, %589 : vector<8x8xf32>
    %cst_245 = arith.constant dense<0xFF800000> : vector<8xf32>
    %591 = vector.multi_reduction <maximumf>, %590, %cst_245 [1] : vector<8x8xf32> to vector<8xf32>
    %592 = vector.shape_cast %591 : vector<8xf32> to vector<8x1xf32>
    %593 = vector.broadcast %592 : vector<8x1xf32> to vector<8x8xf32>
    %594 = arith.subf %590, %593 : vector<8x8xf32>
    %595 = math.exp %594 : vector<8x8xf32>
    %cst_246 = arith.constant dense<0.000000e+00> : vector<8xf32>
    %596 = vector.multi_reduction <add>, %595, %cst_246 [1] : vector<8x8xf32> to vector<8xf32>
    %597 = vector.shape_cast %596 : vector<8xf32> to vector<8x1xf32>
    %598 = tpu.reciprocal %597 {approx = true} : vector<8x1xf32> -> vector<8x1xf32>
    %599 = vector.broadcast %598 : vector<8x1xf32> to vector<8x8xf32>
    %600 = arith.mulf %595, %599 : vector<8x8xf32>
    %cst_247 = arith.constant dense<0.000000e+00> : vector<8x8xf32>
    %601 = tpu.matmul %600, %587, %cst_247 {dimension_numbers = #tpu.dot_dimension_numbers<[1], [0], [0], [1], [0, 0, 1, 1], [], []>} : vector<8x8xf32>, vector<8x8xf32>, vector<8x8xf32> -> vector<8x8xf32>
    %602 = vector.extract_strided_slice %550 {offsets = [8, 0], sizes = [8, 32], strides = [1, 1]} : vector<32x32xf32> to vector<8x32xf32>
    %cst_248 = arith.constant dense<0.000000e+00> : vector<8x32xf32>
    %603 = tpu.matmul %601, %602, %cst_248 {dimension_numbers = #tpu.dot_dimension_numbers<[1], [0], [0], [1], [0, 0, 1, 1], [], []>} : vector<8x8xf32>, vector<8x32xf32>, vector<8x32xf32> -> vector<8x32xf32>
    %604 = arith.addf %584, %603 : vector<8x32xf32>
    %605 = vector.extract_strided_slice %556 {offsets = [0, 16], sizes = [8, 8], strides = [1, 1]} : vector<8x32xf32> to vector<8x8xf32>
    %606 = vector.extract_strided_slice %561 {offsets = [0, 16], sizes = [8, 8], strides = [1, 1]} : vector<8x64xf32> to vector<8x8xf32>
    %607 = vector.extract_strided_slice %561 {offsets = [0, 48], sizes = [8, 8], strides = [1, 1]} : vector<8x64xf32> to vector<8x8xf32>
    %cst_249 = arith.constant dense<0.000000e+00> : vector<8x8xf32>
    %608 = tpu.matmul %605, %606, %cst_249 {dimension_numbers = #tpu.dot_dimension_numbers<[1], [1], [0], [0], [0, 0, 1, 0], [], []>} : vector<8x8xf32>, vector<8x8xf32>, vector<8x8xf32> -> vector<8x8xf32>
    %cst_250 = arith.constant 0.353553385 : f32
    %609 = vector.broadcast %cst_250 : f32 to vector<8x8xf32>
    %610 = arith.mulf %608, %609 : vector<8x8xf32>
    %cst_251 = arith.constant dense<0xFF800000> : vector<8xf32>
    %611 = vector.multi_reduction <maximumf>, %610, %cst_251 [1] : vector<8x8xf32> to vector<8xf32>
    %612 = vector.shape_cast %611 : vector<8xf32> to vector<8x1xf32>
    %613 = vector.broadcast %612 : vector<8x1xf32> to vector<8x8xf32>
    %614 = arith.subf %610, %613 : vector<8x8xf32>
    %615 = math.exp %614 : vector<8x8xf32>
    %cst_252 = arith.constant dense<0.000000e+00> : vector<8xf32>
    %616 = vector.multi_reduction <add>, %615, %cst_252 [1] : vector<8x8xf32> to vector<8xf32>
    %617 = vector.shape_cast %616 : vector<8xf32> to vector<8x1xf32>
    %618 = tpu.reciprocal %617 {approx = true} : vector<8x1xf32> -> vector<8x1xf32>
    %619 = vector.broadcast %618 : vector<8x1xf32> to vector<8x8xf32>
    %620 = arith.mulf %615, %619 : vector<8x8xf32>
    %cst_253 = arith.constant dense<0.000000e+00> : vector<8x8xf32>
    %621 = tpu.matmul %620, %607, %cst_253 {dimension_numbers = #tpu.dot_dimension_numbers<[1], [0], [0], [1], [0, 0, 1, 1], [], []>} : vector<8x8xf32>, vector<8x8xf32>, vector<8x8xf32> -> vector<8x8xf32>
    %622 = vector.extract_strided_slice %550 {offsets = [16, 0], sizes = [8, 32], strides = [1, 1]} : vector<32x32xf32> to vector<8x32xf32>
    %cst_254 = arith.constant dense<0.000000e+00> : vector<8x32xf32>
    %623 = tpu.matmul %621, %622, %cst_254 {dimension_numbers = #tpu.dot_dimension_numbers<[1], [0], [0], [1], [0, 0, 1, 1], [], []>} : vector<8x8xf32>, vector<8x32xf32>, vector<8x32xf32> -> vector<8x32xf32>
    %624 = arith.addf %604, %623 : vector<8x32xf32>
    %625 = vector.extract_strided_slice %556 {offsets = [0, 24], sizes = [8, 8], strides = [1, 1]} : vector<8x32xf32> to vector<8x8xf32>
    %626 = vector.extract_strided_slice %561 {offsets = [0, 24], sizes = [8, 8], strides = [1, 1]} : vector<8x64xf32> to vector<8x8xf32>
    %627 = vector.extract_strided_slice %561 {offsets = [0, 56], sizes = [8, 8], strides = [1, 1]} : vector<8x64xf32> to vector<8x8xf32>
    %cst_255 = arith.constant dense<0.000000e+00> : vector<8x8xf32>
    %628 = tpu.matmul %625, %626, %cst_255 {dimension_numbers = #tpu.dot_dimension_numbers<[1], [1], [0], [0], [0, 0, 1, 0], [], []>} : vector<8x8xf32>, vector<8x8xf32>, vector<8x8xf32> -> vector<8x8xf32>
    %cst_256 = arith.constant 0.353553385 : f32
    %629 = vector.broadcast %cst_256 : f32 to vector<8x8xf32>
    %630 = arith.mulf %628, %629 : vector<8x8xf32>
    %cst_257 = arith.constant dense<0xFF800000> : vector<8xf32>
    %631 = vector.multi_reduction <maximumf>, %630, %cst_257 [1] : vector<8x8xf32> to vector<8xf32>
    %632 = vector.shape_cast %631 : vector<8xf32> to vector<8x1xf32>
    %633 = vector.broadcast %632 : vector<8x1xf32> to vector<8x8xf32>
    %634 = arith.subf %630, %633 : vector<8x8xf32>
    %635 = math.exp %634 : vector<8x8xf32>
    %cst_258 = arith.constant dense<0.000000e+00> : vector<8xf32>
    %636 = vector.multi_reduction <add>, %635, %cst_258 [1] : vector<8x8xf32> to vector<8xf32>
    %637 = vector.shape_cast %636 : vector<8xf32> to vector<8x1xf32>
    %638 = tpu.reciprocal %637 {approx = true} : vector<8x1xf32> -> vector<8x1xf32>
    %639 = vector.broadcast %638 : vector<8x1xf32> to vector<8x8xf32>
    %640 = arith.mulf %635, %639 : vector<8x8xf32>
    %cst_259 = arith.constant dense<0.000000e+00> : vector<8x8xf32>
    %641 = tpu.matmul %640, %627, %cst_259 {dimension_numbers = #tpu.dot_dimension_numbers<[1], [0], [0], [1], [0, 0, 1, 1], [], []>} : vector<8x8xf32>, vector<8x8xf32>, vector<8x8xf32> -> vector<8x8xf32>
    %642 = vector.extract_strided_slice %550 {offsets = [24, 0], sizes = [8, 32], strides = [1, 1]} : vector<32x32xf32> to vector<8x32xf32>
    %cst_260 = arith.constant dense<0.000000e+00> : vector<8x32xf32>
    %643 = tpu.matmul %641, %642, %cst_260 {dimension_numbers = #tpu.dot_dimension_numbers<[1], [0], [0], [1], [0, 0, 1, 1], [], []>} : vector<8x8xf32>, vector<8x32xf32>, vector<8x32xf32> -> vector<8x32xf32>
    %644 = arith.addf %624, %643 : vector<8x32xf32>
    %645 = arith.addf %549, %644 : vector<8x32xf32>
    %c0_261 = arith.constant 0 : index
    %c0_262 = arith.constant 0 : index
    %646 = vector.load %arg29[%c0_261, %c0_262] : memref<1x32xf32, #tpu.memory_space<vmem>>, vector<1x32xf32>
    %c0_263 = arith.constant 0 : index
    %c0_264 = arith.constant 0 : index
    %647 = vector.load %arg30[%c0_263, %c0_264] : memref<1x32xf32, #tpu.memory_space<vmem>>, vector<1x32xf32>
    %cst_265 = arith.constant dense<0.000000e+00> : vector<8xf32>
    %648 = vector.multi_reduction <add>, %645, %cst_265 [1] : vector<8x32xf32> to vector<8xf32>
    %649 = vector.shape_cast %648 : vector<8xf32> to vector<8x1xf32>
    %cst_266 = arith.constant 3.200000e+01 : f32
    %650 = vector.broadcast %cst_266 : f32 to vector<8x1xf32>
    %651 = arith.divf %649, %650 : vector<8x1xf32>
    %652 = vector.broadcast %651 : vector<8x1xf32> to vector<8x32xf32>
    %653 = arith.subf %645, %652 : vector<8x32xf32>
    %654 = arith.mulf %653, %653 : vector<8x32xf32>
    %cst_267 = arith.constant dense<0.000000e+00> : vector<8xf32>
    %655 = vector.multi_reduction <add>, %654, %cst_267 [1] : vector<8x32xf32> to vector<8xf32>
    %656 = vector.shape_cast %655 : vector<8xf32> to vector<8x1xf32>
    %cst_268 = arith.constant 3.200000e+01 : f32
    %657 = vector.broadcast %cst_268 : f32 to vector<8x1xf32>
    %658 = arith.divf %656, %657 : vector<8x1xf32>
    %cst_269 = arith.constant 9.99999974E-6 : f32
    %659 = vector.broadcast %cst_269 : f32 to vector<8x1xf32>
    %660 = arith.addf %658, %659 : vector<8x1xf32>
    %661 = math.rsqrt %660 : vector<8x1xf32>
    %662 = vector.broadcast %661 : vector<8x1xf32> to vector<8x32xf32>
    %663 = arith.mulf %653, %662 : vector<8x32xf32>
    %664 = vector.broadcast %646 : vector<1x32xf32> to vector<8x32xf32>
    %665 = arith.mulf %663, %664 : vector<8x32xf32>
    %666 = vector.broadcast %647 : vector<1x32xf32> to vector<8x32xf32>
    %667 = arith.addf %665, %666 : vector<8x32xf32>
    %c0_270 = arith.constant 0 : index
    %c0_271 = arith.constant 0 : index
    %668 = vector.load %arg31[%c0_270, %c0_271] : memref<32x64xf32, #tpu.memory_space<vmem>>, vector<32x64xf32>
    %c0_272 = arith.constant 0 : index
    %c0_273 = arith.constant 0 : index
    %669 = vector.load %arg32[%c0_272, %c0_273] : memref<1x64xf32, #tpu.memory_space<vmem>>, vector<1x64xf32>
    %c0_274 = arith.constant 0 : index
    %c0_275 = arith.constant 0 : index
    %670 = vector.load %arg33[%c0_274, %c0_275] : memref<64x32xf32, #tpu.memory_space<vmem>>, vector<64x32xf32>
    %c0_276 = arith.constant 0 : index
    %c0_277 = arith.constant 0 : index
    %671 = vector.load %arg34[%c0_276, %c0_277] : memref<1x32xf32, #tpu.memory_space<vmem>>, vector<1x32xf32>
    %cst_278 = arith.constant dense<0.000000e+00> : vector<8x64xf32>
    %672 = tpu.matmul %667, %668, %cst_278 {dimension_numbers = #tpu.dot_dimension_numbers<[1], [0], [0], [1], [0, 0, 1, 1], [], []>} : vector<8x32xf32>, vector<32x64xf32>, vector<8x64xf32> -> vector<8x64xf32>
    %673 = vector.broadcast %669 : vector<1x64xf32> to vector<8x64xf32>
    %674 = arith.addf %672, %673 : vector<8x64xf32>
    %cst_279 = arith.constant 0.000000e+00 : f32
    %675 = vector.broadcast %cst_279 : f32 to vector<8x64xf32>
    %676 = arith.maximumf %674, %675 : vector<8x64xf32>
    %cst_280 = arith.constant dense<0.000000e+00> : vector<8x32xf32>
    %677 = tpu.matmul %676, %670, %cst_280 {dimension_numbers = #tpu.dot_dimension_numbers<[1], [0], [0], [1], [0, 0, 1, 1], [], []>} : vector<8x64xf32>, vector<64x32xf32>, vector<8x32xf32> -> vector<8x32xf32>
    %678 = vector.broadcast %671 : vector<1x32xf32> to vector<8x32xf32>
    %679 = arith.addf %677, %678 : vector<8x32xf32>
    %680 = arith.addf %667, %679 : vector<8x32xf32>
    %c0_281 = arith.constant 0 : index
    %c0_282 = arith.constant 0 : index
    %681 = vector.load %arg35[%c0_281, %c0_282] : memref<1x32xf32, #tpu.memory_space<vmem>>, vector<1x32xf32>
    %c0_283 = arith.constant 0 : index
    %c0_284 = arith.constant 0 : index
    %682 = vector.load %arg36[%c0_283, %c0_284] : memref<1x32xf32, #tpu.memory_space<vmem>>, vector<1x32xf32>
    %cst_285 = arith.constant dense<0.000000e+00> : vector<8xf32>
    %683 = vector.multi_reduction <add>, %680, %cst_285 [1] : vector<8x32xf32> to vector<8xf32>
    %684 = vector.shape_cast %683 : vector<8xf32> to vector<8x1xf32>
    %cst_286 = arith.constant 3.200000e+01 : f32
    %685 = vector.broadcast %cst_286 : f32 to vector<8x1xf32>
    %686 = arith.divf %684, %685 : vector<8x1xf32>
    %687 = vector.broadcast %686 : vector<8x1xf32> to vector<8x32xf32>
    %688 = arith.subf %680, %687 : vector<8x32xf32>
    %689 = arith.mulf %688, %688 : vector<8x32xf32>
    %cst_287 = arith.constant dense<0.000000e+00> : vector<8xf32>
    %690 = vector.multi_reduction <add>, %689, %cst_287 [1] : vector<8x32xf32> to vector<8xf32>
    %691 = vector.shape_cast %690 : vector<8xf32> to vector<8x1xf32>
    %cst_288 = arith.constant 3.200000e+01 : f32
    %692 = vector.broadcast %cst_288 : f32 to vector<8x1xf32>
    %693 = arith.divf %691, %692 : vector<8x1xf32>
    %cst_289 = arith.constant 9.99999974E-6 : f32
    %694 = vector.broadcast %cst_289 : f32 to vector<8x1xf32>
    %695 = arith.addf %693, %694 : vector<8x1xf32>
    %696 = math.rsqrt %695 : vector<8x1xf32>
    %697 = vector.broadcast %696 : vector<8x1xf32> to vector<8x32xf32>
    %698 = arith.mulf %688, %697 : vector<8x32xf32>
    %699 = vector.broadcast %681 : vector<1x32xf32> to vector<8x32xf32>
    %700 = arith.mulf %698, %699 : vector<8x32xf32>
    %701 = vector.broadcast %682 : vector<1x32xf32> to vector<8x32xf32>
    %702 = arith.addf %700, %701 : vector<8x32xf32>
    %c0_290 = arith.constant 0 : index
    %c0_291 = arith.constant 0 : index
    %703 = vector.load %arg37[%c0_290, %c0_291] : memref<32x12xf32, #tpu.memory_space<vmem>>, vector<32x12xf32>
    %cst_292 = arith.constant dense<0.000000e+00> : vector<8x12xf32>
    %704 = tpu.matmul %702, %703, %cst_292 {dimension_numbers = #tpu.dot_dimension_numbers<[1], [0], [0], [1], [0, 0, 1, 1], [], []>} : vector<8x32xf32>, vector<32x12xf32>, vector<8x12xf32> -> vector<8x12xf32>
    %c0_293 = arith.constant 0 : index
    %c0_294 = arith.constant 0 : index
    %705 = vector.load %arg38[%c0_293, %c0_294] : memref<1x12xf32, #tpu.memory_space<vmem>>, vector<1x12xf32>
    %706 = vector.broadcast %705 : vector<1x12xf32> to vector<8x12xf32>
    %707 = arith.addf %704, %706 : vector<8x12xf32>
    %c0_295 = arith.constant 0 : index
    %c0_296 = arith.constant 0 : index
    %708 = vector.load %arg39[%c0_295, %c0_296] : memref<12x32xf32, #tpu.memory_space<vmem>>, vector<12x32xf32>
    %cst_297 = arith.constant dense<0.000000e+00> : vector<8x32xf32>
    %709 = tpu.matmul %707, %708, %cst_297 {dimension_numbers = #tpu.dot_dimension_numbers<[1], [0], [0], [1], [0, 0, 1, 1], [], []>} : vector<8x12xf32>, vector<12x32xf32>, vector<8x32xf32> -> vector<8x32xf32>
    %c0_298 = arith.constant 0 : index
    %c0_299 = arith.constant 0 : index
    %710 = vector.load %arg40[%c0_298, %c0_299] : memref<32x32xf32, #tpu.memory_space<vmem>>, vector<32x32xf32>
    %cst_300 = arith.constant dense<0.000000e+00> : vector<8x32xf32>
    %711 = tpu.matmul %702, %710, %cst_300 {dimension_numbers = #tpu.dot_dimension_numbers<[1], [0], [0], [1], [0, 0, 1, 1], [], []>} : vector<8x32xf32>, vector<32x32xf32>, vector<8x32xf32> -> vector<8x32xf32>
    %712 = arith.addf %709, %711 : vector<8x32xf32>
    %c0_301 = arith.constant 0 : index
    %c0_302 = arith.constant 0 : index
    %713 = vector.load %arg41[%c0_301, %c0_302] : memref<1x32xf32, #tpu.memory_space<vmem>>, vector<1x32xf32>
    %714 = vector.broadcast %713 : vector<1x32xf32> to vector<8x32xf32>
    %715 = arith.addf %712, %714 : vector<8x32xf32>
    %c0_303 = arith.constant 0 : index
    %c0_304 = arith.constant 0 : index
    %716 = vector.load %arg42[%c0_303, %c0_304] : memref<32x6xf32, #tpu.memory_space<vmem>>, vector<32x6xf32>
    %cst_305 = arith.constant dense<0.000000e+00> : vector<8x6xf32>
    %717 = tpu.matmul %715, %716, %cst_305 {dimension_numbers = #tpu.dot_dimension_numbers<[1], [0], [0], [1], [0, 0, 1, 1], [], []>} : vector<8x32xf32>, vector<32x6xf32>, vector<8x6xf32> -> vector<8x6xf32>
    %c0_306 = arith.constant 0 : index
    %c0_307 = arith.constant 0 : index
    %718 = vector.load %arg43[%c0_306, %c0_307] : memref<1x6xf32, #tpu.memory_space<vmem>>, vector<1x6xf32>
    %719 = vector.broadcast %718 : vector<1x6xf32> to vector<8x6xf32>
    %720 = arith.addf %717, %719 : vector<8x6xf32>
    %c0_308 = arith.constant 0 : index
    %c0_309 = arith.constant 0 : index
    %c0_310 = arith.constant 0 : index
    %721 = vector.load %arg45[%c0_308, %c0_309, %c0_310] : memref<1x8x18xf32, #tpu.memory_space<vmem>>, vector<1x8x12xf32>
    %722 = vector.shape_cast %721 : vector<1x8x12xf32> to vector<8x12xf32>
    %723 = vector.shape_cast %707 : vector<8x12xf32> to vector<1x8x12xf32>
    tpu.vector_store %arg45[%c0_308, %c0_309, %c0_310], %723 {strides = array<i32>} : memref<1x8x18xf32, #tpu.memory_space<vmem>>, vector<1x8x12xf32>,
    %c0_311 = arith.constant 0 : index
    %c0_312 = arith.constant 0 : index
    %c12 = arith.constant 12 : index
    %724 = vector.load %arg45[%c0_311, %c0_312, %c12] : memref<1x8x18xf32, #tpu.memory_space<vmem>>, vector<1x8x6xf32>
    %725 = vector.shape_cast %724 : vector<1x8x6xf32> to vector<8x6xf32>
    %726 = vector.shape_cast %720 : vector<8x6xf32> to vector<1x8x6xf32>
    tpu.vector_store %arg45[%c0_311, %c0_312, %c12], %726 {strides = array<i32>} : memref<1x8x18xf32, #tpu.memory_space<vmem>>, vector<1x8x6xf32>,
    return
  }
  func.func @transform_0(%arg0: i32) -> (i32, i32, i32) {
    %c0_i32 = arith.constant 0 : i32
    %c0_i32_0 = arith.constant 0 : i32
    %c0_i32_1 = arith.constant 0 : i32
    return %arg0, %c0_i32, %c0_i32_0 : i32, i32, i32
  }
  func.func @transform_1(%arg0: i32) -> (i32, i32, i32) {
    %c0_i32 = arith.constant 0 : i32
    %c0_i32_0 = arith.constant 0 : i32
    %c0_i32_1 = arith.constant 0 : i32
    return %arg0, %c0_i32, %c0_i32_0 : i32, i32, i32
  }
  func.func @transform_2(%arg0: i32) -> (i32, i32) {
    %c0_i32 = arith.constant 0 : i32
    %c0_i32_0 = arith.constant 0 : i32
    %c0_i32_1 = arith.constant 0 : i32
    return %c0_i32, %c0_i32_0 : i32, i32
  }
  func.func @transform_3(%arg0: i32) -> (i32, i32) {
    %c0_i32 = arith.constant 0 : i32
    %c0_i32_0 = arith.constant 0 : i32
    %c0_i32_1 = arith.constant 0 : i32
    return %c0_i32, %c0_i32_0 : i32, i32
  }
  func.func @transform_4(%arg0: i32) -> (i32, i32) {
    %c0_i32 = arith.constant 0 : i32
    %c0_i32_0 = arith.constant 0 : i32
    %c0_i32_1 = arith.constant 0 : i32
    return %c0_i32, %c0_i32_0 : i32, i32
  }
  func.func @transform_5(%arg0: i32) -> (i32, i32) {
    %c0_i32 = arith.constant 0 : i32
    %c0_i32_0 = arith.constant 0 : i32
    %c0_i32_1 = arith.constant 0 : i32
    return %c0_i32, %c0_i32_0 : i32, i32
  }
  func.func @transform_6(%arg0: i32) -> (i32, i32) {
    %c0_i32 = arith.constant 0 : i32
    %c0_i32_0 = arith.constant 0 : i32
    %c0_i32_1 = arith.constant 0 : i32
    return %c0_i32, %c0_i32_0 : i32, i32
  }
  func.func @transform_7(%arg0: i32) -> (i32, i32) {
    %c0_i32 = arith.constant 0 : i32
    %c0_i32_0 = arith.constant 0 : i32
    %c0_i32_1 = arith.constant 0 : i32
    return %c0_i32, %c0_i32_0 : i32, i32
  }
  func.func @transform_8(%arg0: i32) -> (i32, i32) {
    %c0_i32 = arith.constant 0 : i32
    %c0_i32_0 = arith.constant 0 : i32
    %c0_i32_1 = arith.constant 0 : i32
    return %c0_i32, %c0_i32_0 : i32, i32
  }
  func.func @transform_9(%arg0: i32) -> (i32, i32) {
    %c0_i32 = arith.constant 0 : i32
    %c0_i32_0 = arith.constant 0 : i32
    %c0_i32_1 = arith.constant 0 : i32
    return %c0_i32, %c0_i32_0 : i32, i32
  }
  func.func @transform_10(%arg0: i32) -> (i32, i32) {
    %c0_i32 = arith.constant 0 : i32
    %c0_i32_0 = arith.constant 0 : i32
    %c0_i32_1 = arith.constant 0 : i32
    return %c0_i32, %c0_i32_0 : i32, i32
  }
  func.func @transform_11(%arg0: i32) -> (i32, i32) {
    %c0_i32 = arith.constant 0 : i32
    %c0_i32_0 = arith.constant 0 : i32
    %c0_i32_1 = arith.constant 0 : i32
    return %c0_i32, %c0_i32_0 : i32, i32
  }
  func.func @transform_12(%arg0: i32) -> (i32, i32) {
    %c0_i32 = arith.constant 0 : i32
    %c0_i32_0 = arith.constant 0 : i32
    %c0_i32_1 = arith.constant 0 : i32
    return %c0_i32, %c0_i32_0 : i32, i32
  }
  func.func @transform_13(%arg0: i32) -> (i32, i32) {
    %c0_i32 = arith.constant 0 : i32
    %c0_i32_0 = arith.constant 0 : i32
    %c0_i32_1 = arith.constant 0 : i32
    return %c0_i32, %c0_i32_0 : i32, i32
  }
  func.func @transform_14(%arg0: i32) -> (i32, i32) {
    %c0_i32 = arith.constant 0 : i32
    %c0_i32_0 = arith.constant 0 : i32
    %c0_i32_1 = arith.constant 0 : i32
    return %c0_i32, %c0_i32_0 : i32, i32
  }
  func.func @transform_15(%arg0: i32) -> (i32, i32) {
    %c0_i32 = arith.constant 0 : i32
    %c0_i32_0 = arith.constant 0 : i32
    %c0_i32_1 = arith.constant 0 : i32
    return %c0_i32, %c0_i32_0 : i32, i32
  }
  func.func @transform_16(%arg0: i32) -> (i32, i32) {
    %c0_i32 = arith.constant 0 : i32
    %c0_i32_0 = arith.constant 0 : i32
    %c0_i32_1 = arith.constant 0 : i32
    return %c0_i32, %c0_i32_0 : i32, i32
  }
  func.func @transform_17(%arg0: i32) -> (i32, i32) {
    %c0_i32 = arith.constant 0 : i32
    %c0_i32_0 = arith.constant 0 : i32
    %c0_i32_1 = arith.constant 0 : i32
    return %c0_i32, %c0_i32_0 : i32, i32
  }
  func.func @transform_18(%arg0: i32) -> (i32, i32) {
    %c0_i32 = arith.constant 0 : i32
    %c0_i32_0 = arith.constant 0 : i32
    %c0_i32_1 = arith.constant 0 : i32
    return %c0_i32, %c0_i32_0 : i32, i32
  }
  func.func @transform_19(%arg0: i32) -> (i32, i32) {
    %c0_i32 = arith.constant 0 : i32
    %c0_i32_0 = arith.constant 0 : i32
    %c0_i32_1 = arith.constant 0 : i32
    return %c0_i32, %c0_i32_0 : i32, i32
  }
  func.func @transform_20(%arg0: i32) -> (i32, i32) {
    %c0_i32 = arith.constant 0 : i32
    %c0_i32_0 = arith.constant 0 : i32
    %c0_i32_1 = arith.constant 0 : i32
    return %c0_i32, %c0_i32_0 : i32, i32
  }
  func.func @transform_21(%arg0: i32) -> (i32, i32) {
    %c0_i32 = arith.constant 0 : i32
    %c0_i32_0 = arith.constant 0 : i32
    %c0_i32_1 = arith.constant 0 : i32
    return %c0_i32, %c0_i32_0 : i32, i32
  }
  func.func @transform_22(%arg0: i32) -> (i32, i32) {
    %c0_i32 = arith.constant 0 : i32
    %c0_i32_0 = arith.constant 0 : i32
    %c0_i32_1 = arith.constant 0 : i32
    return %c0_i32, %c0_i32_0 : i32, i32
  }
  func.func @transform_23(%arg0: i32) -> (i32, i32) {
    %c0_i32 = arith.constant 0 : i32
    %c0_i32_0 = arith.constant 0 : i32
    %c0_i32_1 = arith.constant 0 : i32
    return %c0_i32, %c0_i32_0 : i32, i32
  }
  func.func @transform_24(%arg0: i32) -> (i32, i32) {
    %c0_i32 = arith.constant 0 : i32
    %c0_i32_0 = arith.constant 0 : i32
    %c0_i32_1 = arith.constant 0 : i32
    return %c0_i32, %c0_i32_0 : i32, i32
  }
  func.func @transform_25(%arg0: i32) -> (i32, i32) {
    %c0_i32 = arith.constant 0 : i32
    %c0_i32_0 = arith.constant 0 : i32
    %c0_i32_1 = arith.constant 0 : i32
    return %c0_i32, %c0_i32_0 : i32, i32
  }
  func.func @transform_26(%arg0: i32) -> (i32, i32) {
    %c0_i32 = arith.constant 0 : i32
    %c0_i32_0 = arith.constant 0 : i32
    %c0_i32_1 = arith.constant 0 : i32
    return %c0_i32, %c0_i32_0 : i32, i32
  }
  func.func @transform_27(%arg0: i32) -> (i32, i32) {
    %c0_i32 = arith.constant 0 : i32
    %c0_i32_0 = arith.constant 0 : i32
    %c0_i32_1 = arith.constant 0 : i32
    return %c0_i32, %c0_i32_0 : i32, i32
  }
  func.func @transform_28(%arg0: i32) -> (i32, i32) {
    %c0_i32 = arith.constant 0 : i32
    %c0_i32_0 = arith.constant 0 : i32
    %c0_i32_1 = arith.constant 0 : i32
    return %c0_i32, %c0_i32_0 : i32, i32
  }
  func.func @transform_29(%arg0: i32) -> (i32, i32) {
    %c0_i32 = arith.constant 0 : i32
    %c0_i32_0 = arith.constant 0 : i32
    %c0_i32_1 = arith.constant 0 : i32
    return %c0_i32, %c0_i32_0 : i32, i32
  }
  func.func @transform_30(%arg0: i32) -> (i32, i32) {
    %c0_i32 = arith.constant 0 : i32
    %c0_i32_0 = arith.constant 0 : i32
    %c0_i32_1 = arith.constant 0 : i32
    return %c0_i32, %c0_i32_0 : i32, i32
  }
  func.func @transform_31(%arg0: i32) -> (i32, i32) {
    %c0_i32 = arith.constant 0 : i32
    %c0_i32_0 = arith.constant 0 : i32
    %c0_i32_1 = arith.constant 0 : i32
    return %c0_i32, %c0_i32_0 : i32, i32
  }
  func.func @transform_32(%arg0: i32) -> (i32, i32) {
    %c0_i32 = arith.constant 0 : i32
    %c0_i32_0 = arith.constant 0 : i32
    %c0_i32_1 = arith.constant 0 : i32
    return %c0_i32, %c0_i32_0 : i32, i32
  }
  func.func @transform_33(%arg0: i32) -> (i32, i32) {
    %c0_i32 = arith.constant 0 : i32
    %c0_i32_0 = arith.constant 0 : i32
    %c0_i32_1 = arith.constant 0 : i32
    return %c0_i32, %c0_i32_0 : i32, i32
  }
  func.func @transform_34(%arg0: i32) -> (i32, i32) {
    %c0_i32 = arith.constant 0 : i32
    %c0_i32_0 = arith.constant 0 : i32
    %c0_i32_1 = arith.constant 0 : i32
    return %c0_i32, %c0_i32_0 : i32, i32
  }
  func.func @transform_35(%arg0: i32) -> (i32, i32) {
    %c0_i32 = arith.constant 0 : i32
    %c0_i32_0 = arith.constant 0 : i32
    %c0_i32_1 = arith.constant 0 : i32
    return %c0_i32, %c0_i32_0 : i32, i32
  }
  func.func @transform_36(%arg0: i32) -> (i32, i32) {
    %c0_i32 = arith.constant 0 : i32
    %c0_i32_0 = arith.constant 0 : i32
    %c0_i32_1 = arith.constant 0 : i32
    return %c0_i32, %c0_i32_0 : i32, i32
  }
  func.func @transform_37(%arg0: i32) -> (i32, i32) {
    %c0_i32 = arith.constant 0 : i32
    %c0_i32_0 = arith.constant 0 : i32
    %c0_i32_1 = arith.constant 0 : i32
    return %c0_i32, %c0_i32_0 : i32, i32
  }
  func.func @transform_38(%arg0: i32) -> (i32, i32) {
    %c0_i32 = arith.constant 0 : i32
    %c0_i32_0 = arith.constant 0 : i32
    %c0_i32_1 = arith.constant 0 : i32
    return %c0_i32, %c0_i32_0 : i32, i32
  }
  func.func @transform_39(%arg0: i32) -> (i32, i32) {
    %c0_i32 = arith.constant 0 : i32
    %c0_i32_0 = arith.constant 0 : i32
    %c0_i32_1 = arith.constant 0 : i32
    return %c0_i32, %c0_i32_0 : i32, i32
  }
  func.func @transform_40(%arg0: i32) -> (i32, i32) {
    %c0_i32 = arith.constant 0 : i32
    %c0_i32_0 = arith.constant 0 : i32
    %c0_i32_1 = arith.constant 0 : i32
    return %c0_i32, %c0_i32_0 : i32, i32
  }
  func.func @transform_41(%arg0: i32) -> (i32, i32) {
    %c0_i32 = arith.constant 0 : i32
    %c0_i32_0 = arith.constant 0 : i32
    %c0_i32_1 = arith.constant 0 : i32
    return %c0_i32, %c0_i32_0 : i32, i32
  }
  func.func @transform_42(%arg0: i32) -> (i32, i32) {
    %c0_i32 = arith.constant 0 : i32
    %c0_i32_0 = arith.constant 0 : i32
    %c0_i32_1 = arith.constant 0 : i32
    return %c0_i32, %c0_i32_0 : i32, i32
  }
  func.func @transform_43(%arg0: i32) -> (i32, i32, i32) {
    %c0_i32 = arith.constant 0 : i32
    %c0_i32_0 = arith.constant 0 : i32
    %c0_i32_1 = arith.constant 0 : i32
    return %arg0, %c0_i32, %c0_i32_0 : i32, i32, i32
  }
  func.func @transform_44(%arg0: i32) -> (i32, i32, i32) {
    %c0_i32 = arith.constant 0 : i32
    %c0_i32_0 = arith.constant 0 : i32
    %c0_i32_1 = arith.constant 0 : i32
    return %arg0, %c0_i32, %c0_i32_0 : i32, i32, i32
  }
}

</mosaic_0001>

<bundles_post_ra>
// kernel: decoder_forward.1
= control target key start
LH: loop header
LB: loop body
LE: loop exit
PB: predicated region body
PF: predicated region fallthrough
CT: control target
= control target key end

     0   :  { %s10300_s6 = smov 1   ;;  %s10301_s10 = smov 2   ;;  %s11777_s0 = inlined_call_operand.smem [shape: u32[45], index: -1, kind: input, shape index: {}] }
   0x1   :  { %s10388_s5 = sld [smem:[%s11777_s0]]   ;;  %s10302_s14 = smov 3  }
   0x2   :  { %s10393_s9 = sld [smem:[%s11777_s0 + %s10300_s6]]   ;;  %s10303_s18 = smov 4  }
   0x3   :  { %s10398_s13 = sld [smem:[%s11777_s0 + %s10301_s10]]   ;;  %s10304_s22 = smov 5  }
   0x4   :  { %s10403_s17 = sld [smem:[%s11777_s0 + %s10302_s14]]   ;;  %s10305_s26 = smov 6  }
   0x5   :  { %s10408_s21 = sld [smem:[%s11777_s0 + %s10303_s18]]   ;;  %s10306_s30 = smov 7  }
   0x6   :  { %s10413_s25 = sld [smem:[%s11777_s0 + %s10304_s22]]   ;;  %s10307_s4 = smov 8  }
   0x7   :  { %11838 = sst [smem:[#allocation41_spill]] %s10388_s5  ;;  %s10308_s10 = smov 9  }
   0x8   :  { %11839 = sst [smem:[#allocation42_spill]] %s10393_s9  ;;  %s10309_s15 = smov 10  }
   0x9   :  { %11840 = sst [smem:[#allocation43_spill]] %s10398_s13  ;;  %s10310_s20 = smov 11  }
   0xa   :  { %11841 = sst [smem:[#allocation44_spill]] %s10403_s17  ;;  %s10312_s1 = smov 13  }
   0xb   :  { %11842 = sst [smem:[#allocation45_spill]] %s10408_s21  ;;  %s10313_s7 = smov 14  }
   0xc   :  { %s10418_s29 = sld [smem:[%s11777_s0 + %s10305_s26]]   ;;  %s10311_s26 = smov 12  }
   0xd   :  { %s10423_s3 = sld [smem:[%s11777_s0 + %s10306_s30]]   ;;  %s10315_s22 = smov 16  }
   0xe   :  { %s10428_s8 = sld [smem:[%s11777_s0 + %s10307_s4]]   ;;  %s10316_s28 = smov 17  }
   0xf   :  { %s10433_s14 = sld [smem:[%s11777_s0 + %s10308_s10]]  }
  0x10   :  { %s10438_s19 = sld [smem:[%s11777_s0 + %s10309_s15]]   ;;  %s10314_s15 = smov 15  }
  0x11   :  { %s10443_s24 = sld [smem:[%s11777_s0 + %s10310_s20]]  }
  0x12   :  { %11843 = sst [smem:[#allocation46_spill]] %s10418_s29 }
  0x13   :  { %11844 = sst [smem:[#allocation47_spill]] %s10423_s3 }
  0x14   :  { %11845 = sst [smem:[#allocation48_spill]] %s10428_s8 }
  0x15   :  { %11846 = sst [smem:[#allocation49_spill]] %s10433_s14 }
  0x16   :  { %s10448_s30 = sld [smem:[%s11777_s0 + %s10311_s26]]  }
  0x17   :  { %s10453_s6 = sld [smem:[%s11777_s0 + %s10312_s1]]  }
  0x18   :  { %s10458_s12 = sld [smem:[%s11777_s0 + %s10313_s7]]   ;;  %s10317_s7 = smov 18  }
  0x19   :  { %s10463_s20 = sld [smem:[%s11777_s0 + %s10314_s15]]   ;;  %s10318_s15 = smov 19  }
  0x1a   :  { %s10468_s27 = sld [smem:[%s11777_s0 + %s10315_s22]]   ;;  %s10319_s22 = smov 20  }
  0x1b   :  { %s10473_s4 = sld [smem:[%s11777_s0 + %s10316_s28]]   ;;  %s10320_s28 = smov 21  }
  0x1c   :  { %11847 = sst [smem:[#allocation50_spill]] %s10448_s30 }
  0x1d   :  { %11848 = sst [smem:[#allocation51_spill]] %s10453_s6 }
  0x1e   :  { %11849 = sst [smem:[#allocation52_spill]] %s10458_s12 }
  0x1f   :  { %s10478_s9 = sld [smem:[%s11777_s0 + %s10317_s7]]   ;;  %s10321_s7 = smov 22  }
  0x20   :  { %s10483_s13 = sld [smem:[%s11777_s0 + %s10318_s15]]   ;;  %s10322_s15 = smov 23  }
  0x21   :  { %11850 = sst [smem:[#allocation53_spill]] %s10473_s4 }
  0x22   :  { %s10488_s12 = sld [smem:[%s11777_s0 + %s10319_s22]]   ;;  %s10323_s22 = smov 24  }
  0x23   :  { %s10493_s30 = sld [smem:[%s11777_s0 + %s10320_s28]]   ;;  %s10324_s28 = smov 25  }
  0x24   :  { %s10503_s8 = sld [smem:[%s11777_s0 + %s10322_s15]]   ;;  %s10326_s15 = smov 27  }
  0x25   :  { %11851 = sst [smem:[#allocation54_spill]] %s10478_s9 }
  0x26   :  { %11852 = sst [smem:[#allocation55_spill]] %s10483_s13 }
  0x27   :  { %s10498_s9 = sld [smem:[%s11777_s0 + %s10321_s7]]   ;;  %s10325_s7 = smov 26  }
  0x28   :  { %11853 = sst [smem:[#allocation56_spill]] %s10488_s12 }
  0x29   :  { %11854 = sst [smem:[#allocation57_spill]] %s10493_s30 }
  0x2a   :  { %11856 = sst [smem:[#allocation59_spill]] %s10503_s8 }
  0x2b   :  { %s10508_s12 = sld [smem:[%s11777_s0 + %s10323_s22]]   ;;  %s10327_s22 = smov 28  }
  0x2c   :  { %s10513_s29 = sld [smem:[%s11777_s0 + %s10324_s28]]   ;;  %s10328_s28 = smov 29  }
  0x2d   :  { %11855 = sst [smem:[#allocation58_spill]] %s10498_s9 }
  0x2e   :  { %s10518_s21 = sld [smem:[%s11777_s0 + %s10325_s7]]   ;;  %s10329_s7 = smov 30  }
  0x2f   :  { %s10523_s5 = sld [smem:[%s11777_s0 + %s10326_s15]]   ;;  %s10330_s15 = smov 31  }
  0x30   :  { %s10533_s8 = sld [smem:[%s11777_s0 + %s10328_s28]]   ;;  %s10332_s28 = smov 33  }
  0x31   :  { %11857 = sst [smem:[#allocation60_spill]] %s10508_s12 }
  0x32   :  { %s10528_s12 = sld [smem:[%s11777_s0 + %s10327_s22]]   ;;  %s10331_s22 = smov 32  }
  0x33   :  { %s10548_s30 = sld [smem:[%s11777_s0 + %s10331_s22]]   ;;  %s10335_s22 = smov 36  }
  0x34   :  { %11858 = sst [smem:[#allocation61_spill]] %s10518_s21 }
  0x35   :  { %11859 = sst [smem:[#allocation62_spill]] %s10523_s5 }
  0x36   :  { %11861 = sst [smem:[#allocation64_spill]] %s10533_s8 }
  0x37   :  { %s10538_s21 = sld [smem:[%s11777_s0 + %s10329_s7]]   ;;  %s10333_s7 = smov 34  }
  0x38   :  { %11860 = sst [smem:[#allocation63_spill]] %s10528_s12 }
  0x39   :  { %s10543_s5 = sld [smem:[%s11777_s0 + %s10330_s15]]   ;;  %s10334_s15 = smov 35  }
  0x3a   :  { %11864 = sst [smem:[#allocation67_spill]] %s10548_s30 }
  0x3b   :  { %s10553_s8 = sld [smem:[%s11777_s0 + %s10332_s28]]   ;;  %s10336_s28 = smov 37  }
  0x3c   :  { %s10568_s30 = sld [smem:[%s11777_s0 + %s10335_s22]]   ;;  %s10339_s22 = smov 40  }
  0x3d   :  { %11862 = sst [smem:[#allocation65_spill]] %s10538_s21 }
  0x3e   :  { %s10558_s21 = sld [smem:[%s11777_s0 + %s10333_s7]]   ;;  %s10337_s7 = smov 38  }
  0x3f   :  { %11863 = sst [smem:[#allocation66_spill]] %s10543_s5 }
  0x40   :  { %s10563_s5 = sld [smem:[%s11777_s0 + %s10334_s15]]   ;;  %s10338_s15 = smov 39  }
  0x41   :  { %11865 = sst [smem:[#allocation68_spill]] %s10553_s8 }
  0x42   :  { %11868 = sst [smem:[#allocation71_spill]] %s10568_s30 }
  0x43   :  { %s10573_s8 = sld [smem:[%s11777_s0 + %s10336_s28]]   ;;  %s10340_s28 = smov 41  }
  0x44   :  { %11866 = sst [smem:[#allocation69_spill]] %s10558_s21 }
  0x45   :  { %s10578_s21 = sld [smem:[%s11777_s0 + %s10337_s7]]   ;;  %s10341_s7 = smov 42  }
  0x46   :  { %11867 = sst [smem:[#allocation70_spill]] %s10563_s5 }
  0x47   :  { %s10583_s5 = sld [smem:[%s11777_s0 + %s10338_s15]]   ;;  %s10342_s15 = smov 43  }
  0x48   :  { %s10588_s30 = sld [smem:[%s11777_s0 + %s10339_s22]]   ;;  %s10343_s22 = smov 44  }
  0x49   :  { %11869 = sst [smem:[#allocation72_spill]] %s10573_s8 }
  0x4a   :  { %s10593_s8 = sld [smem:[%s11777_s0 + %s10340_s28]]  }
  0x4b   :  { %11870 = sst [smem:[#allocation73_spill]] %s10578_s21 }
  0x4c   :  { %s10598_s21 = sld [smem:[%s11777_s0 + %s10341_s7]]  }
  0x4d   :  { %11871 = sst [smem:[#allocation74_spill]] %s10583_s5 }
  0x4e   :  { %11872 = sst [smem:[#allocation75_spill]] %s10588_s30 }
  0x4f   :  { %s10603_s5 = sld [smem:[%s11777_s0 + %s10342_s15]]  }
  0x50   :  { %s10608_s30 = sld [smem:[%s11777_s0 + %s10343_s22]]  }
  0x52   :  { %11873 = sst [smem:[#allocation76_spill]] %s10598_s21 }
  0x55   :  { %11874 = sst [smem:[#allocation77_spill]] %s10603_s5 }
  0x56   :  { %11875 = sst [smem:[#allocation78_spill]] %s10608_s30 }
  0x57   :  { %95 = vsyncpa [#allocation3], 0 }
  0x58   :  { %97 = vsyncpa [#allocation3 + $0x1], 0 }
  0x59   :  { %98 = vsyncpa [#allocation5], 0 }
  0x5a   :  { %99 = vsyncpa [#allocation8], 0 }
  0x5b   :  { %100 = vsyncpa [#allocation11], 0 }
  0x5c   :  { %101 = vsyncpa [#allocation14], 0 }
  0x5d   :  { %102 = vsyncpa [#allocation17], 0 }
  0x5e   :  { %103 = vsyncpa [#allocation20], 0 }
  0x5f   :  { %104 = vsyncpa [#allocation23], 0 }
  0x60   :  { %105 = vsyncpa [#allocation26], 0 }
  0x61   :  { %106 = vsyncpa [#allocation29], 0  ;;  %s10610_s28 = smov 0   ;;  %s10612_s1 = smov 0  }
  0x62   :  { %s10614_s2 = smov 0   ;;  %s10616_s7 = smov 0  }
  0x63 LB: > { %s11876_s17 = sld [smem:[#allocation44_spill]]  ;;  %s11877_s14 = sld [smem:[#allocation49_spill]]  ;;  %s10298_s7 = sphi %s10616_s7, %s11956_s7   ;;  %s10294_s2 = sphi %s10614_s2, %s11955_s2   ;;  %s10290_s1 = sphi %s10612_s1, %s11954_s1   ;;  %s10286_s28 = sphi %s10610_s28, %s11953_s28  }
  0x64   : > { %s11878_s13 = sld [smem:[#allocation55_spill]]  ;;  %s11880_s9 = sld [smem:[#allocation58_spill]] }
  0x65   : > { %s11879_s12 = sld [smem:[#allocation63_spill]]  ;;  %s11881_s6 = sld [smem:[#allocation51_spill]] }
  0x66   : > { %s11882_s4 = sld [smem:[#allocation53_spill]]  ;;  %s11883_s3 = sld [smem:[#allocation47_spill]] }
  0x67   : > { %s10344_s0 = smov [#allocation4]   ;;  %s10631_s11 = sadd.s32 4294967295, %s10298_s7  }
  0x68   : > { %s1098_s10 = sshll.u32 %s10344_s0, 4  ;;  %p8259_p0 = scmp.ge.s32.totalorder %s10298_s7, 1  ;;  %s10636_s10 = int_to_ptr.vmem [resolvable:$true] %s1098_s10 }
  0x69   : > { %p11797_p1 = scmp.eq.s32.totalorder %s10631_s11, 0  ;;  %p1082_p2 = scmp.lt.s32.totalorder %s10298_s7, 3 }
  0x6a   : > { %s10345_s16 = smov [#allocation7]   ;;  %s10346_s22 = smov [#allocation10]  }
  0x6b   : > { %p10638_p3 = pnand %p8259_p0, %p1082_p2  ;;  %s1126_s18 = sshll.u32 %s10345_s16, 4  ;;  %s10644_s18 = int_to_ptr.vmem [resolvable:$true] %s1126_s18 }
  0x6c   : > { %s1151_s23 = sshll.u32 %s10346_s22, 4  ;;  %s10347_s0 = smov [#allocation13]   ;;  %s10652_s23 = int_to_ptr.vmem [resolvable:$true] %s1151_s23 }
  0x6d   : > { %s11884_s15 = scalar_select %p10638_p3, 1, 0 }
  0x6e   : > { %p9367_p4 = pneg %p10638_p3  ;;  %s10654_s21 = sshll.u32 %s10347_s0, 4  ;;  %s1177_s21 = int_to_ptr.vmem [resolvable:$true] %s10654_s21 }
  0x6f   : > { %s9694_s30 = scalar_lea.hbm %s11876_s17, 32 }
  0x70   : > { %p10648_p5 = pnand %p9367_p4, %p11797_p1  ;;  %p9695_p6 = scmp.ne.s32.totalorder %s11876_s17, %s9694_s30 }
  0x71   : > { %p9701_p10 = scmp.lt.u32.totalorder %s9694_s30, %s11876_s17 }
  0x72   : > { %p10660_p7 = pneg %p10648_p5 }
  0x74   : > { %p9697_p8 = pnand %p10660_p7, %p9695_p6 }
  0x76   : > { %p9698_p9 = pneg %p9697_p8 }
  0x78   : > { %p9703_p11 = pnand %p9701_p10, %p9698_p9 }
  0x7a   : > { %9706 = shalt.err (!%p9703_p11)
}
  0x7b   : > { %s9707_s22 = scalar_lea.vmem %s10636_s10, 32  ;;  %p9715_p2 = scmp.lt.s32.totalorder %s10636_s10, %s10636_s10 }
  0x7c   : > { %p9708_p12 = scmp.ne.s32.totalorder %s10636_s10, %s9707_s22  ;;  %p9716_p4 = scmp.lt.s32.totalorder %s9707_s22, %s9707_s22 }
  0x7e   : > { %p9710_p13 = pnand %p9708_p12, %p10660_p7  ;;  %p9717_p1 = por %p9716_p4, %p9715_p2 }
  0x80   : > { %p9711_p0 = pneg %p9710_p13 }
  0x82   : > { %p9718_p3 = pnand %p9717_p1, %p9711_p0 }
  0x84   : > { %9721 = shalt.err (!%p9718_p3)
}
  0x85   : > { %9370 = dma.hbm_to_vmem [thread:$0]  (!%p10648_p5), %s11876_s17, 32, %s10636_s10, [#allocation5]  }
  0x86   : > { %s9722_s30 = scalar_lea.hbm %s11883_s3, 16 }
  0x87   : > { %p9723_p6 = scmp.ne.s32.totalorder %s11883_s3, %s9722_s30  ;;  %p9729_p10 = scmp.lt.u32.totalorder %s9722_s30, %s11883_s3 }
  0x89   : > { %p9725_p8 = pnand %p9723_p6, %p10660_p7 }
  0x8b   : > { %p9726_p9 = pneg %p9725_p8 }
  0x8d   : > { %p9731_p11 = pnand %p9729_p10, %p9726_p9 }
  0x8f   : > { %9734 = shalt.err (!%p9731_p11)
}
  0x90   : > { %s9735_s0 = scalar_lea.vmem %s10644_s18, 16  ;;  %s9742_s22 = scalar_lea.vmem %s10644_s18, 32 }
  0x91   : > { %p9736_p1 = scmp.ne.s32.totalorder %s10644_s18, %s9735_s0  ;;  %p9743_p13 = scmp.lt.s32.totalorder %s10644_s18, %s10644_s18 }
  0x92   : > { %p9744_p0 = scmp.lt.s32.totalorder %s9742_s22, %s9735_s0 }
  0x93   : > { %p9738_p3 = pnand %p9736_p1, %p10660_p7 }
  0x94   : > { %p9745_p2 = por %p9744_p0, %p9743_p13 }
  0x95   : > { %p9739_p12 = pneg %p9738_p3 }
  0x97   : > { %p9746_p4 = pnand %p9745_p2, %p9739_p12 }
  0x99   : > { %9749 = shalt.err (!%p9746_p4)
}
  0x9a   : > { %9376 = dma.hbm_to_vmem [thread:$0]  (!%p10648_p5), %s11883_s3, 16, %s10644_s18, [#allocation8]  }
  0x9b   : > { %s9750_s10 = scalar_lea.hbm %s10438_s19, 16 }
  0x9c   : > { %p9751_p6 = scmp.ne.s32.totalorder %s10438_s19, %s9750_s10  ;;  %p9757_p10 = scmp.lt.u32.totalorder %s9750_s10, %s10438_s19 }
  0x9e   : > { %p9753_p8 = pnand %p9751_p6, %p10660_p7 }
  0xa0   : > { %p9754_p9 = pneg %p9753_p8 }
  0xa2   : > { %p9759_p11 = pnand %p9757_p10, %p9754_p9 }
  0xa4   : > { %9762 = shalt.err (!%p9759_p11)
}
  0xa5   : > { %s9763_s30 = scalar_lea.vmem %s10652_s23, 16  ;;  %s9770_s0 = scalar_lea.vmem %s10652_s23, 32 }
  0xa6   : > { %p9764_p1 = scmp.ne.s32.totalorder %s10652_s23, %s9763_s30  ;;  %p9771_p13 = scmp.lt.s32.totalorder %s10652_s23, %s10652_s23 }
  0xa7   : > { %p9772_p0 = scmp.lt.s32.totalorder %s9770_s0, %s9763_s30 }
  0xa8   : > { %p9766_p3 = pnand %p9764_p1, %p10660_p7 }
  0xa9   : > { %p9773_p2 = por %p9772_p0, %p9771_p13 }
  0xaa   : > { %p9767_p12 = pneg %p9766_p3 }
  0xac   : > { %p9774_p4 = pnand %p9773_p2, %p9767_p12 }
  0xae   : > { %9777 = shalt.err (!%p9774_p4)
}
  0xaf   : > { %9382 = dma.hbm_to_vmem [thread:$0]  (!%p10648_p5), %s10438_s19, 16, %s10652_s23, [#allocation11]  }
  0xb0   : > { %s10348_s18 = smov [#allocation16]   ;;  %s9778_s10 = scalar_lea.hbm %s11881_s6, 16 }
  0xb1   : > { %s1201_s22 = sshll.u32 %s10348_s18, 4  ;;  %p9779_p6 = scmp.ne.s32.totalorder %s11881_s6, %s9778_s10  ;;  %s1202_s22 = int_to_ptr.vmem [resolvable:$true] %s1201_s22 }
  0xb2   : > { %p9785_p10 = scmp.lt.u32.totalorder %s9778_s10, %s11881_s6 }
  0xb3   : > { %p9781_p8 = pnand %p9779_p6, %p10660_p7 }
  0xb5   : > { %p9782_p9 = pneg %p9781_p8 }
  0xb7   : > { %p9787_p11 = pnand %p9785_p10, %p9782_p9 }
  0xb9   : > { %9790 = shalt.err (!%p9787_p11)
}
  0xba   : > { %s9791_s30 = scalar_lea.vmem %s1177_s21, 16  ;;  %s9798_s0 = scalar_lea.vmem %s1177_s21, 32 }
  0xbb   : > { %p9792_p1 = scmp.ne.s32.totalorder %s1177_s21, %s9791_s30  ;;  %p9799_p13 = scmp.lt.s32.totalorder %s1177_s21, %s1177_s21 }
  0xbc   : > { %p9800_p0 = scmp.lt.s32.totalorder %s9798_s0, %s9791_s30 }
  0xbd   : > { %p9794_p3 = pnand %p9792_p1, %p10660_p7 }
  0xbe   : > { %p9801_p2 = por %p9800_p0, %p9799_p13 }
  0xbf   : > { %p9795_p12 = pneg %p9794_p3 }
  0xc1   : > { %p9802_p4 = pnand %p9801_p2, %p9795_p12 }
  0xc3   : > { %9805 = shalt.err (!%p9802_p4)
}
  0xc4   : > { %9388 = dma.hbm_to_vmem [thread:$0]  (!%p10648_p5), %s11881_s6, 16, %s1177_s21, [#allocation14]  }
  0xc5   : > { %s9806_s23 = scalar_lea.hbm %s10468_s27, 16 }
  0xc6   : > { %p9807_p6 = scmp.ne.s32.totalorder %s10468_s27, %s9806_s23  ;;  %p9813_p10 = scmp.lt.u32.totalorder %s9806_s23, %s10468_s27 }
  0xc8   : > { %p9809_p8 = pnand %p9807_p6, %p10660_p7 }
  0xca   : > { %p9810_p9 = pneg %p9809_p8 }
  0xcc   : > { %p9815_p11 = pnand %p9813_p10, %p9810_p9 }
  0xce   : > { %9818 = shalt.err (!%p9815_p11)
}
  0xcf   : > { %s9819_s18 = scalar_lea.vmem %s1202_s22, 16  ;;  %s9826_s10 = scalar_lea.vmem %s1202_s22, 32 }
  0xd0   : > { %p9820_p1 = scmp.ne.s32.totalorder %s1202_s22, %s9819_s18  ;;  %p9827_p13 = scmp.lt.s32.totalorder %s1202_s22, %s1202_s22 }
  0xd1   : > { %p9828_p0 = scmp.lt.s32.totalorder %s9826_s10, %s9819_s18 }
  0xd2   : > { %p9822_p3 = pnand %p9820_p1, %p10660_p7 }
  0xd3   : > { %p9829_p2 = por %p9828_p0, %p9827_p13 }
  0xd4   : > { %p9823_p12 = pneg %p9822_p3 }
  0xd6   : > { %p9830_p4 = pnand %p9829_p2, %p9823_p12 }
  0xd8   : > { %9833 = shalt.err (!%p9830_p4)
}
  0xd9   : > { %9394 = dma.hbm_to_vmem [thread:$0]  (!%p10648_p5), %s10468_s27, 16, %s1202_s22, [#allocation17]  }
  0xda   : > { %s10349_s21 = smov [#allocation19]   ;;  %s10350_s0 = smov [#allocation22]  }
  0xdb   : > { %s1226_s30 = sshll.u32 %s10349_s21, 4  ;;  %s1251_s23 = sshll.u32 %s10350_s0, 4  ;;  %s1227_s30 = int_to_ptr.vmem [resolvable:$true] %s1226_s30  ;;  %s1252_s23 = int_to_ptr.vmem [resolvable:$true] %s1251_s23 }
  0xdc   : > { %s9834_s3 = scalar_lea.hbm %s11878_s13, 16 }
  0xdd   : > { %p9835_p6 = scmp.ne.s32.totalorder %s11878_s13, %s9834_s3  ;;  %p9841_p10 = scmp.lt.u32.totalorder %s9834_s3, %s11878_s13 }
  0xdf   : > { %p9837_p8 = pnand %p9835_p6, %p10660_p7 }
  0xe1   : > { %p9838_p9 = pneg %p9837_p8 }
  0xe3   : > { %p9843_p11 = pnand %p9841_p10, %p9838_p9 }
  0xe5   : > { %9846 = shalt.err (!%p9843_p11)
}
  0xe6   : > { %s9847_s18 = scalar_lea.vmem %s1227_s30, 16  ;;  %s9854_s22 = scalar_lea.vmem %s1227_s30, 32 }
  0xe7   : > { %p9848_p1 = scmp.ne.s32.totalorder %s1227_s30, %s9847_s18  ;;  %p9855_p13 = scmp.lt.s32.totalorder %s1227_s30, %s1227_s30 }
  0xe8   : > { %p9856_p0 = scmp.lt.s32.totalorder %s9854_s22, %s9847_s18 }
  0xe9   : > { %p9850_p3 = pnand %p9848_p1, %p10660_p7 }
  0xea   : > { %p9857_p2 = por %p9856_p0, %p9855_p13 }
  0xeb   : > { %p9851_p12 = pneg %p9850_p3 }
  0xed   : > { %p9858_p4 = pnand %p9857_p2, %p9851_p12 }
  0xef   : > { %9861 = shalt.err (!%p9858_p4)
}
  0xf0   : > { %9400 = dma.hbm_to_vmem [thread:$0]  (!%p10648_p5), %s11878_s13, 16, %s1227_s30, [#allocation20]  }
  0xf1   : > { %s9862_s3 = scalar_lea.hbm %s11880_s9, 16 }
  0xf2   : > { %p9863_p6 = scmp.ne.s32.totalorder %s11880_s9, %s9862_s3  ;;  %p9869_p10 = scmp.lt.u32.totalorder %s9862_s3, %s11880_s9 }
  0xf4   : > { %p9865_p8 = pnand %p9863_p6, %p10660_p7 }
  0xf6   : > { %p9866_p9 = pneg %p9865_p8 }
  0xf8   : > { %p9871_p11 = pnand %p9869_p10, %p9866_p9 }
  0xfa   : > { %9874 = shalt.err (!%p9871_p11)
}
  0xfb   : > { %s9875_s10 = scalar_lea.vmem %s1252_s23, 16  ;;  %s9882_s21 = scalar_lea.vmem %s1252_s23, 32 }
  0xfc   : > { %p9876_p1 = scmp.ne.s32.totalorder %s1252_s23, %s9875_s10  ;;  %p9883_p13 = scmp.lt.s32.totalorder %s1252_s23, %s1252_s23 }
  0xfd   : > { %p9884_p0 = scmp.lt.s32.totalorder %s9882_s21, %s9875_s10 }
  0xfe   : > { %p9878_p3 = pnand %p9876_p1, %p10660_p7 }
  0xff   : > { %p9885_p2 = por %p9884_p0, %p9883_p13 }
 0x100   : > { %p9879_p12 = pneg %p9878_p3 }
 0x102   : > { %p9886_p4 = pnand %p9885_p2, %p9879_p12 }
 0x104   : > { %9889 = shalt.err (!%p9886_p4)
}
 0x105   : > { %9406 = dma.hbm_to_vmem [thread:$0]  (!%p10648_p5), %s11880_s9, 16, %s1252_s23, [#allocation23]  }
 0x106   : > { %s10351_s30 = smov [#allocation25]   ;;  %s10352_s18 = smov [#allocation28]  }
 0x107   : > { %s1276_s0 = sshll.u32 %s10351_s30, 4  ;;  %s1301_s22 = sshll.u32 %s10352_s18, 4  ;;  %s1277_s0 = int_to_ptr.vmem [resolvable:$true] %s1276_s0  ;;  %s1302_s22 = int_to_ptr.vmem [resolvable:$true] %s1301_s22 }
 0x108   : > { %s9890_s3 = scalar_lea.hbm %s10513_s29, 16 }
 0x109   : > { %p9891_p6 = scmp.ne.s32.totalorder %s10513_s29, %s9890_s3  ;;  %p9897_p10 = scmp.lt.u32.totalorder %s9890_s3, %s10513_s29 }
 0x10b   : > { %p9893_p8 = pnand %p9891_p6, %p10660_p7 }
 0x10d   : > { %p9894_p9 = pneg %p9893_p8 }
 0x10f   : > { %p9899_p11 = pnand %p9897_p10, %p9894_p9 }
 0x111   : > { %9902 = shalt.err (!%p9899_p11)
}
 0x112   : > { %s9903_s10 = scalar_lea.vmem %s1277_s0, 16  ;;  %s9910_s23 = scalar_lea.vmem %s1277_s0, 32 }
 0x113   : > { %p9904_p1 = scmp.ne.s32.totalorder %s1277_s0, %s9903_s10  ;;  %p9911_p13 = scmp.lt.s32.totalorder %s1277_s0, %s1277_s0 }
 0x114   : > { %p9912_p0 = scmp.lt.s32.totalorder %s9910_s23, %s9903_s10 }
 0x115   : > { %p9906_p3 = pnand %p9904_p1, %p10660_p7 }
 0x116   : > { %p9913_p2 = por %p9912_p0, %p9911_p13 }
 0x117   : > { %p9907_p12 = pneg %p9906_p3 }
 0x119   : > { %p9914_p4 = pnand %p9913_p2, %p9907_p12 }
 0x11b   : > { %9917 = shalt.err (!%p9914_p4)
}
 0x11c   : > { %9412 = dma.hbm_to_vmem [thread:$0]  (!%p10648_p5), %s10513_s29, 16, %s1277_s0, [#allocation26]  }
 0x11d   : > { %s9918_s21 = scalar_lea.hbm %s11879_s12, 16 }
 0x11e   : > { %p9919_p6 = scmp.ne.s32.totalorder %s11879_s12, %s9918_s21  ;;  %p9925_p10 = scmp.lt.u32.totalorder %s9918_s21, %s11879_s12 }
 0x120   : > { %p9921_p8 = pnand %p9919_p6, %p10660_p7 }
 0x122   : > { %p9922_p9 = pneg %p9921_p8 }
 0x124   : > { %p9927_p11 = pnand %p9925_p10, %p9922_p9 }
 0x126   : > { %9930 = shalt.err (!%p9927_p11)
}
 0x127   : > { %s9931_s30 = scalar_lea.vmem %s1302_s22, 16  ;;  %s9938_s18 = scalar_lea.vmem %s1302_s22, 32 }
 0x128   : > { %p9932_p1 = scmp.ne.s32.totalorder %s1302_s22, %s9931_s30  ;;  %p9939_p13 = scmp.lt.s32.totalorder %s1302_s22, %s1302_s22 }
 0x129   : > { %p9940_p0 = scmp.lt.s32.totalorder %s9938_s18, %s9931_s30 }
 0x12a   : > { %p9934_p3 = pnand %p9932_p1, %p10660_p7 }
 0x12b   : > { %p9941_p2 = por %p9940_p0, %p9939_p13 }
 0x12c   : > { %p9935_p12 = pneg %p9934_p3 }
 0x12e   : > { %p9942_p4 = pnand %p9941_p2, %p9935_p12 }
 0x130   : > { %9945 = shalt.err (!%p9942_p4)
}
 0x131   : > { %9418 = dma.hbm_to_vmem [thread:$0]  (!%p10648_p5), %s11879_s12, 16, %s1302_s22, [#allocation29]  }
 0x132   : > { %s10353_s0 = smov [#allocation6]   ;;  %s10354_s10 = smov [#allocation9]  }
 0x133   : > { %s1112_s3 = sshll.u32 %s10353_s0, 4  ;;  %s1140_s23 = sshll.u32 %s10354_s10, 4  ;;  %s1113_s3 = int_to_ptr.vmem [resolvable:$true] %s1112_s3  ;;  %s1141_s23 = int_to_ptr.vmem [resolvable:$true] %s1140_s23 }
 0x134   : > { %s9946_s21 = scalar_lea.hbm %s10413_s25, 16 }
 0x135   : > { %p9947_p6 = scmp.ne.s32.totalorder %s10413_s25, %s9946_s21  ;;  %p9953_p10 = scmp.lt.u32.totalorder %s9946_s21, %s10413_s25 }
 0x137   : > { %p9949_p8 = pnand %p9947_p6, %p10660_p7 }
 0x139   : > { %p9950_p9 = pneg %p9949_p8 }
 0x13b   : > { %p9955_p11 = pnand %p9953_p10, %p9950_p9 }
 0x13d   : > { %9958 = shalt.err (!%p9955_p11)
}
 0x13e   : > { %s9959_s30 = scalar_lea.vmem %s1113_s3, 16  ;;  %s9966_s22 = scalar_lea.vmem %s1113_s3, 32 }
 0x13f   : > { %p9960_p1 = scmp.ne.s32.totalorder %s1113_s3, %s9959_s30  ;;  %p9967_p13 = scmp.lt.s32.totalorder %s1113_s3, %s1113_s3 }
 0x140   : > { %p9968_p0 = scmp.lt.s32.totalorder %s9966_s22, %s9959_s30 }
 0x141   : > { %p9962_p3 = pnand %p9960_p1, %p10660_p7 }
 0x142   : > { %p9969_p2 = por %p9968_p0, %p9967_p13 }
 0x143   : > { %p9963_p12 = pneg %p9962_p3 }
 0x145   : > { %p9970_p4 = pnand %p9969_p2, %p9963_p12 }
 0x147   : > { %9973 = shalt.err (!%p9970_p4)
}
 0x148   : > { %9373 = dma.hbm_to_vmem [thread:$0]  (!%p10648_p5), %s10413_s25, 16, %s1113_s3, [#allocation5]  }
 0x149   : > { %s9974_s18 = scalar_lea.hbm %s11877_s14, 16 }
 0x14a   : > { %p9975_p6 = scmp.ne.s32.totalorder %s11877_s14, %s9974_s18  ;;  %p9981_p10 = scmp.lt.u32.totalorder %s9974_s18, %s11877_s14 }
 0x14c   : > { %p9977_p8 = pnand %p9975_p6, %p10660_p7 }
 0x14e   : > { %p9978_p9 = pneg %p9977_p8 }
 0x150   : > { %p9983_p11 = pnand %p9981_p10, %p9978_p9 }
 0x152   : > { %9986 = shalt.err (!%p9983_p11)
}
 0x153   : > { %s9987_s0 = scalar_lea.vmem %s1141_s23, 16  ;;  %s9994_s10 = scalar_lea.vmem %s1141_s23, 32 }
 0x154   : > { %p9988_p1 = scmp.ne.s32.totalorder %s1141_s23, %s9987_s0  ;;  %p9995_p13 = scmp.lt.s32.totalorder %s1141_s23, %s1141_s23 }
 0x155   : > { %p9996_p0 = scmp.lt.s32.totalorder %s9994_s10, %s9987_s0 }
 0x156   : > { %p9990_p3 = pnand %p9988_p1, %p10660_p7 }
 0x157   : > { %p9997_p2 = por %p9996_p0, %p9995_p13 }
 0x158   : > { %p9991_p12 = pneg %p9990_p3 }
 0x15a   : > { %p9998_p4 = pnand %p9997_p2, %p9991_p12 }
 0x15c   : > { %10001 = shalt.err (!%p9998_p4)
}
 0x15d   : > { %9379 = dma.hbm_to_vmem [thread:$0]  (!%p10648_p5), %s11877_s14, 16, %s1141_s23, [#allocation8]  }
 0x15e   : > { %s10355_s3 = smov [#allocation12]   ;;  %s10356_s30 = smov [#allocation15]  }
 0x15f   : > { %s1162_s21 = sshll.u32 %s10355_s3, 4  ;;  %s1190_s22 = sshll.u32 %s10356_s30, 4  ;;  %s1163_s21 = int_to_ptr.vmem [resolvable:$true] %s1162_s21  ;;  %s1191_s22 = int_to_ptr.vmem [resolvable:$true] %s1190_s22 }
 0x160   : > { %s10002_s18 = scalar_lea.hbm %s10443_s24, 16 }
 0x161   : > { %p10003_p6 = scmp.ne.s32.totalorder %s10443_s24, %s10002_s18  ;;  %p10009_p10 = scmp.lt.u32.totalorder %s10002_s18, %s10443_s24 }
 0x163   : > { %p10005_p8 = pnand %p10003_p6, %p10660_p7 }
 0x165   : > { %p10006_p9 = pneg %p10005_p8 }
 0x167   : > { %p10011_p11 = pnand %p10009_p10, %p10006_p9 }
 0x169   : > { %10014 = shalt.err (!%p10011_p11)
}
 0x16a   : > { %s10015_s0 = scalar_lea.vmem %s1163_s21, 16  ;;  %s10022_s23 = scalar_lea.vmem %s1163_s21, 32 }
 0x16b   : > { %p10016_p1 = scmp.ne.s32.totalorder %s1163_s21, %s10015_s0  ;;  %p10023_p13 = scmp.lt.s32.totalorder %s1163_s21, %s1163_s21 }
 0x16c   : > { %p10024_p0 = scmp.lt.s32.totalorder %s10022_s23, %s10015_s0 }
 0x16d   : > { %p10018_p3 = pnand %p10016_p1, %p10660_p7 }
 0x16e   : > { %p10025_p2 = por %p10024_p0, %p10023_p13 }
 0x16f   : > { %p10019_p12 = pneg %p10018_p3 }
 0x171   : > { %p10026_p4 = pnand %p10025_p2, %p10019_p12 }
 0x173   : > { %10029 = shalt.err (!%p10026_p4)
}
 0x174   : > { %9385 = dma.hbm_to_vmem [thread:$0]  (!%p10648_p5), %s10443_s24, 16, %s1163_s21, [#allocation11]  }
 0x175   : > { %s10030_s10 = scalar_lea.hbm %s10463_s20, 16 }
 0x176   : > { %p10031_p6 = scmp.ne.s32.totalorder %s10463_s20, %s10030_s10  ;;  %p10037_p10 = scmp.lt.u32.totalorder %s10030_s10, %s10463_s20 }
 0x178   : > { %p10033_p8 = pnand %p10031_p6, %p10660_p7 }
 0x17a   : > { %p10034_p9 = pneg %p10033_p8 }
 0x17c   : > { %p10039_p11 = pnand %p10037_p10, %p10034_p9 }
 0x17e   : > { %10042 = shalt.err (!%p10039_p11)
}
 0x17f   : > { %s10043_s3 = scalar_lea.vmem %s1191_s22, 16  ;;  %s10050_s30 = scalar_lea.vmem %s1191_s22, 32 }
 0x180   : > { %p10044_p1 = scmp.ne.s32.totalorder %s1191_s22, %s10043_s3  ;;  %p10051_p13 = scmp.lt.s32.totalorder %s1191_s22, %s1191_s22 }
 0x181   : > { %p10052_p0 = scmp.lt.s32.totalorder %s10050_s30, %s10043_s3 }
 0x182   : > { %p10046_p3 = pnand %p10044_p1, %p10660_p7 }
 0x183   : > { %p10053_p2 = por %p10052_p0, %p10051_p13 }
 0x184   : > { %p10047_p12 = pneg %p10046_p3 }
 0x186   : > { %p10054_p4 = pnand %p10053_p2, %p10047_p12 }
 0x188   : > { %10057 = shalt.err (!%p10054_p4)
}
 0x189   : > { %9391 = dma.hbm_to_vmem [thread:$0]  (!%p10648_p5), %s10463_s20, 16, %s1191_s22, [#allocation14]  }
 0x18a   : > { %s10357_s21 = smov [#allocation18]   ;;  %s10358_s0 = smov [#allocation21]  }
 0x18b   : > { %s1212_s18 = sshll.u32 %s10357_s21, 4  ;;  %s1240_s23 = sshll.u32 %s10358_s0, 4  ;;  %s1213_s18 = int_to_ptr.vmem [resolvable:$true] %s1212_s18  ;;  %s1241_s23 = int_to_ptr.vmem [resolvable:$true] %s1240_s23 }
 0x18c   : > { %s10058_s10 = scalar_lea.hbm %s11882_s4, 16 }
 0x18d   : > { %p10059_p6 = scmp.ne.s32.totalorder %s11882_s4, %s10058_s10  ;;  %p10065_p10 = scmp.lt.u32.totalorder %s10058_s10, %s11882_s4 }
 0x18f   : > { %p10061_p8 = pnand %p10059_p6, %p10660_p7 }
 0x191   : > { %p10062_p9 = pneg %p10061_p8 }
 0x193   : > { %p10067_p11 = pnand %p10065_p10, %p10062_p9 }
 0x195   : > { %10070 = shalt.err (!%p10067_p11)
}
 0x196   : > { %s10071_s3 = scalar_lea.vmem %s1213_s18, 16  ;;  %s10078_s22 = scalar_lea.vmem %s1213_s18, 32 }
 0x197   : > { %p10072_p1 = scmp.ne.s32.totalorder %s1213_s18, %s10071_s3  ;;  %p10079_p13 = scmp.lt.s32.totalorder %s1213_s18, %s1213_s18 }
 0x198   : > { %p10080_p0 = scmp.lt.s32.totalorder %s10078_s22, %s10071_s3 }
 0x199   : > { %p10074_p3 = pnand %p10072_p1, %p10660_p7 }
 0x19a   : > { %p10081_p2 = por %p10080_p0, %p10079_p13 }
 0x19b   : > { %p10075_p12 = pneg %p10074_p3 }
 0x19d   : > { %p10082_p4 = pnand %p10081_p2, %p10075_p12 }
 0x19f   : > { %10085 = shalt.err (!%p10082_p4)
}
 0x1a0   : > { %s11887_s30 = sld [smem:[#allocation57_spill]] }
 0x1a1   : > { %9397 = dma.hbm_to_vmem [thread:$0]  (!%p10648_p5), %s11882_s4, 16, %s1213_s18, [#allocation17]  }
 0x1a6   : > { %s10086_s21 = scalar_lea.hbm %s11887_s30, 16 }
 0x1a7   : > { %p10087_p6 = scmp.ne.s32.totalorder %s11887_s30, %s10086_s21  ;;  %p10093_p10 = scmp.lt.u32.totalorder %s10086_s21, %s11887_s30 }
 0x1a9   : > { %p10089_p8 = pnand %p10087_p6, %p10660_p7 }
 0x1ab   : > { %p10090_p9 = pneg %p10089_p8 }
 0x1ad   : > { %p10095_p11 = pnand %p10093_p10, %p10090_p9 }
 0x1af   : > { %10098 = shalt.err (!%p10095_p11)
}
 0x1b0   : > { %s10099_s0 = scalar_lea.vmem %s1241_s23, 16  ;;  %s10106_s10 = scalar_lea.vmem %s1241_s23, 32 }
 0x1b1   : > { %p10100_p1 = scmp.ne.s32.totalorder %s1241_s23, %s10099_s0  ;;  %p10107_p13 = scmp.lt.s32.totalorder %s1241_s23, %s1241_s23 }
 0x1b2   : > { %p10108_p0 = scmp.lt.s32.totalorder %s10106_s10, %s10099_s0 }
 0x1b3   : > { %p10102_p3 = pnand %p10100_p1, %p10660_p7 }
 0x1b4   : > { %p10109_p2 = por %p10108_p0, %p10107_p13 }
 0x1b5   : > { %p10103_p12 = pneg %p10102_p3 }
 0x1b7   : > { %p10110_p4 = pnand %p10109_p2, %p10103_p12 }
 0x1b9   : > { %10113 = shalt.err (!%p10110_p4)
}
 0x1ba   : > { %s11888_s18 = sld [smem:[#allocation59_spill]]  ;;  %s10359_s3 = smov [#allocation24]  }
 0x1bb   : > { %9403 = dma.hbm_to_vmem [thread:$0]  (!%p10648_p5), %s11887_s30, 16, %s1241_s23, [#allocation20]  }
 0x1bc   : > { %s1262_s22 = sshll.u32 %s10359_s3, 4  ;;  %s10360_s21 = smov [#allocation27]   ;;  %s1263_s22 = int_to_ptr.vmem [resolvable:$true] %s1262_s22 }
 0x1bd   : > { %s1290_s4 = sshll.u32 %s10360_s21, 4  ;;  %s1291_s4 = int_to_ptr.vmem [resolvable:$true] %s1290_s4 }
 0x1c0   : > { %s10114_s6 = scalar_lea.hbm %s11888_s18, 16 }
 0x1c1   : > { %p10115_p6 = scmp.ne.s32.totalorder %s11888_s18, %s10114_s6  ;;  %p10121_p10 = scmp.lt.u32.totalorder %s10114_s6, %s11888_s18 }
 0x1c3   : > { %p10117_p8 = pnand %p10115_p6, %p10660_p7 }
 0x1c5   : > { %p10118_p9 = pneg %p10117_p8 }
 0x1c7   : > { %p10123_p11 = pnand %p10121_p10, %p10118_p9 }
 0x1c9   : > { %10126 = shalt.err (!%p10123_p11)
}
 0x1ca   : > { %s10127_s0 = scalar_lea.vmem %s1263_s22, 16  ;;  %s10134_s23 = scalar_lea.vmem %s1263_s22, 32 }
 0x1cb   : > { %p10128_p1 = scmp.ne.s32.totalorder %s1263_s22, %s10127_s0  ;;  %p10135_p13 = scmp.lt.s32.totalorder %s1263_s22, %s1263_s22 }
 0x1cc   : > { %p10136_p0 = scmp.lt.s32.totalorder %s10134_s23, %s10127_s0 }
 0x1cd   : > { %p10130_p3 = pnand %p10128_p1, %p10660_p7 }
 0x1ce   : > { %p10137_p2 = por %p10136_p0, %p10135_p13 }
 0x1cf   : > { %p10131_p12 = pneg %p10130_p3 }
 0x1d1   : > { %p10138_p4 = pnand %p10137_p2, %p10131_p12 }
 0x1d3   : > { %10141 = shalt.err (!%p10138_p4)
}
 0x1d4   : > { %s11889_s10 = sld [smem:[#allocation62_spill]] }
 0x1d5   : > { %9409 = dma.hbm_to_vmem [thread:$0]  (!%p10648_p5), %s11888_s18, 16, %s1263_s22, [#allocation23]  }
 0x1da   : > { %s10142_s6 = scalar_lea.hbm %s11889_s10, 16 }
 0x1db   : > { %p10143_p6 = scmp.ne.s32.totalorder %s11889_s10, %s10142_s6  ;;  %p10149_p10 = scmp.lt.u32.totalorder %s10142_s6, %s11889_s10 }
 0x1dd   : > { %p10145_p8 = pnand %p10143_p6, %p10660_p7 }
 0x1df   : > { %p10146_p9 = pneg %p10145_p8 }
 0x1e1   : > { %p10151_p11 = pnand %p10149_p10, %p10146_p9 }
 0x1e3   : > { %10154 = shalt.err (!%p10151_p11)
}
 0x1e4   : > { %s10155_s3 = scalar_lea.vmem %s1291_s4, 16  ;;  %s10162_s21 = scalar_lea.vmem %s1291_s4, 32 }
 0x1e5   : > { %p10156_p1 = scmp.ne.s32.totalorder %s1291_s4, %s10155_s3  ;;  %p10163_p13 = scmp.lt.s32.totalorder %s1291_s4, %s1291_s4 }
 0x1e6   : > { %p10164_p0 = scmp.lt.s32.totalorder %s10162_s21, %s10155_s3 }
 0x1e7   : > { %p10158_p3 = pnand %p10156_p1, %p10660_p7 }
 0x1e8   : > { %p10165_p2 = por %p10164_p0, %p10163_p13 }
 0x1e9   : > { %p10159_p12 = pneg %p10158_p3 }
 0x1eb   : > { %p10166_p4 = pnand %p10165_p2, %p10159_p12 }
 0x1ed   : > { %10169 = shalt.err (!%p10166_p4)
}
 0x1ee   : > { %s11890_s22 = sld [smem:[#allocation64_spill]]  ;;  %s10361_s0 = smov [#allocation30]  }
 0x1ef   : > { %9415 = dma.hbm_to_vmem [thread:$0]  (!%p10648_p5), %s11889_s10, 16, %s1291_s4, [#allocation26]  }
 0x1f0   : > { %s1312_s23 = sshll.u32 %s10361_s0, 4  ;;  %s1313_s23 = int_to_ptr.vmem [resolvable:$true] %s1312_s23 }
 0x1f4   : > { %s10170_s6 = scalar_lea.hbm %s11890_s22, 16 }
 0x1f5   : > { %p10171_p6 = scmp.ne.s32.totalorder %s11890_s22, %s10170_s6  ;;  %p10177_p10 = scmp.lt.u32.totalorder %s10170_s6, %s11890_s22 }
 0x1f7   : > { %p10173_p8 = pnand %p10171_p6, %p10660_p7 }
 0x1f9   : > { %p10174_p9 = pneg %p10173_p8 }
 0x1fb   : > { %p10179_p11 = pnand %p10177_p10, %p10174_p9 }
 0x1fd   : > { %10182 = shalt.err (!%p10179_p11)
}
 0x1fe   : > { %s10183_s3 = scalar_lea.vmem %s1313_s23, 16  ;;  %s10190_s21 = scalar_lea.vmem %s1313_s23, 32 }
 0x1ff   : > { %p10184_p1 = scmp.ne.s32.totalorder %s1313_s23, %s10183_s3  ;;  %p10191_p13 = scmp.lt.s32.totalorder %s1313_s23, %s1313_s23 }
 0x200   : > { %p10192_p0 = scmp.lt.s32.totalorder %s10190_s21, %s10183_s3 }
 0x201   : > { %p10186_p3 = pnand %p10184_p1, %p10660_p7 }
 0x202   : > { %p10193_p2 = por %p10192_p0, %p10191_p13 }
 0x203   : > { %p10187_p12 = pneg %p10186_p3 }
 0x205   : > { %p10194_p4 = pnand %p10193_p2, %p10187_p12 }
 0x207   : > { %10197 = shalt.err (!%p10194_p4)
}
 0x208   : > { %s11891_s4 = sld [smem:[#allocation41_spill]]  ;;  %s10861_s16 = sadd.s32 1, %s10298_s7  }
 0x209   : > { %9421 = dma.hbm_to_vmem [thread:$0]  (!%p10648_p5), %s11890_s22, 16, %s1313_s23, [#allocation29]  }
 0x20a   : > { %s119_s26 = sadd.s32 1, %s10294_s2  ;;  %s116_s0 = ssub.s32 %s10298_s7, %s10861_s16 }
 0x20b   : > { %p126_p7 = scmp.ne.s32.totalorder %s10294_s2, %s10290_s1  ;;  %p117_p6 = scmp.eq.s32.totalorder %s116_s0, 0 }
 0x20c   : > { %p127_p8 = scmp.eq.s32.totalorder %s10298_s7, 0  ;;  %p132_p9 = scmp.ne.s32.totalorder %s10290_s1, %s10286_s28 }
 0x20d   : > { %p9444_p10 = scmp.lt.s32.totalorder %s10298_s7, 2  ;;  %p11892_p1 = scmp.eq.s32.totalorder %s10631_s11, 0 }
 0x20e   : > { %s10873_s6 = scalar_select %p117_p6, %s10294_s2, %s119_s26  }
 0x20f   : > { %p128_p11 = por %p127_p8, %p126_p7  ;;  %p10877_p3 = por %p11892_p1, %p132_p9 }
 0x210   : > { %s1362_s23 = sand.u32 1, %s10294_s2   ;;  %s8280_s21 = sshll.u32 %s10298_s7, 7 }
 0x211   : > { %s11893_s3 = scalar_select %p10877_p3, 1, 0 }
 0x212   : > { %s8279_s9 = sshll.u32 %s1362_s23, 3  ;;  %s10884_s10 = scalar_lea.hbm %s11891_s4, %s8280_s21 }
 0x213   : > { %s1366_s28 = scalar_lea.vmem [#allocation2], %s8279_s9  ;;  %p10886_p5 = pnand %p9444_p10, %p128_p11 }
 0x214   : > { %s1373_s26 = sshll.u32 %s1366_s28, 4  ;;  %s1363_s12 = scalar_lea.sflag [#allocation3], %s1362_s23  ;;  %s10890_s26 = int_to_ptr.vmem [resolvable:$true] %s1373_s26 }
 0x215   : > { %s10198_s13 = scalar_lea.hbm %s10884_s10, 128  ;;  %p10200_p13 = pneg %p10886_p5 }
 0x216   : > { %p10199_p12 = scmp.ne.s32.totalorder %s10884_s10, %s10198_s13  ;;  %s10203_s7 = scalar_lea.hbm %s11891_s4, 256 }
 0x217   : > { %p10204_p4 = scmp.lt.u32.totalorder %s10884_s10, %s11891_s4  ;;  %p10205_p7 = scmp.lt.u32.totalorder %s10203_s7, %s10198_s13 }
 0x218   : > { %p10201_p0 = pnand %p10200_p13, %p10199_p12  ;;  %p10207_p8 = scmp.lt.u32.totalorder %s10198_s13, %s10884_s10 }
 0x219   : > { %p10206_p6 = por %p10205_p7, %p10204_p4 }
 0x21a   : > { %p10202_p2 = pneg %p10201_p0 }
 0x21b   : > { %p10208_p9 = por %p10207_p8, %p10206_p6 }
 0x21d   : > { %p10209_p10 = pnand %p10208_p9, %p10202_p2 }
 0x21f   : > { %10212 = shalt.err (!%p10209_p10)
}
 0x220   : > { %s10213_s9 = scalar_lea.vmem %s10890_s26, 128  ;;  %s10362_s23 = smov [#allocation2]  }
 0x221   : > { %p10214_p11 = scmp.ne.s32.totalorder %s10890_s26, %s10213_s9  ;;  %s10218_s21 = sshll.u32 %s10362_s23, 4  ;;  %s10219_s21 = int_to_ptr.vmem [resolvable:$false] %s10218_s21 }
 0x222   : > { %s10220_s28 = scalar_lea.vmem %s10219_s21, 256  ;;  %p10221_p12 = scmp.lt.s32.totalorder %s10890_s26, %s10219_s21 }
 0x223   : > { %p10216_p1 = pnand %p10214_p11, %p10200_p13  ;;  %p10222_p0 = scmp.lt.s32.totalorder %s10220_s28, %s10213_s9 }
 0x225   : > { %p10217_p3 = pneg %p10216_p1  ;;  %p10223_p4 = por %p10222_p0, %p10221_p12 }
 0x227   : > { %p10224_p7 = pnand %p10223_p4, %p10217_p3 }
 0x229   : > { %10227 = shalt.err (!%p10224_p7)
}
 0x22a   : > { %9425 = dma.hbm_to_vmem [thread:$0]  (!%p10886_p5), %s10884_s10, 128, %s10890_s26, %s1363_s12  }
 0x22b   : > { %p11895_p2 = scmp.ne.s32.totalorder %s11884_s15, 0 }
 0x22c   : > { %s1390_s13 = sand.u32 (!%p11895_p2), 1, %s10290_s1   ;;  %p11896_p13 = scmp.ne.s32.totalorder (!%p11895_p2), %s11893_s3, 0 }
 0x22d   : > { %1388 = sbr.rel (%p11895_p2) target bundleno = 16031 (0x3e9f), region = 192  ;;  %s10916_s7 = sshll.u32 (!%p11895_p2), %s1390_s13, 3 }
 0x22e   : > { %s1391_s23 = scalar_lea.sflag (!%p11895_p2), [#allocation3], %s1390_s13  ;;  %s1394_s21 = scalar_lea.vmem (!%p11895_p2), [#allocation2], %s10916_s7 }
 0x234   : > { %10245 = dma.done.wait (%p11896_p13), %s1391_s23, 128  }
 0x235   : > { %10247 = vsyncadd (%p11896_p13), %s1391_s23, 4294967168  ;;  %p11897_p3 = scmp.eq.s32.totalorder %s10631_s11, 0 }
 0x237   : > { %10249 = dma.done.wait (%p11897_p3), [#allocation5], 48   ;;  %p11898_p5 = pmov %p11897_p3 }
 0x238   : > { %p11899_p6 = pmov %p11897_p3 }
 0x239   : > { %10251 = vsyncadd (%p11898_p5), [#allocation5], 4294967248 }
 0x23a   : > { %10253 = dma.done.wait (%p11899_p6), [#allocation8], 32   ;;  %p11900_p8 = pmov %p11897_p3 }
 0x23b   : > { %p11901_p9 = pmov %p11897_p3 }
 0x23c   : > { %10255 = vsyncadd (%p11900_p8), [#allocation8], 4294967264 }
 0x23d   : > { %10257 = dma.done.wait (%p11901_p9), [#allocation11], 32   ;;  %p11902_p10 = pmov %p11897_p3 }
 0x23e   : > { %p11903_p11 = pmov %p11897_p3 }
 0x23f   : > { %10259 = vsyncadd (%p11902_p10), [#allocation11], 4294967264 }
 0x240   : > { %10261 = dma.done.wait (%p11903_p11), [#allocation14], 32   ;;  %p11904_p1 = pmov %p11897_p3 }
 0x242   : > { %10263 = vsyncadd (%p11904_p1), [#allocation14], 4294967264  ;;  %p11905_p12 = pmov %p11904_p1 }
 0x243   : > { %p11906_p0 = pmov %p11904_p1 }
 0x244   : > { %10265 = dma.done.wait (%p11905_p12), [#allocation17], 32  }
 0x245   : > { %10267 = vsyncadd (%p11906_p0), [#allocation17], 4294967264  ;;  %p11907_p4 = pmov %p11906_p0 }
 0x246   : > { %p11908_p7 = pmov %p11906_p0 }
 0x247   : > { %10269 = dma.done.wait (%p11907_p4), [#allocation20], 32  }
 0x248   : > { %10271 = vsyncadd (%p11908_p7), [#allocation20], 4294967264  ;;  %p11909_p2 = pmov %p11906_p0 }
 0x249   : > { %p11910_p13 = pmov %p11906_p0 }
 0x24a   : > { %10273 = dma.done.wait (%p11909_p2), [#allocation23], 32  }
 0x24b   : > { %10275 = vsyncadd (%p11910_p13), [#allocation23], 4294967264  ;;  %p11911_p3 = pmov %p11906_p0 }
 0x24c   : > { %p11912_p5 = pmov %p11906_p0 }
 0x24d   : > { %10277 = dma.done.wait (%p11911_p3), [#allocation26], 32  }
 0x24e   : > { %10279 = vsyncadd (%p11912_p5), [#allocation26], 4294967264  ;;  %p11913_p6 = pmov %p11906_p0 }
 0x24f   : > { %p11914_p8 = pmov %p11906_p0 }
 0x250   : > { %10281 = dma.done.wait (%p11913_p6), [#allocation29], 32  }
 0x251   : > { %10283 = vsyncadd (%p11914_p8), [#allocation29], 4294967264  ;;  %s11915_s12 = sld [smem:[#allocation45_spill]]  ;;  %s11916_s15 = sld [smem:[#allocation46_spill]]  ;;  %v10363_v0 = vmov 0.0|0.0   ;;  %vm10364_vm0 = vmmov 0  }
 0x252   : > { %9155 = vmatprep.subr.bf16.mxu0 %v10363_v0  ;;  %9161 = vmatprep.subr.bf16.mxu1 %v10363_v0  ;;  %v10365_v1 = vmov 0.0   ;;  %s11825_s10 = smov 96   ;;  %v1589_v16 = vld [vmem:[%s1394_s21] sm:$0xff]  ;;  %vm1601_vm1 = vcmask 261120   ;;  %v10978_v17 = vld [vmem:[#allocation4] sm:$0x3] }
 0x253   : > { %8654 = vmatprep.mubr.msk.f32.mxu0 %vm10364_vm0, %v10365_v1  ;;  %8665 = vmatprep.mubr.msk.f32.mxu1 %vm10364_vm0, %v10365_v1  ;;  %v8303_v26 = vld [vmem:[#allocation6] ss:$0 sm:$0xff]  ;;  %v8305_v27 = vld [vmem:[#allocation7] ss:$0 sm:$0xff]  ;;  %vm1866_vm2 = vcmask 64512   ;;  %vm2016_vm3 = vcmask 9216  }
 0x254   : > { %vm2020_vm4 = vcmask 58368   ;;  %s11827_s3 = smov 64   ;;  %vm2120_vm5 = vcmask 1041408   ;;  %s11917_s26 = sld [smem:[#allocation48_spill]]  ;;  %vm2116_vm6 = vcmask 15360   ;;  %vm3481_vm7 = vcmask 254976  }
 0x255   : > { %s11821_s0 = smov 120   ;;  %s11823_s9 = smov 88   ;;  %vm3610_vm8 = vcmask 523264   ;;  %vm3729_vm10 = vcmask 253952   ;;  %vm3731_vm11 = vcmask 254977   ;;  %vm7765_vm12 = vcmask 1043456  }
 0x256   : > { %s11815_s28 = smov 56   ;;  %s11817_s13 = smov 112   ;;  %vm10378_vm13 = vmmov 1   ;;  %vm7761_vm15 = vcmask 97280  }
 0x257   : > { %v1590_v2 = vld [vmem:[%s11915_s12] sm:$0xff]  ;;  %v1591_v3 = vld [vmem:[%s11915_s12 + $0x8] sm:$0xff]  ;;  %v1592_v7 = vld [vmem:[%s11915_s12 + $0x10] sm:$0xff]  ;;  %s11819_s7 = smov 80   ;;  %s11807_s23 = smov 48  }
 0x258   : > { %v1675_v4 = vld [vmem:[%s11916_s15] sm:$0xff]  ;;  %v9156_v5 = vpack.c.bf16 %v1591_v3, %v1590_v2  ;;  %v1676_v6 = vld [vmem:[%s11916_s15 + $0x8] sm:$0xff]  ;;  %v1593_v8 = vld [vmem:[%s11915_s12 + $0x18] sm:$0xff]  ;;  %s11809_s21 = smov 104   ;;  %s11930_s4 = smov 72  }
 0x259   : > { %v9162_v9 = vpack.c.bf16 %v1676_v6, %v1675_v4  ;;  %v1677_v10 = vld [vmem:[%s11916_s15 + $0x10] sm:$0xff]  ;;  %v1678_v11 = vld [vmem:[%s11916_s15 + $0x18] sm:$0xff]  ;;  %v9574_v12 = vpack.i.bf16 %v1676_v6, %v1675_v4  ;;  %v9159_v13 = vpack.c.bf16 %v1593_v8, %v1592_v7  ;;  %s11931_s12 = sld [smem:[#allocation60_spill]]  ;;  %s11933_s14 = smov 40   ;;  %vm9277_vm14 = vmpackc.low %vm7765_vm12, %vm10378_vm13 }
 0x25a   : > { %9157 = vmatpush3.bf16.msra.mxu0 %v9156_v5  ;;  %v9165_v14 = vpack.c.bf16 %v1678_v11, %v1677_v10  ;;  %v9579_v15 = vpack.i.bf16 %v1678_v11, %v1677_v10  ;;  %v1680_v60 = vld [vmem:[%s11917_s26] sm:$0xff]  ;;  %p1577_p9 = scmp.lt.s32.totalorder %s10631_s11, 1  ;;  %s11934_s5 = sld [smem:[#allocation77_spill]] }
 0x25b   : > { %9163 = vmatpush3.bf16.msra.mxu1 %v9162_v9  ;;  %9158 = vmatprep.subr.bf16.mxu0 %v10363_v0  ;;  %s11936_s17 = sld [smem:[#allocation61_spill]] }
 0x25c   : > { %9164 = vmatprep.subr.bf16.mxu1 %v10363_v0  ;;  %9575 = vrot.lane.b32.xlu0 %v9574_v12, %s11825_s10  ;;  %s11958_s11 = smov (!%p1577_p9, %s10631_s11), 1 }
 0x25e   : > { %9160 = vmatpush3.bf16.msra.mxu0 %v9159_v13 }
 0x25f   : > { %9166 = vmatpush3.bf16.msra.mxu1 %v9165_v14  ;;  %9167 = vmatprep.subr.bf16.mxu0 %v10363_v0 }
 0x260   : > { %9580 = vrot.lane.b32.xlu0 %v9579_v15, %s11825_s10  ;;  %8679 = vmatprep.subr.mxu1 %v10365_v1 }
 0x261   : > { %8655 = vmatmul.mubr.msk.f32.vlgmr.msra.gmra.mrb[0].mxu0 %vm1601_vm1, %v1589_v16 }
 0x262   : > { %8666 = vmatmul.mubr.msk.f32.vlgmr.msra.gmra.mrb[0].mxu1 %vm1601_vm1, %v10978_v17  ;;  %8676 = vmatprep.mubr.msk.f32.mxu0 %vm10364_vm0, %v10365_v1 }
 0x263   : > { %8681 = vmatprep.mubr.msk.f32.mxu1 %vm10364_vm0, %v10365_v1 }
 0x2ce   : > { %v9576_v18 = vpop.permute.xlu0 %9575 }
 0x2cf   : > { %v9578_v19 = vunpack.i.h.bf16 %v9576_v18  ;;  %v9577_v20 = vunpack.i.l.bf16 %v9576_v18 }
 0x2d1   : > { %v9168_v21 = vpack.c.bf16 %v9578_v19, %v9577_v20 }
 0x2d2   : > { %v9581_v22 = vpop.permute.xlu0 %9580 }
 0x2d3   : > { %v9583_v23 = vunpack.i.h.bf16 %v9581_v22  ;;  %v9582_v24 = vunpack.i.l.bf16 %v9581_v22  ;;  %9169 = vmatpush3.bf16.msra.mxu0 %v9168_v21 }
 0x2d4   : > { %9170 = vmatprep.subr.bf16.mxu0 %v10363_v0 }
 0x2d5   : > { %v9171_v25 = vpack.c.bf16 %v9583_v23, %v9582_v24 }
 0x2d7   : > { %9172 = vmatpush3.bf16.msra.mxu0 %v9171_v25 }
 0x2d8   : > { %8689 = vmatprep.subr.mxu0 %v10365_v1 }
 0x334   : > { %v1671_v28 = vpop.f32.mrb[0].mxu0 }
 0x335   : > { %v1672_v29 = vadd.f32 %v8303_v26, %v1671_v28  ;;  %v1760_v30 = vpop.f32.mrb[0].mxu1  ;;  %v8656_v31 = vpop.f32.mrb[1].mxu0 }
 0x336   : > { %v10992_v32 = vadd.f32 %v8305_v27, %v1760_v30  ;;  %v8667_v33 = vpop.f32.mrb[1].mxu1 }
 0x337   : > { %8677 = vmatmul.mubr.msk.f32.vlgmr.msra.gmra.mrb[2].mxu0 %vm1601_vm1, %v1672_v29 }
 0x338   : > { %1864 = vrot.lane.b32.xlu1 %v10992_v32, %s11825_s10  ;;  %8691 = vmatprep.mubr.msk.f32.mxu0 %vm10364_vm0, %v10365_v1 }
 0x33c   : > { %1780 = vrot.lane.b32.xlu1 %v8305_v27, %s11825_s10 }
 0x3aa   : > { %v1865_v34 = vpop.permute.xlu1 %1864 }
 0x3ab   : > { %8680 = vmatpush3.xpose.msk.msra.mxu1 %vm1866_vm2, %v1865_v34  ;;  %v1681_v34 = vld [vmem:[%s11917_s26 + $0x8] sm:$0xff] }
 0x3ac   : > { %8684 = vmatprep.subr.mxu1 %v10365_v1 }
 0x3ae   : > { %8682 = vmatmul.mubr.msk.f32.vlgmr.msra.gmra.mrb[2].mxu1 %vm1866_vm2, %v10992_v32  ;;  %v1781_v35 = vpop.permute.xlu1 %1780 }
 0x3af   : > { %8686 = vmatprep.mubr.msk.f32.mxu1 %vm10364_vm0, %v10365_v1 }
 0x40a   : > { %v1852_v36 = vpop.f32.mrb[2].mxu0 }
 0x40b   : > { %v11006_v37 = vadd.f32 %v1852_v36, %v1781_v35  ;;  %v8678_v38 = vpop.f32.mrb[3].mxu0 }
 0x40d   : > { %8685 = vmatpush3.xpose.msk.msra.mxu1 %vm1866_vm2, %v11006_v37 }
 0x40e   : > { %8699 = vmatprep.subr.mxu1 %v10365_v1 }
 0x410   : > { %8687 = vmatmul.mubr.msk.f32.vlgmr.msra.gmra.mrb[4].mxu1 %vm1866_vm2, %v10992_v32 }
 0x411   : > { %8701 = vmatprep.mubr.msk.f32.mxu1 %vm10364_vm0, %v10365_v1  ;;  %8700 = vmatpush3.msra.mxu1 %v1680_v60 }
 0x412   : > { %8704 = vmatprep.subr.mxu1 %v10365_v1 }
 0x481   : > { %v1937_v39 = vpop.f32.mrb[2].mxu1 }
 0x482   : > { %v1941_v40 = vmul.f32 0.35355338, %v1937_v39  ;;  %v8683_v41 = vpop.f32.mrb[3].mxu1 }
 0x484   : > { %v2017_v42 = vsel %vm2016_vm3, %v1941_v40, -inf }
 0x485   : > { %2018 = vmax.xlane.f32.xlu0 %v2017_v42 }
 0x49b   : > { %2038 = vrot.lane.b32.xlu0 %v11006_v37, %s11825_s10 }
 0x4e3   : > { %v2011_v43 = vpop.f32.mrb[4].mxu1 }
 0x4e4   : > { %v2015_v44 = vmul.f32 0.35355338, %v2011_v43  ;;  %v8688_v45 = vpop.f32.mrb[5].mxu1 }
 0x4e6   : > { %v2021_v46 = vsel %vm2020_vm4, %v2015_v44, -inf }
 0x4e7   : > { %2022 = vmax.xlane.f32.xlu1 %v2021_v46 }
 0x4f8   : > { %2114 = vrot.lane.b32.xlu1 %v10992_v32, %s11827_s3 }
 0x512   : > { %v2019_v47 = vpop.xlane.xlu0 %2018 }
 0x516   : > { %v2039_v48 = vpop.permute.xlu0 %2038 }
 0x517   : > { %8690 = vmatpush3.msra.mxu0 %v2039_v48 }
 0x518   : > { %8694 = vmatprep.subr.mxu0 %v10365_v1 }
 0x574   : > { %v2023_v49 = vpop.xlane.xlu1 %2022 }
 0x575   : > { %v2024_v50 = vmax.f32 %v2019_v47, %v2023_v49 }
 0x577   : > { %v2025_v51 = vsub.f32 %v1941_v40, %v2024_v50  ;;  %v2028_v52 = vsub.f32 %v2015_v44, %v2024_v50  ;;  %v8308_v50 = vld [vmem:[#allocation9] ss:$0 sm:$0xff] }
 0x578   : > { %v2115_v58 = vpop.permute.xlu1 %2114 }
 0x579   : > { %v2026_v53 = vmul.f32 1.442695, %v2025_v51  ;;  %v2029_v54 = vmul.f32 1.442695, %v2028_v52 }
 0x57b   : > { %9604 = vpow2.f32 %v2026_v53 }
 0x57c   : > { %9606 = vpow2.f32 %v2029_v54 }
 0x585   : > { %v9605_v55 = vpop.eup %9604 }
 0x586   : > { %v9607_v56 = vpop.eup %9606  ;;  %v2031_v57 = vsel %vm2016_vm3, %v9605_v55, 0.0 }
 0x587   : > { %8692 = vmatmul.mubr.msk.f32.vlgmr.msra.gmra.mrb[4].mxu0 %vm1866_vm2, %v9607_v56  ;;  %v2034_v59 = vsel %vm2020_vm4, %v9607_v56, 0.0  ;;  %2032 = vadd.xlane.f32.xlu0 %v2031_v57 }
 0x588   : > { %8695 = vmatpush3.msk.msra.mxu0 %vm2120_vm5, %v2115_v58  ;;  %2035 = vadd.xlane.f32.xlu1 %v2034_v59 }
 0x589   : > { %8696 = vmatprep.mubr.msk.f32.mxu0 %vm10364_vm0, %v10365_v1  ;;  %8709 = vmatprep.subr.mxu0 %v10365_v1 }
 0x58f   : > { %8697 = vmatmul.mubr.msk.f32.vlgmr.msra.gmra.mrb[4].mxu0 %vm2116_vm6, %v9605_v55 }
 0x590   : > { %8711 = vmatprep.mubr.msk.f32.mxu0 %vm10364_vm0, %v10365_v1 }
 0x599   : > { %2348 = vrot.lane.b32.xlu1 %v11006_v37, %s11821_s0 }
 0x59d   : > { %2271 = vrot.lane.b32.xlu0 %v10992_v32, %s11823_s9 }
 0x5a1   : > { %2269 = vrot.lane.b32.xlu0 %v10992_v32, %s11821_s0 }
 0x614   : > { %v2033_v61 = vpop.xlane.xlu0 %2032 }
 0x615   : > { %v2036_v62 = vpop.xlane.xlu1 %2035 }
 0x616   : > { %v2037_v4 = vadd.f32 %v2036_v62, %v2033_v61 }
 0x618   : > { %v2272_v63 = vpop.permute.xlu0 %2271  ;;  %9608 = vrcp.f32 %v2037_v4 }
 0x619   : > { %v2349_v2 = vpop.permute.xlu1 %2348 }
 0x61a   : > { %8710 = vmatpush3.xpose.msk.msra.mxu0 %vm1866_vm2, %v2349_v2 }
 0x61b   : > { %8724 = vmatprep.subr.mxu0 %v10365_v1 }
 0x61c   : > { %v2270_v3 = vpop.permute.xlu0 %2269 }
 0x61d   : > { %8712 = vmatmul.mubr.msk.f32.vlgmr.msra.gmra.mrb[6].mxu0 %vm1866_vm2, %v2270_v3 }
 0x61e   : > { %8726 = vmatprep.mubr.msk.f32.mxu0 %vm10364_vm0, %v10365_v1  ;;  %8725 = vmatpush3.msra.mxu0 %v1681_v34 }
 0x61f   : > { %8729 = vmatprep.subr.mxu0 %v10365_v1 }
 0x622   : > { %v9609_v5 = vpop.eup %9608 }
 0x662   : > { %v2189_v6 = vpop.f32.mrb[4].mxu0 }
 0x663   : > { %v2194_v7 = vmul.f32 %v9609_v5, %v2189_v6  ;;  %v8698_v8 = vpop.f32.mrb[5].mxu0 }
 0x665   : > { %8702 = vmatmul.mubr.msk.f32.vlgmr.msra.gmra.mrb[6].mxu1 %vm1866_vm2, %v2194_v7 }
 0x666   : > { %8705 = vmatpush3.xpose.msk.msra.mxu1 %vm1866_vm2, %v2272_v63  ;;  %8706 = vmatprep.mubr.msk.f32.mxu1 %vm10364_vm0, %v10365_v1 }
 0x667   : > { %8714 = vmatprep.subr.mxu1 %v10365_v1 }
 0x669   : > { %8707 = vmatmul.mubr.msk.f32.vlgmr.msra.gmra.mrb[8].mxu1 %vm1866_vm2, %v2270_v3 }
 0x66a   : > { %8716 = vmatprep.mubr.msk.f32.mxu1 %vm10364_vm0, %v10365_v1 }
 0x6f0   : > { %v2418_v9 = vpop.f32.mrb[6].mxu0 }
 0x6f1   : > { %v2422_v10 = vmul.f32 0.35355338, %v2418_v9  ;;  %v8713_v11 = vpop.f32.mrb[7].mxu0 }
 0x6f3   : > { %v2426_v12 = vsel %vm2020_vm4, %v2422_v10, -inf }
 0x6f4   : > { %2427 = vmax.xlane.f32.xlu0 %v2426_v12 }
 0x70a   : > { %2443 = vrot.lane.b32.xlu0 %v11006_v37, %s11823_s9 }
 0x738   : > { %v11056_v13 = vpop.f32.mrb[6].mxu1 }
 0x739   : > { %v8703_v14 = vpop.f32.mrb[7].mxu1  ;;  %v2268_v51 = vadd.f32 %v8308_v50, %v11056_v13 }
 0x73c   : > { %v2343_v15 = vpop.f32.mrb[8].mxu1 }
 0x73d   : > { %v2347_v16 = vmul.f32 0.35355338, %v2343_v15  ;;  %v8708_v18 = vpop.f32.mrb[9].mxu1 }
 0x73f   : > { %v2423_v19 = vsel %vm2016_vm3, %v2347_v16, -inf }
 0x740   : > { %2424 = vmax.xlane.f32.xlu1 %v2423_v19 }
 0x751   : > { %2519 = vrot.lane.b32.xlu1 %v10992_v32, %s11815_s28  ;;  %s11920_s28 = sld [smem:[#allocation54_spill]] }
 0x781   : > { %v2428_v20 = vpop.xlane.xlu0 %2427 }
 0x785   : > { %v2444_v21 = vpop.permute.xlu0 %2443 }
 0x786   : > { %8715 = vmatpush3.msra.mxu1 %v2444_v21 }
 0x787   : > { %8719 = vmatprep.subr.mxu1 %v10365_v1 }
 0x7cd   : > { %v2425_v22 = vpop.xlane.xlu1 %2424 }
 0x7ce   : > { %v2429_v23 = vmax.f32 %v2425_v22, %v2428_v20 }
 0x7d0   : > { %v2430_v24 = vsub.f32 %v2347_v16, %v2429_v23  ;;  %v2433_v25 = vsub.f32 %v2422_v10, %v2429_v23  ;;  %v1682_v10 = vld [vmem:[%s11917_s26 + $0x10] sm:$0xff] }
 0x7d1   : > { %v2520_v31 = vpop.permute.xlu1 %2519 }
 0x7d2   : > { %v2431_v26 = vmul.f32 1.442695, %v2430_v24  ;;  %v2434_v27 = vmul.f32 1.442695, %v2433_v25 }
 0x7d4   : > { %9610 = vpow2.f32 %v2431_v26 }
 0x7d5   : > { %9612 = vpow2.f32 %v2434_v27 }
 0x7de   : > { %v9611_v28 = vpop.eup %9610 }
 0x7df   : > { %v9613_v29 = vpop.eup %9612  ;;  %v2436_v30 = vsel %vm2016_vm3, %v9611_v28, 0.0 }
 0x7e0   : > { %8717 = vmatmul.mubr.msk.f32.vlgmr.msra.gmra.mrb[10].mxu1 %vm1866_vm2, %v9613_v29  ;;  %v2439_v33 = vsel %vm2020_vm4, %v9613_v29, 0.0  ;;  %2437 = vadd.xlane.f32.xlu1 %v2436_v30 }
 0x7e1   : > { %8720 = vmatpush3.msk.msra.mxu1 %vm2120_vm5, %v2520_v31  ;;  %2440 = vadd.xlane.f32.xlu0 %v2439_v33 }
 0x7e2   : > { %8721 = vmatprep.mubr.msk.f32.mxu1 %vm10364_vm0, %v10365_v1  ;;  %8734 = vmatprep.subr.mxu1 %v10365_v1 }
 0x7e8   : > { %8722 = vmatmul.mubr.msk.f32.vlgmr.msra.gmra.mrb[10].mxu1 %vm2116_vm6, %v9611_v28 }
 0x7e9   : > { %8736 = vmatprep.mubr.msk.f32.mxu1 %vm10364_vm0, %v10365_v1 }
 0x7f1   : > { %2751 = vrot.lane.b32.xlu1 %v11006_v37, %s11817_s13 }
 0x7f5   : > { %2672 = vrot.lane.b32.xlu1 %v10992_v32, %s11817_s13  ;;  %s11921_s13 = smov %s11920_s28 }
 0x7f7   : > { %2674 = vrot.lane.b32.xlu0 %v10992_v32, %s11819_s7 }
 0x86d   : > { %v2438_v35 = vpop.xlane.xlu1 %2437 }
 0x86e   : > { %v2441_v39 = vpop.xlane.xlu0 %2440 }
 0x86f   : > { %v2442_v40 = vadd.f32 %v2441_v39, %v2438_v35 }
 0x871   : > { %v2752_v36 = vpop.permute.xlu1 %2751  ;;  %9614 = vrcp.f32 %v2442_v40 }
 0x872   : > { %8735 = vmatpush3.xpose.msk.msra.mxu1 %vm1866_vm2, %v2752_v36  ;;  %v2675_v45 = vpop.permute.xlu0 %2674 }
 0x873   : > { %8749 = vmatprep.subr.mxu1 %v10365_v1 }
 0x875   : > { %v2673_v38 = vpop.permute.xlu1 %2672 }
 0x876   : > { %8737 = vmatmul.mubr.msk.f32.vlgmr.msra.gmra.mrb[12].mxu1 %vm1866_vm2, %v2673_v38 }
 0x877   : > { %8751 = vmatprep.mubr.msk.f32.mxu1 %vm10364_vm0, %v10365_v1  ;;  %8750 = vmatpush3.msra.mxu1 %v1682_v10 }
 0x878   : > { %8754 = vmatprep.subr.mxu1 %v10365_v1 }
 0x87b   : > { %v9615_v41 = vpop.eup %9614 }
 0x8bb   : > { %v2592_v42 = vpop.f32.mrb[10].mxu1 }
 0x8bc   : > { %v2597_v43 = vmul.f32 %v9615_v41, %v2592_v42  ;;  %v8723_v44 = vpop.f32.mrb[11].mxu1 }
 0x8be   : > { %8727 = vmatmul.mubr.msk.f32.vlgmr.msra.gmra.mrb[8].mxu0 %vm1866_vm2, %v2597_v43 }
 0x8bf   : > { %8730 = vmatpush3.xpose.msk.msra.mxu0 %vm1866_vm2, %v2675_v45  ;;  %8731 = vmatprep.mubr.msk.f32.mxu0 %vm10364_vm0, %v10365_v1 }
 0x8c0   : > { %8739 = vmatprep.subr.mxu0 %v10365_v1 }
 0x8c2   : > { %8732 = vmatmul.mubr.msk.f32.vlgmr.msra.gmra.mrb[10].mxu0 %vm1866_vm2, %v2673_v38 }
 0x8c3   : > { %8741 = vmatprep.mubr.msk.f32.mxu0 %vm10364_vm0, %v10365_v1 }
 0x949   : > { %v2821_v46 = vpop.f32.mrb[12].mxu1 }
 0x94a   : > { %v2825_v47 = vmul.f32 0.35355338, %v2821_v46  ;;  %v8738_v48 = vpop.f32.mrb[13].mxu1  ;;  %v1683_v46 = vld [vmem:[%s11917_s26 + $0x18] sm:$0xff] }
 0x94c   : > { %v2829_v49 = vsel %vm2020_vm4, %v2825_v47, -inf }
 0x94d   : > { %2830 = vmax.xlane.f32.xlu1 %v2829_v49 }
 0x95e   : > { %2922 = vrot.lane.b32.xlu1 %v10992_v32, %s11807_s23  ;;  %s11813_s23 = smov 72  }
 0x991   : > { %v2667_v52 = vpop.f32.mrb[8].mxu0 }
 0x992   : > { %v11097_v53 = vadd.f32 %v2667_v52, %v2268_v51  ;;  %v8728_v54 = vpop.f32.mrb[9].mxu0 }
 0x995   : > { %v2746_v55 = vpop.f32.mrb[10].mxu0 }
 0x996   : > { %v2750_v56 = vmul.f32 0.35355338, %v2746_v55  ;;  %v8733_v57 = vpop.f32.mrb[11].mxu0 }
 0x998   : > { %v2826_v58 = vsel %vm2016_vm3, %v2750_v56, -inf }
 0x999   : > { %2827 = vmax.xlane.f32.xlu0 %v2826_v58 }
 0x9af   : > { %2846 = vrot.lane.b32.xlu0 %v11006_v37, %s11819_s7  ;;  %s11922_s7 = sld [smem:[#allocation43_spill]] }
 0x9da   : > { %v2831_v59 = vpop.xlane.xlu1 %2830 }
 0x9de   : > { %v2923_v8 = vpop.permute.xlu1 %2922 }
 0xa26   : > { %v2828_v60 = vpop.xlane.xlu0 %2827 }
 0xa27   : > { %v2832_v61 = vmax.f32 %v2828_v60, %v2831_v59 }
 0xa29   : > { %v2833_v62 = vsub.f32 %v2750_v56, %v2832_v61  ;;  %v2836_v63 = vsub.f32 %v2825_v47, %v2832_v61 }
 0xa2a   : > { %v2847_v2 = vpop.permute.xlu0 %2846 }
 0xa2b   : > { %v2834_v3 = vmul.f32 1.442695, %v2833_v62  ;;  %v2837_v4 = vmul.f32 1.442695, %v2836_v63  ;;  %8740 = vmatpush3.msra.mxu0 %v2847_v2 }
 0xa2c   : > { %8744 = vmatprep.subr.mxu0 %v10365_v1 }
 0xa2d   : > { %9616 = vpow2.f32 %v2834_v3 }
 0xa2e   : > { %9618 = vpow2.f32 %v2837_v4 }
 0xa37   : > { %v9617_v5 = vpop.eup %9616 }
 0xa38   : > { %v9619_v6 = vpop.eup %9618  ;;  %v2839_v7 = vsel %vm2016_vm3, %v9617_v5, 0.0 }
 0xa39   : > { %8742 = vmatmul.mubr.msk.f32.vlgmr.msra.gmra.mrb[12].mxu0 %vm1866_vm2, %v9619_v6  ;;  %v2842_v9 = vsel %vm2020_vm4, %v9619_v6, 0.0  ;;  %2840 = vadd.xlane.f32.xlu0 %v2839_v7 }
 0xa3a   : > { %8745 = vmatpush3.msk.msra.mxu0 %vm2120_vm5, %v2923_v8  ;;  %2843 = vadd.xlane.f32.xlu1 %v2842_v9 }
 0xa3b   : > { %8746 = vmatprep.mubr.msk.f32.mxu0 %vm10364_vm0, %v10365_v1  ;;  %8759 = vmatprep.subr.mxu0 %v10365_v1 }
 0xa41   : > { %8747 = vmatmul.mubr.msk.f32.vlgmr.msra.gmra.mrb[12].mxu0 %vm2116_vm6, %v9617_v5 }
 0xa42   : > { %8761 = vmatprep.mubr.msk.f32.mxu0 %vm10364_vm0, %v10365_v1 }
 0xa4b   : > { %3154 = vrot.lane.b32.xlu1 %v11006_v37, %s11809_s21 }
 0xa4f   : > { %3077 = vrot.lane.b32.xlu0 %v10992_v32, %s11813_s23 }
 0xa53   : > { %3075 = vrot.lane.b32.xlu0 %v10992_v32, %s11809_s21  ;;  %s11811_s21 = smov 40  }
 0xac6   : > { %v2841_v11 = vpop.xlane.xlu0 %2840 }
 0xac7   : > { %v2844_v12 = vpop.xlane.xlu1 %2843 }
 0xac8   : > { %v2845_v13 = vadd.f32 %v2844_v12, %v2841_v11 }
 0xaca   : > { %v3078_v14 = vpop.permute.xlu0 %3077  ;;  %9620 = vrcp.f32 %v2845_v13 }
 0xacb   : > { %v3155_v15 = vpop.permute.xlu1 %3154 }
 0xacc   : > { %8760 = vmatpush3.xpose.msk.msra.mxu0 %vm1866_vm2, %v3155_v15 }
 0xacd   : > { %8774 = vmatprep.subr.mxu0 %v10365_v1 }
 0xace   : > { %v3076_v16 = vpop.permute.xlu0 %3075 }
 0xacf   : > { %8762 = vmatmul.mubr.msk.f32.vlgmr.msra.gmra.mrb[14].mxu0 %vm1866_vm2, %v3076_v16 }
 0xad0   : > { %8776 = vmatprep.mubr.msk.f32.mxu0 %vm10364_vm0, %v10365_v1  ;;  %8775 = vmatpush3.msra.mxu0 %v1683_v46 }
 0xad1   : > { %9173 = vmatprep.subr.bf16.mxu0 %v10363_v0 }
 0xad4   : > { %v9621_v18 = vpop.eup %9620 }
 0xb14   : > { %v2995_v19 = vpop.f32.mrb[12].mxu0 }
 0xb15   : > { %v3000_v20 = vmul.f32 %v9621_v18, %v2995_v19  ;;  %v8748_v21 = vpop.f32.mrb[13].mxu0 }
 0xb16   : > { %v8341_v21 = vld [vmem:[#allocation10] ss:$0 sm:$0xff] }
 0xb17   : > { %8752 = vmatmul.mubr.msk.f32.vlgmr.msra.gmra.mrb[14].mxu1 %vm1866_vm2, %v3000_v20 }
 0xb18   : > { %8755 = vmatpush3.xpose.msk.msra.mxu1 %vm1866_vm2, %v3078_v14  ;;  %8756 = vmatprep.mubr.msk.f32.mxu1 %vm10364_vm0, %v10365_v1 }
 0xb19   : > { %8764 = vmatprep.subr.mxu1 %v10365_v1 }
 0xb1b   : > { %8757 = vmatmul.mubr.msk.f32.vlgmr.msra.gmra.mrb[16].mxu1 %vm1866_vm2, %v3076_v16 }
 0xb1c   : > { %8766 = vmatprep.mubr.msk.f32.mxu1 %vm10364_vm0, %v10365_v1 }
 0xba2   : > { %v3224_v22 = vpop.f32.mrb[14].mxu0 }
 0xba3   : > { %v3228_v23 = vmul.f32 0.35355338, %v3224_v22  ;;  %v8763_v24 = vpop.f32.mrb[15].mxu0 }
 0xba4   : > { %v3741_v24 = vld [vmem:[%s11921_s13 + $0x8] sm:$0xff] }
 0xba5   : > { %v3232_v25 = vsel %vm2020_vm4, %v3228_v23, -inf }
 0xba6   : > { %3233 = vmax.xlane.f32.xlu0 %v3232_v25  ;;  %v8342_v25 = vld [vmem:[#allocation12] ss:$0 sm:$0xff] }
 0xbbc   : > { %3249 = vrot.lane.b32.xlu0 %v11006_v37, %s11813_s23  ;;  %s11919_s23 = sld [smem:[#allocation52_spill]] }
 0xbc2   : > { %v3515_v7 = vld [vmem:[%s11919_s23] sm:$0xff]  ;;  %v3516_v8 = vld [vmem:[%s11919_s23 + $0x8] sm:$0xff]  ;;  %v3517_v9 = vld [vmem:[%s11919_s23 + $0x10] sm:$0xff] }
 0xbc3   : > { %v9180_v10 = vpack.c.bf16 %v3516_v8, %v3515_v7  ;;  %v3518_v11 = vld [vmem:[%s11919_s23 + $0x18] sm:$0xff]  ;;  %v3519_v13 = vld [vmem:[%s11919_s23 + $0x20] sm:$0xff]  ;;  %v3520_v14 = vld [vmem:[%s11919_s23 + $0x28] sm:$0xff] }
 0xbc4   : > { %v9183_v12 = vpack.c.bf16 %v3518_v11, %v3517_v9  ;;  %v9186_v15 = vpack.c.bf16 %v3520_v14, %v3519_v13 }
 0xbea   : > { %v3070_v26 = vpop.f32.mrb[14].mxu1 }
 0xbeb   : > { %v3074_v27 = vadd.f32 %v3070_v26, %v11097_v53  ;;  %v8753_v28 = vpop.f32.mrb[15].mxu1 }
 0xbee   : > { %v3149_v29 = vpop.f32.mrb[16].mxu1 }
 0xbef   : > { %v3153_v30 = vmul.f32 0.35355338, %v3149_v29  ;;  %v8758_v31 = vpop.f32.mrb[17].mxu1  ;;  %v3742_v29 = vld [vmem:[%s11921_s13 + $0x10] sm:$0xff] }
 0xbf1   : > { %v3229_v33 = vsel %vm2016_vm3, %v3153_v30, -inf }
 0xbf2   : > { %3230 = vmax.xlane.f32.xlu1 %v3229_v33  ;;  %v11193_v33 = vld [vmem:[%s11922_s7] sm:$0xff]  ;;  %s11925_s7 = smov 80  }
 0xc03   : > { %3325 = vrot.lane.b32.xlu1 %v10992_v32, %s11811_s21  ;;  %s11918_s21 = sld [smem:[#allocation50_spill]] }
 0xc09   : > { %v3510_v2 = vld [vmem:[%s11918_s21] sm:$0xff]  ;;  %v3511_v3 = vld [vmem:[%s11918_s21 + $0x8] sm:$0xff]  ;;  %v3513_v5 = vld [vmem:[%s11918_s21 + $0x18] sm:$0xff] }
 0xc0a   : > { %v9174_v4 = vpack.c.bf16 %v3511_v3, %v3510_v2 }
 0xc33   : > { %v3234_v34 = vpop.xlane.xlu0 %3233 }
 0xc37   : > { %v3250_v35 = vpop.permute.xlu0 %3249 }
 0xc38   : > { %8765 = vmatpush3.msra.mxu1 %v3250_v35  ;;  %v3522_v35 = vld [vmem:[%s11919_s23 + $0x38] sm:$0xff] }
 0xc39   : > { %8769 = vmatprep.subr.mxu1 %v10365_v1 }
 0xc7f   : > { %v3231_v37 = vpop.xlane.xlu1 %3230 }
 0xc80   : > { %v3235_v36 = vmax.f32 %v3231_v37, %v3234_v34  ;;  %v3521_v34 = vld [vmem:[%s11919_s23 + $0x30] sm:$0xff] }
 0xc81   : > { %v9189_v37 = vpack.c.bf16 %v3522_v35, %v3521_v34 }
 0xc82   : > { %v3236_v38 = vsub.f32 %v3153_v30, %v3235_v36  ;;  %v3239_v39 = vsub.f32 %v3228_v23, %v3235_v36  ;;  %v3740_v23 = vld [vmem:[%s11920_s28] sm:$0xff]  ;;  %v3743_v30 = vld [vmem:[%s11921_s13 + $0x18] sm:$0xff]  ;;  %s11923_s28 = sld [smem:[#allocation56_spill]]  ;;  %s11932_s13 = smov 64  }
 0xc83   : > { %v3326_v45 = vpop.permute.xlu1 %3325  ;;  %v11186_v31 = vpack.c.bf16 %v3743_v30, %v3742_v29  ;;  %v8343_v36 = vld [vmem:[#allocation13] ss:$0 sm:$0xff] }
 0xc84   : > { %v3237_v40 = vmul.f32 1.442695, %v3236_v38  ;;  %v3240_v41 = vmul.f32 1.442695, %v3239_v39 }
 0xc86   : > { %9622 = vpow2.f32 %v3237_v40 }
 0xc87   : > { %9624 = vpow2.f32 %v3240_v41 }
 0xc90   : > { %v9623_v42 = vpop.eup %9622 }
 0xc91   : > { %v9625_v43 = vpop.eup %9624  ;;  %v3242_v44 = vsel %vm2016_vm3, %v9623_v42, 0.0 }
 0xc92   : > { %8767 = vmatmul.mubr.msk.f32.vlgmr.msra.gmra.mrb[18].mxu1 %vm1866_vm2, %v9625_v43  ;;  %v3245_v32 = vsel %vm2020_vm4, %v9625_v43, 0.0  ;;  %3243 = vadd.xlane.f32.xlu1 %v3242_v44 }
 0xc93   : > { %8770 = vmatpush3.msk.msra.mxu1 %vm2120_vm5, %v3326_v45  ;;  %3246 = vadd.xlane.f32.xlu0 %v3245_v32 }
 0xc94   : > { %8771 = vmatprep.mubr.msk.f32.mxu1 %vm10364_vm0, %v10365_v1  ;;  %9179 = vmatprep.subr.bf16.mxu1 %v10363_v0 }
 0xc9a   : > { %8772 = vmatmul.mubr.msk.f32.vlgmr.msra.gmra.mrb[18].mxu1 %vm2116_vm6, %v9623_v42  ;;  %v11204_v42 = vld [vmem:[#allocation19] ss:$0 sm:$0xff] }
 0xc9b   : > { %8806 = vmatprep.mubr.msk.f32.mxu1 %vm10364_vm0, %v10365_v1  ;;  %9181 = vmatpush3.bf16.msra.mxu1 %v9180_v10 }
 0xc9c   : > { %9182 = vmatprep.subr.bf16.mxu1 %v10363_v0 }
 0xc9f   : > { %9184 = vmatpush3.bf16.msra.mxu1 %v9183_v12 }
 0xca0   : > { %9185 = vmatprep.subr.bf16.mxu1 %v10363_v0 }
 0xca3   : > { %9187 = vmatpush3.bf16.msra.mxu1 %v9186_v15 }
 0xca4   : > { %9188 = vmatprep.subr.bf16.mxu1 %v10363_v0 }
 0xca7   : > { %9190 = vmatpush3.bf16.msra.mxu1 %v9189_v37 }
 0xca8   : > { %8825 = vmatprep.subr.mxu1 %v10365_v1 }
 0xd1f   : > { %v3244_v48 = vpop.xlane.xlu1 %3243 }
 0xd20   : > { %v3247_v47 = vpop.xlane.xlu0 %3246 }
 0xd21   : > { %v3248_v49 = vadd.f32 %v3247_v47, %v3244_v48  ;;  %v3734_v48 = vlaneseq }
 0xd23   : > { %9626 = vrcp.f32 %v3248_v49  ;;  %v11225_v49 = vshrl.u32 %v3734_v48, 7 }
 0xd2d   : > { %v9627_v50 = vpop.eup %9626 }
 0xd6d   : > { %v3398_v51 = vpop.f32.mrb[18].mxu1 }
 0xd6e   : > { %v3403_v52 = vmul.f32 %v9627_v50, %v3398_v51  ;;  %v8773_v53 = vpop.f32.mrb[19].mxu1  ;;  %v3737_v50 = vand.u32 127, %v3734_v48 }
 0xd70   : > { %8777 = vmatmul.mubr.msk.f32.vlgmr.msra.gmra.mrb[16].mxu0 %vm1866_vm2, %v3403_v52  ;;  %vm3738_vm9 = vcmp.le.s32.totalorder %v3737_v50, %v11225_v49  ;;  %v10377_v52 = vmov -1e+09   ;;  %v11288_v50 = vld [vmem:[#allocation21] ss:$0 sm:$0xff] }
 0xd71   : > { %8787 = vmatprep.mubr.msk.f32.mxu0 %vm10364_vm0, %v10365_v1  ;;  %9175 = vmatpush3.bf16.msra.mxu0 %v9174_v4  ;;  %v11228_v53 = vsel %vm3738_vm9, 0.0, %v10377_v52 }
 0xd72   : > { %9176 = vmatprep.subr.bf16.mxu0 %v10363_v0 }
 0xe43   : > { %v3473_v54 = vpop.f32.mrb[16].mxu0 }
 0xe44   : > { %v3477_v55 = vadd.f32 %v3473_v54, %v3074_v27  ;;  %v8778_v56 = vpop.f32.mrb[17].mxu0  ;;  %v11177_v27 = vpack.c.bf16 %v3741_v24, %v3740_v23 }
 0xe46   : > { %v3478_v57 = vadd.f32 %v3477_v55, %v10978_v17  ;;  %v3512_v17 = vld [vmem:[%s11918_s21 + $0x10] sm:$0xff] }
 0xe47   : > { %v9177_v6 = vpack.c.bf16 %v3513_v5, %v3512_v17 }
 0xe48   : > { %v3482_v58 = vsel %vm3481_vm7, %v3478_v57, 0.0 }
 0xe49   : > { %3483 = vadd.xlane.f32.xlu0 %v3482_v58  ;;  %9178 = vmatpush3.bf16.msra.mxu0 %v9177_v6  ;;  %v11245_v6 = vld [vmem:[%s11923_s28] sm:$0xff] }
 0xe4a   : > { %9191 = vmatprep.subr.bf16.mxu0 %v10363_v0 }
 0xed6   : > { %v3484_v59 = vpop.xlane.xlu0 %3483 }
 0xed7   : > { %v3486_v60 = vmul.f32 0.03125, %v3484_v59 }
 0xed9   : > { %v3487_v61 = vsub.f32 %v3478_v57, %v3486_v60 }
 0xedb   : > { %v3488_v62 = vmul.f32 %v3487_v61, %v3487_v61 }
 0xedd   : > { %v3489_v63 = vsel %vm3481_vm7, %v3488_v62, 0.0 }
 0xede   : > { %3490 = vadd.xlane.f32.xlu1 %v3489_v63 }
 0xf6b   : > { %v3491_v16 = vpop.xlane.xlu1 %3490 }
 0xf6c   : > { %v3492_v18 = vmul.f32 0.03125, %v3491_v16 }
 0xf6e   : > { %v3493_v19 = vadd.f32 1e-05, %v3492_v18 }
 0xf70   : > { %9628 = vrsqrt.f32 %v3493_v19 }
 0xf7a   : > { %v9629_v20 = vpop.eup %9628 }
 0xf7b   : > { %v3495_v22 = vmul.f32 %v9629_v20, %v3487_v61 }
 0xf7d   : > { %v3502_v26 = vmul.f32 %v8341_v21, %v3495_v22 }
 0xf7f   : > { %v11179_v28 = vadd.f32 %v8342_v25, %v3502_v26 }
 0xf81   : > { %8788 = vmatmul.mubr.msk.f32.vlgmr.msra.gmra.mrb[18].mxu0 %vm1601_vm1, %v11179_v28 }
 0xf82   : > { %9193 = vmatpush3.bf16.msra.mxu0 %v11177_v27  ;;  %8817 = vmatprep.mubr.msk.f32.mxu0 %vm10364_vm0, %v10365_v1 }
 0xf83   : > { %9194 = vmatprep.subr.bf16.mxu0 %v10363_v0 }
 0xf86   : > { %9196 = vmatpush3.bf16.msra.mxu0 %v11186_v31 }
 0xf87   : > { %8820 = vmatprep.subr.mxu0 %v10365_v1 }
 0xf89   : > { %8818 = vmatmul.mubr.msk.f32.vlgmr.msra.gmra.mrb[20].mxu0 %vm1601_vm1, %v11193_v33 }
 0xf8a   : > { %8822 = vmatprep.mubr.msk.f32.mxu0 %vm10364_vm0, %v10365_v1 }
0x1054   : > { %v3599_v38 = vpop.f32.mrb[18].mxu0 }
0x1055   : > { %v3600_v39 = vadd.f32 %v8343_v36, %v3599_v38  ;;  %v8789_v40 = vpop.f32.mrb[19].mxu0 }
0x1057   : > { %v3603_v41 = vmax.f32 %v3600_v39, 0.0 }
0x1059   : > { %8807 = vmatmul.mubr.msk.f32.vlgmr.msra.gmra.mrb[20].mxu1 %vm3610_vm8, %v3603_v41 }
0x105a   : > { %8827 = vmatprep.mubr.msk.f32.mxu1 %vm10364_vm0, %v10365_v1 }
0x105c   : > { %v3825_v43 = vpop.f32.mrb[20].mxu0 }
0x105d   : > { %v11209_v44 = vadd.f32 %v11204_v42, %v3825_v43  ;;  %v8819_v45 = vpop.f32.mrb[21].mxu0 }
0x105f   : > { %3837 = vrot.lane.b32.xlu0 %v11209_v44, %s11825_s10  ;;  %s11928_s10 = smov 48  }
0x1063   : > { %4078 = vrot.lane.b32.xlu0 %v11209_v44, %s11823_s9  ;;  %s11927_s9 = smov 56  }
0x1067   : > { %4076 = vrot.lane.b32.xlu0 %v11209_v44, %s11821_s0  ;;  %s11924_s0 = smov %s11923_s28  ;;  %s11926_s28 = smov 112  }
0x1068   : > { %v11271_v30 = vld [vmem:[%s11924_s0 + $0x8] sm:$0xff] }
0x10d1   : > { %v3838_v32 = vpop.permute.xlu0 %3837 }
0x10d2   : > { %8821 = vmatpush3.xpose.msk.msra.mxu0 %vm1866_vm2, %v3838_v32 }
0x10d3   : > { %8830 = vmatprep.subr.mxu0 %v10365_v1 }
0x10d5   : > { %8823 = vmatmul.mubr.msk.f32.vlgmr.msra.gmra.mrb[22].mxu0 %vm1866_vm2, %v11209_v44  ;;  %v4079_v4 = vpop.permute.xlu0 %4078 }
0x10d6   : > { %8832 = vmatprep.mubr.msk.f32.mxu0 %vm10364_vm0, %v10365_v1  ;;  %8831 = vmatpush3.msra.mxu0 %v11245_v6 }
0x10d7   : > { %8840 = vmatprep.subr.mxu0 %v10365_v1 }
0x10d9   : > { %v4077_v5 = vpop.permute.xlu0 %4076 }
0x112c   : > { %v11223_v46 = vpop.f32.mrb[20].mxu1 }
0x112d   : > { %v8808_v47 = vpop.f32.mrb[21].mxu1 }
0x11a8   : > { %v3909_v51 = vpop.f32.mrb[22].mxu0 }
0x11a9   : > { %v3913_v54 = vmul.f32 0.35355338, %v3909_v51  ;;  %v8824_v55 = vpop.f32.mrb[23].mxu0 }
0x11ab   : > { %v3914_v56 = vadd.f32 %v3913_v54, %v11228_v53 }
0x11ad   : > { %v3915_v57 = vsel %vm1866_vm2, %v3914_v56, -inf }
0x11ae   : > { %3916 = vmax.xlane.f32.xlu1 %v3915_v57 }
0x123b   : > { %v3917_v58 = vpop.xlane.xlu1 %3916 }
0x123c   : > { %v3918_v59 = vsub.f32 %v3914_v56, %v3917_v58 }
0x123e   : > { %v3919_v60 = vmul.f32 1.442695, %v3918_v59 }
0x1240   : > { %9630 = vpow2.f32 %v3919_v60 }
0x124a   : > { %v9631_v61 = vpop.eup %9630 }
0x124b   : > { %v3921_v62 = vsel %vm1866_vm2, %v9631_v61, 0.0 }
0x124c   : > { %3922 = vadd.xlane.f32.xlu1 %v3921_v62 }
0x125d   : > { %3926 = vrot.lane.b32.xlu1 %v11209_v44, %s11827_s3  ;;  %s11929_s3 = smov 104  }
0x12d9   : > { %v3923_v63 = vpop.xlane.xlu1 %3922 }
0x12da   : > { %9632 = vrcp.f32 %v3923_v63 }
0x12dd   : > { %v3927_v2 = vpop.permute.xlu1 %3926 }
0x12de   : > { %8826 = vmatpush3.msra.mxu1 %v3927_v2  ;;  %v8345_v2 = vld [vmem:[#allocation15] ss:$0 sm:$0xff] }
0x12df   : > { %8835 = vmatprep.subr.mxu1 %v10365_v1 }
0x12e4   : > { %v9633_v3 = vpop.eup %9632 }
0x12e5   : > { %v3925_v17 = vmul.f32 %v9633_v3, %v9631_v61  ;;  %v11300_v61 = vld [vmem:[%s11924_s0 + $0x10] sm:$0xff] }
0x12e7   : > { %8828 = vmatmul.mubr.msk.f32.vlgmr.msra.gmra.mrb[22].mxu1 %vm1866_vm2, %v3925_v17 }
0x12e8   : > { %8836 = vmatpush3.xpose.msk.msra.mxu1 %vm1866_vm2, %v4079_v4  ;;  %8837 = vmatprep.mubr.msk.f32.mxu1 %vm10364_vm0, %v10365_v1  ;;  %v3681_v4 = vadd.f32 %v8345_v2, %v11223_v46 }
0x12e9   : > { %8845 = vmatprep.subr.mxu1 %v10365_v1 }
0x12eb   : > { %8838 = vmatmul.mubr.msk.f32.vlgmr.msra.gmra.mrb[24].mxu1 %vm1866_vm2, %v4077_v5 }
0x12ec   : > { %8847 = vmatprep.mubr.msk.f32.mxu1 %vm10364_vm0, %v10365_v1  ;;  %8846 = vmatpush3.msra.mxu1 %v11271_v30 }
0x12ed   : > { %8855 = vmatprep.subr.mxu1 %v10365_v1 }
0x13ba   : > { %v3998_v7 = vpop.f32.mrb[22].mxu1 }
0x13bb   : > { %v8829_v8 = vpop.f32.mrb[23].mxu1  ;;  %8833 = vmatmul.mubr.msk.f32.vlgmr.msra.gmra.mrb[24].mxu0 %vm1866_vm2, %v3998_v7 }
0x13bc   : > { %8842 = vmatprep.mubr.msk.f32.mxu0 %vm10364_vm0, %v10365_v1 }
0x13be   : > { %v4150_v9 = vpop.f32.mrb[24].mxu1 }
0x13bf   : > { %v4154_v10 = vmul.f32 0.35355338, %v4150_v9  ;;  %v8839_v11 = vpop.f32.mrb[25].mxu1  ;;  %v3684_v9 = vadd.f32 %v3681_v4, %v11179_v28 }
0x13c1   : > { %v4155_v12 = vadd.f32 %v4154_v10, %v11228_v53  ;;  %v3687_v10 = vsel %vm3481_vm7, %v3684_v9, 0.0 }
0x13c3   : > { %v4156_v13 = vsel %vm1866_vm2, %v4155_v12, -inf }
0x13c4   : > { %4157 = vmax.xlane.f32.xlu1 %v4156_v13 }
0x13d5   : > { %4319 = vrot.lane.b32.xlu1 %v11209_v44, %s11925_s7 }
0x13d9   : > { %4317 = vrot.lane.b32.xlu1 %v11209_v44, %s11926_s28 }
0x1451   : > { %v4158_v14 = vpop.xlane.xlu1 %4157 }
0x1452   : > { %v4159_v15 = vsub.f32 %v4155_v12, %v4158_v14 }
0x1454   : > { %v4160_v16 = vmul.f32 1.442695, %v4159_v15 }
0x1455   : > { %v4320_v25 = vpop.permute.xlu1 %4319 }
0x1456   : > { %9634 = vpow2.f32 %v4160_v16 }
0x1459   : > { %v4318_v29 = vpop.permute.xlu1 %4317 }
0x1460   : > { %v9635_v18 = vpop.eup %9634 }
0x1461   : > { %v4162_v19 = vsel %vm1866_vm2, %v9635_v18, 0.0 }
0x1462   : > { %4163 = vadd.xlane.f32.xlu0 %v4162_v19 }
0x1478   : > { %4167 = vrot.lane.b32.xlu0 %v11209_v44, %s11927_s9 }
0x148e   : > { %v4071_v20 = vpop.f32.mrb[24].mxu0 }
0x148f   : > { %v8834_v21 = vpop.f32.mrb[25].mxu0  ;;  %v4075_v51 = vadd.f32 %v11288_v50, %v4071_v20  ;;  %v11315_v20 = vld [vmem:[%s11931_s12] sm:$0xff] }
0x1490   : > { %v11318_v21 = vld [vmem:[%s11931_s12 + $0x8] sm:$0xff] }
0x14ef   : > { %v4164_v22 = vpop.xlane.xlu0 %4163 }
0x14f0   : > { %9636 = vrcp.f32 %v4164_v22  ;;  %v11322_v22 = vpack.i.bf16 %v11318_v21, %v11315_v20 }
0x14f3   : > { %v4168_v23 = vpop.permute.xlu0 %4167 }
0x14f4   : > { %8841 = vmatpush3.msra.mxu0 %v4168_v23  ;;  %v11327_v23 = vld [vmem:[%s11931_s12 + $0x10] sm:$0xff] }
0x14f5   : > { %8850 = vmatprep.subr.mxu0 %v10365_v1 }
0x14fa   : > { %v9637_v24 = vpop.eup %9636 }
0x14fb   : > { %v4166_v26 = vmul.f32 %v9637_v24, %v9635_v18  ;;  %v11330_v24 = vld [vmem:[%s11931_s12 + $0x18] sm:$0xff]  ;;  %s11935_s12 = sld [smem:[#allocation42_spill]] }
0x14fd   : > { %8843 = vmatmul.mubr.msk.f32.vlgmr.msra.gmra.mrb[26].mxu0 %vm1866_vm2, %v4166_v26 }
0x14fe   : > { %8851 = vmatpush3.xpose.msk.msra.mxu0 %vm1866_vm2, %v4320_v25  ;;  %8852 = vmatprep.mubr.msk.f32.mxu0 %vm10364_vm0, %v10365_v1  ;;  %v11336_v25 = vpack.i.bf16 %v11330_v24, %v11327_v23 }
0x14ff   : > { %8860 = vmatprep.subr.mxu0 %v10365_v1 }
0x1501   : > { %8853 = vmatmul.mubr.msk.f32.vlgmr.msra.gmra.mrb[28].mxu0 %vm1866_vm2, %v4318_v29 }
0x1502   : > { %8862 = vmatprep.mubr.msk.f32.mxu0 %vm10364_vm0, %v10365_v1  ;;  %8861 = vmatpush3.msra.mxu0 %v11300_v61 }
0x1503   : > { %8870 = vmatprep.subr.mxu0 %v10365_v1 }
0x15d0   : > { %v4239_v34 = vpop.f32.mrb[26].mxu0 }
0x15d1   : > { %v8844_v35 = vpop.f32.mrb[27].mxu0  ;;  %8848 = vmatmul.mubr.msk.f32.vlgmr.msra.gmra.mrb[26].mxu1 %vm1866_vm2, %v4239_v34 }
0x15d2   : > { %8857 = vmatprep.mubr.msk.f32.mxu1 %vm10364_vm0, %v10365_v1  ;;  %v11342_v35 = vld [vmem:[#allocation25] ss:$0 sm:$0xff] }
0x15d4   : > { %v4391_v37 = vpop.f32.mrb[28].mxu0 }
0x15d5   : > { %v4395_v36 = vmul.f32 0.35355338, %v4391_v37  ;;  %v8854_v38 = vpop.f32.mrb[29].mxu0  ;;  %v11345_v37 = vld [vmem:[%s11924_s0 + $0x18] sm:$0xff]  ;;  %s8301_s0 = sshll.u32 %s11958_s11, 1 }
0x15d6   : > { %s1583_s15 = scalar_lea.vmem %s11934_s5, %s8301_s0  ;;  %s1579_s0 = scalar_lea.vmem %s11935_s12, %s11958_s11 }
0x15d7   : > { %v4396_v39 = vadd.f32 %v4395_v36, %v11228_v53  ;;  %s11937_s12 = sld [smem:[#allocation65_spill]]  ;;  %s11940_s5 = sld [smem:[#allocation68_spill]] }
0x15d9   : > { %v4397_v40 = vsel %vm1866_vm2, %v4396_v39, -inf }
0x15da   : > { %4398 = vmax.xlane.f32.xlu0 %v4397_v40 }
0x15f0   : > { %4408 = vrot.lane.b32.xlu0 %v11209_v44, %s11928_s10 }
0x15f4   : > { %4558 = vrot.lane.b32.xlu0 %v11209_v44, %s11929_s3 }
0x1667   : > { %v4399_v41 = vpop.xlane.xlu0 %4398 }
0x1668   : > { %v4400_v43 = vsub.f32 %v4396_v39, %v4399_v41 }
0x166a   : > { %v4401_v45 = vmul.f32 1.442695, %v4400_v43 }
0x166b   : > { %v4409_v32 = vpop.permute.xlu0 %4408 }
0x166c   : > { %9638 = vpow2.f32 %v4401_v45  ;;  %8856 = vmatpush3.msra.mxu1 %v4409_v32 }
0x166d   : > { %8865 = vmatprep.subr.mxu1 %v10365_v1 }
0x166f   : > { %v4559_v60 = vpop.permute.xlu0 %4558 }
0x1676   : > { %v9639_v47 = vpop.eup %9638 }
0x1677   : > { %v4403_v48 = vsel %vm1866_vm2, %v9639_v47, 0.0 }
0x1678   : > { %4404 = vadd.xlane.f32.xlu1 %v4403_v48  ;;  %v8347_v48 = vld [vmem:[#allocation16] ss:$0 sm:$0xff] }
0x1689   : > { %4560 = vrot.lane.b32.xlu1 %v11209_v44, %s11930_s4 }
0x16a4   : > { %v4312_v52 = vpop.f32.mrb[26].mxu1 }
0x16a5   : > { %v4316_v54 = vadd.f32 %v4312_v52, %v4075_v51  ;;  %v8849_v55 = vpop.f32.mrb[27].mxu1 }
0x1705   : > { %v4405_v56 = vpop.xlane.xlu1 %4404 }
0x1706   : > { %9640 = vrcp.f32 %v4405_v56 }
0x1709   : > { %v4561_v59 = vpop.permute.xlu1 %4560 }
0x1710   : > { %v9641_v57 = vpop.eup %9640 }
0x1711   : > { %v4407_v58 = vmul.f32 %v9641_v57, %v9639_v47 }
0x1713   : > { %8858 = vmatmul.mubr.msk.f32.vlgmr.msra.gmra.mrb[28].mxu1 %vm1866_vm2, %v4407_v58  ;;  %v8348_v58 = vld [vmem:[#allocation18] ss:$0 sm:$0xff] }
0x1714   : > { %8866 = vmatpush3.xpose.msk.msra.mxu1 %vm1866_vm2, %v4561_v59  ;;  %8867 = vmatprep.mubr.msk.f32.mxu1 %vm10364_vm0, %v10365_v1 }
0x1715   : > { %8875 = vmatprep.subr.mxu1 %v10365_v1 }
0x1717   : > { %8868 = vmatmul.mubr.msk.f32.vlgmr.msra.gmra.mrb[30].mxu1 %vm1866_vm2, %v4559_v60 }
0x1718   : > { %8877 = vmatprep.mubr.msk.f32.mxu1 %vm10364_vm0, %v10365_v1  ;;  %8876 = vmatpush3.msra.mxu1 %v11345_v37 }
0x1719   : > { %9203 = vmatprep.subr.bf16.mxu1 %v10363_v0 }
0x17e6   : > { %v4480_v62 = vpop.f32.mrb[28].mxu1 }
0x17e7   : > { %v8859_v63 = vpop.f32.mrb[29].mxu1  ;;  %8863 = vmatmul.mubr.msk.f32.vlgmr.msra.gmra.mrb[30].mxu0 %vm1866_vm2, %v4480_v62 }
0x17e8   : > { %8872 = vmatprep.mubr.msk.f32.mxu0 %vm10364_vm0, %v10365_v1 }
0x17ea   : > { %v4632_v3 = vpop.f32.mrb[30].mxu1 }
0x17eb   : > { %v4636_v17 = vmul.f32 0.35355338, %v4632_v3  ;;  %v8869_v5 = vpop.f32.mrb[31].mxu1  ;;  %v8349_v3 = vld [vmem:[%s1579_s0] ss:$0 sm:$0xff]  ;;  %s11939_s0 = sld [smem:[#allocation66_spill]] }
0x17ed   : > { %v4637_v7 = vadd.f32 %v4636_v17, %v11228_v53 }
0x17ef   : > { %v4638_v8 = vsel %vm1866_vm2, %v4637_v7, -inf }
0x17f0   : > { %4639 = vmax.xlane.f32.xlu1 %v4638_v8  ;;  %v11369_v8 = vld [vmem:[%s11936_s17] sm:$0xff] }
0x17f4   : > { %3688 = vadd.xlane.f32.xlu1 %v3687_v10 }
0x187d   : > { %v4640_v11 = vpop.xlane.xlu1 %4639 }
0x187e   : > { %v4641_v12 = vsub.f32 %v4637_v7, %v4640_v11  ;;  %v11377_v11 = vld [vmem:[%s11936_s17 + $0x10] sm:$0xff] }
0x1880   : > { %v4642_v13 = vmul.f32 1.442695, %v4641_v12  ;;  %v11380_v12 = vld [vmem:[%s11936_s17 + $0x18] sm:$0xff] }
0x1881   : > { %v3689_v46 = vpop.xlane.xlu1 %3688 }
0x1882   : > { %9642 = vpow2.f32 %v4642_v13  ;;  %v3690_v14 = vmul.f32 0.03125, %v3689_v46 }
0x1884   : > { %v3691_v15 = vsub.f32 %v3684_v9, %v3690_v14  ;;  %v11372_v9 = vld [vmem:[%s11936_s17 + $0x8] sm:$0xff]  ;;  %v9207_v14 = vpack.c.bf16 %v11380_v12, %v11377_v11 }
0x1885   : > { %v9204_v10 = vpack.c.bf16 %v11372_v9, %v11369_v8 }
0x1886   : > { %v3692_v16 = vmul.f32 %v3691_v15, %v3691_v15 }
0x1888   : > { %v3693_v18 = vsel %vm3481_vm7, %v3692_v16, 0.0 }
0x1889   : > { %3694 = vadd.xlane.f32.xlu1 %v3693_v18 }
0x188c   : > { %v9643_v28 = vpop.eup %9642 }
0x188d   : > { %v4644_v19 = vsel %vm1866_vm2, %v9643_v28, 0.0 }
0x188e   : > { %4645 = vadd.xlane.f32.xlu0 %v4644_v19 }
0x189a   : > { %9585 = vrot.lane.b32.xlu1 %v11322_v22, %s11932_s13 }
0x18a4   : > { %4649 = vrot.lane.b32.xlu0 %v11209_v44, %s11933_s14 }
0x18a8   : > { %9590 = vrot.lane.b32.xlu0 %v11336_v25, %s11932_s13 }
0x18ac   : > { %4855 = vrot.lane.b32.xlu0 %v11342_v35, %s11932_s13 }
0x18ba   : > { %v4553_v26 = vpop.f32.mrb[30].mxu0 }
0x18bb   : > { %v11340_v29 = vadd.f32 %v4553_v26, %v4316_v54  ;;  %v8864_v34 = vpop.f32.mrb[31].mxu0 }
0x1916   : > { %v3695_v44 = vpop.xlane.xlu1 %3694 }
0x1917   : > { %v3696_v36 = vmul.f32 0.03125, %v3695_v44 }
0x1919   : > { %v3697_v38 = vadd.f32 1e-05, %v3696_v36 }
0x191a   : > { %v9586_v41 = vpop.permute.xlu1 %9585 }
0x191b   : > { %9644 = vrsqrt.f32 %v3697_v38  ;;  %v4646_v39 = vpop.xlane.xlu0 %4645  ;;  %v9588_v43 = vunpack.i.h.bf16 %v9586_v41  ;;  %v9587_v45 = vunpack.i.l.bf16 %v9586_v41 }
0x191c   : > { %9646 = vrcp.f32 %v4646_v39 }
0x191d   : > { %v9198_v54 = vpack.c.bf16 %v9588_v43, %v9587_v45 }
0x191f   : > { %v4650_v40 = vpop.permute.xlu0 %4649 }
0x1920   : > { %8871 = vmatpush3.msra.mxu0 %v4650_v40 }
0x1921   : > { %9197 = vmatprep.subr.bf16.mxu0 %v10363_v0 }
0x1923   : > { %v9591_v32 = vpop.permute.xlu0 %9590 }
0x1924   : > { %v9593_v55 = vunpack.i.h.bf16 %v9591_v32  ;;  %v9592_v56 = vunpack.i.l.bf16 %v9591_v32 }
0x1925   : > { %v9645_v47 = vpop.eup %9644 }
0x1926   : > { %v9647_v51 = vpop.eup %9646  ;;  %v3699_v52 = vmul.f32 %v9645_v47, %v3691_v15  ;;  %v9201_v60 = vpack.c.bf16 %v9593_v55, %v9592_v56  ;;  %v5011_v55 = vsub.s32 0, %v11225_v49 }
0x1927   : > { %v4648_v57 = vmul.f32 %v9647_v51, %v9643_v28  ;;  %v4856_v15 = vpop.permute.xlu0 %4855 }
0x1928   : > { %v3706_v59 = vmul.f32 %v8347_v48, %v3699_v52 }
0x1929   : > { %8873 = vmatmul.mubr.msk.f32.vlgmr.msra.gmra.mrb[32].mxu0 %vm1866_vm2, %v4648_v57  ;;  %v11402_v57 = vld [vmem:[#allocation24] ss:$0 sm:$0xff] }
0x192a   : > { %9199 = vmatpush3.bf16.msra.mxu0 %v9198_v54  ;;  %8888 = vmatprep.mubr.msk.f32.mxu0 %vm10364_vm0, %v10365_v1  ;;  %v3713_v62 = vadd.f32 %v8348_v58, %v3706_v59 }
0x192b   : > { %9200 = vmatprep.subr.bf16.mxu0 %v10363_v0 }
0x192c   : > { %v3714_v63 = vmul.f32 0.5, %v3713_v62  ;;  %3730 = vst.msk [vmem:[%s1583_s15] sm:$0x1] %vm3729_vm10, %v3713_v62 }
0x192e   : > { %9202 = vmatpush3.bf16.msra.mxu0 %v9201_v60  ;;  %v3715_v2 = vmul.f32 1.442695, %v3714_v63 }
0x192f   : > { %9209 = vmatprep.subr.bf16.mxu0 %v10363_v0 }
0x1930   : > { %9648 = vpow2.f32 %v3715_v2 }
0x193a   : > { %v9649_v4 = vpop.eup %9648 }
0x193b   : > { %v3724_v17 = vmul.f32 %v9649_v4, %v8349_v3  ;;  %3732 = vst.msk [vmem:[%s1583_s15] sm:$0x2] %vm3731_vm11, %v9649_v4  ;;  %s11938_s15 = sld [smem:[#allocation67_spill]] }
0x193d   : > { %v3726_v5 = vrot.slane %v3724_v17, 1 }
0x193f   : > { %v3728_v7 = vadd.f32 %v3726_v5, %v3713_v62 }
0x1941   : > { %8889 = vmatmul.mubr.msk.f32.vlgmr.msra.gmra.mrb[34].mxu0 %vm1601_vm1, %v3728_v7  ;;  %v5043_v7 = vld [vmem:[%s11937_s12] sm:$0xff] }
0x1942   : > { %8910 = vmatprep.mubr.msk.f32.mxu0 %vm10364_vm0, %v10365_v1 }
0x19fc   : > { %v4721_v13 = vpop.f32.mrb[32].mxu0 }
0x19fd   : > { %v8874_v46 = vpop.f32.mrb[33].mxu0  ;;  %8878 = vmatmul.mubr.msk.f32.vlgmr.msra.gmra.mrb[32].mxu1 %vm1866_vm2, %v4721_v13 }
0x19fe   : > { %9205 = vmatpush3.bf16.msra.mxu1 %v9204_v10  ;;  %8899 = vmatprep.mubr.msk.f32.mxu1 %vm10364_vm0, %v10365_v1  ;;  %v5044_v10 = vld [vmem:[%s11937_s12 + $0x8] sm:$0xff]  ;;  %v5045_v46 = vld [vmem:[%s11937_s12 + $0x10] sm:$0xff] }
0x19ff   : > { %9206 = vmatprep.subr.bf16.mxu1 %v10363_v0  ;;  %v11412_v13 = vpack.c.bf16 %v5044_v10, %v5043_v7 }
0x1a01   : > { %9211 = vmatpush3.bf16.msra.mxu0 %v11412_v13 }
0x1a02   : > { %9208 = vmatpush3.bf16.msra.mxu1 %v9207_v14  ;;  %v5046_v14 = vld [vmem:[%s11937_s12 + $0x18] sm:$0xff]  ;;  %9212 = vmatprep.subr.bf16.mxu0 %v10363_v0  ;;  %s11941_s12 = sld [smem:[#allocation69_spill]] }
0x1a03   : > { %9215 = vmatprep.subr.bf16.mxu1 %v10363_v0 }
0x1a14   : > { %v4927_v16 = vpop.f32.mrb[34].mxu0 }
0x1a15   : > { %v4928_v18 = vadd.f32 %v4927_v16, %v4856_v15  ;;  %v8890_v28 = vpop.f32.mrb[35].mxu0  ;;  %v11418_v15 = vpack.c.bf16 %v5046_v14, %v5045_v46  ;;  %v5048_v16 = vld [vmem:[%s11938_s15] sm:$0xff] }
0x1a16   : > { %v5050_v28 = vld [vmem:[%s11938_s15 + $0x10] sm:$0xff] }
0x1a17   : > { %8900 = vmatmul.mubr.msk.f32.vlgmr.msra.gmra.mrb[34].mxu1 %vm1601_vm1, %v4928_v18  ;;  %9214 = vmatpush3.bf16.msra.mxu0 %v11418_v15  ;;  %v5049_v18 = vld [vmem:[%s11938_s15 + $0x8] sm:$0xff] }
0x1a18   : > { %8929 = vmatprep.mubr.msk.f32.mxu1 %vm10364_vm0, %v10365_v1  ;;  %9227 = vmatprep.subr.bf16.mxu0 %v10363_v0 }
0x1ad0   : > { %v4794_v19 = vpop.f32.mrb[32].mxu1 }
0x1ad1   : > { %v4798_v26 = vadd.f32 %v4794_v19, %v11340_v29  ;;  %v8879_v34 = vpop.f32.mrb[33].mxu1  ;;  %v11396_v29 = vld [vmem:[#allocation27] sm:$0x1]  ;;  %v11425_v19 = vpack.c.bf16 %v5049_v18, %v5048_v16 }
0x1ad3   : > { %v4799_v44 = vadd.f32 %v4798_v26, %v11193_v33  ;;  %v11398_v33 = vld [vmem:[#allocation22] ss:$0 sm:$0xff]  ;;  %v5051_v26 = vld [vmem:[%s11938_s15 + $0x18] sm:$0xff]  ;;  %9217 = vmatpush3.bf16.msra.mxu1 %v11425_v19 }
0x1ad4   : > { %v11429_v34 = vpack.c.bf16 %v5051_v26, %v5050_v28  ;;  %9218 = vmatprep.subr.bf16.mxu1 %v10363_v0 }
0x1ad5   : > { %v4802_v36 = vsel %vm1601_vm1, %v4799_v44, 0.0 }
0x1ad6   : > { %4803 = vadd.xlane.f32.xlu1 %v4802_v36  ;;  %v5053_v36 = vld [vmem:[%s11938_s15 + $0x28] sm:$0xff] }
0x1ad7   : > { %9220 = vmatpush3.bf16.msra.mxu1 %v11429_v34 }
0x1ad8   : > { %9221 = vmatprep.subr.bf16.mxu1 %v10363_v0 }
0x1aea   : > { %v5005_v38 = vpop.f32.mrb[34].mxu1 }
0x1aeb   : > { %v8901_v39 = vpop.f32.mrb[35].mxu1  ;;  %v5006_v54 = vadd.f32 %v5005_v38, %v11396_v29 }
0x1aed   : > { %v5012_v59 = vrot.slane %v5006_v54, %v5011_v55  ;;  %v5055_v54 = vld [vmem:[%s11938_s15 + $0x38] sm:$0xff] }
0x1b63   : > { %v4804_v40 = vpop.xlane.xlu1 %4803 }
0x1b64   : > { %v4805_v41 = vmul.f32 0.03125, %v4804_v40 }
0x1b66   : > { %v4806_v43 = vsub.f32 %v4799_v44, %v4805_v41  ;;  %v5052_v44 = vld [vmem:[%s11938_s15 + $0x20] sm:$0xff] }
0x1b67   : > { %v11435_v38 = vpack.c.bf16 %v5053_v36, %v5052_v44  ;;  %v11473_v44 = vld [vmem:[%s11941_s12] ss:$0 sm:$0xff]  ;;  %s11944_s12 = smov 88  }
0x1b68   : > { %v4807_v45 = vmul.f32 %v4806_v43, %v4806_v43 }
0x1b69   : > { %9223 = vmatpush3.bf16.msra.mxu1 %v11435_v38 }
0x1b6a   : > { %v4808_v32 = vsel %vm1601_vm1, %v4807_v45, 0.0  ;;  %9224 = vmatprep.subr.bf16.mxu1 %v10363_v0  ;;  %v11440_v45 = vld [vmem:[#allocation28] ss:$0 sm:$0xff] }
0x1b6b   : > { %4809 = vadd.xlane.f32.xlu0 %v4808_v32 }
0x1bf8   : > { %v4810_v47 = vpop.xlane.xlu0 %4809 }
0x1bf9   : > { %v4811_v48 = vmul.f32 0.03125, %v4810_v47  ;;  %v11442_v47 = vld [vmem:[#allocation30] ss:$0 sm:$0xff] }
0x1bfb   : > { %v4812_v51 = vadd.f32 1e-05, %v4811_v48 }
0x1bfd   : > { %9650 = vrsqrt.f32 %v4812_v51 }
0x1c07   : > { %v9651_v52 = vpop.eup %9650 }
0x1c08   : > { %v4814_v56 = vmul.f32 %v9651_v52, %v4806_v43  ;;  %v5054_v52 = vld [vmem:[%s11938_s15 + $0x30] sm:$0xff] }
0x1c0a   : > { %v4821_v58 = vmul.f32 %v11398_v33, %v4814_v56  ;;  %v11455_v56 = vpack.c.bf16 %v5055_v54, %v5054_v52 }
0x1c0c   : > { %v4828_v60 = vadd.f32 %v11402_v57, %v4821_v58  ;;  %9226 = vmatpush3.bf16.msra.mxu1 %v11455_v56  ;;  %v11460_v58 = vld [vmem:[%s11939_s0] ss:$0 sm:$0xff]  ;;  %s11942_s0 = sld [smem:[#allocation70_spill]] }
0x1c0d   : > { %8948 = vmatprep.subr.mxu1 %v10365_v1 }
0x1c0e   : > { %v5013_v62 = vadd.f32 %v5012_v59, %v4828_v60 }
0x1c10   : > { %v5016_v63 = vsel %vm1601_vm1, %v5013_v62, 0.0 }
0x1c11   : > { %5017 = vadd.xlane.f32.xlu0 %v5016_v63 }
0x1c9e   : > { %v5018_v2 = vpop.xlane.xlu0 %5017 }
0x1c9f   : > { %v5019_v3 = vmul.f32 0.03125, %v5018_v2 }
0x1ca1   : > { %v5020_v4 = vsub.f32 %v5013_v62, %v5019_v3 }
0x1ca3   : > { %v5021_v17 = vmul.f32 %v5020_v4, %v5020_v4 }
0x1ca5   : > { %v5022_v5 = vsel %vm1601_vm1, %v5021_v17, 0.0 }
0x1ca6   : > { %5023 = vadd.xlane.f32.xlu1 %v5022_v5 }
0x1d33   : > { %v5024_v39 = vpop.xlane.xlu1 %5023 }
0x1d34   : > { %v5025_v40 = vmul.f32 0.03125, %v5024_v39  ;;  %v11476_v39 = vld [vmem:[%s11942_s0] ss:$0 sm:$0xff]  ;;  %s11945_s0 = smov 120  }
0x1d36   : > { %v5026_v41 = vadd.f32 1e-05, %v5025_v40 }
0x1d38   : > { %9652 = vrsqrt.f32 %v5026_v41 }
0x1d42   : > { %v9653_v43 = vpop.eup %9652 }
0x1d43   : > { %v5028_v32 = vmul.f32 %v9653_v43, %v5020_v4 }
0x1d45   : > { %v5035_v48 = vmul.f32 %v11440_v45, %v5028_v32 }
0x1d47   : > { %v5042_v51 = vadd.f32 %v11442_v47, %v5035_v48 }
0x1d49   : > { %8911 = vmatmul.mubr.msk.f32.vlgmr.msra.gmra.mrb[36].mxu0 %vm1601_vm1, %v5042_v51 }
0x1d4a   : > { %9229 = vmatpush3.bf16.msra.mxu0 %v11177_v27  ;;  %8940 = vmatprep.mubr.msk.f32.mxu0 %vm10364_vm0, %v10365_v1 }
0x1d4b   : > { %9230 = vmatprep.subr.bf16.mxu0 %v10363_v0 }
0x1d4e   : > { %9232 = vmatpush3.bf16.msra.mxu0 %v11186_v31  ;;  %v11467_v31 = vld [vmem:[%s11940_s5] ss:$0 sm:$0xff]  ;;  %s11943_s5 = smov 96  }
0x1d4f   : > { %8943 = vmatprep.subr.mxu0 %v10365_v1 }
0x1e1c   : > { %v5132_v27 = vpop.f32.mrb[36].mxu0 }
0x1e1d   : > { %v5133_v59 = vadd.f32 %v11460_v58, %v5132_v27  ;;  %v8912_v60 = vpop.f32.mrb[37].mxu0 }
0x1e1f   : > { %v5136_v62 = vmax.f32 %v5133_v59, 0.0 }
0x1e21   : > { %8930 = vmatmul.mubr.msk.f32.vlgmr.msra.gmra.mrb[36].mxu1 %vm3610_vm8, %v5136_v62 }
0x1e22   : > { %8950 = vmatprep.mubr.msk.f32.mxu1 %vm10364_vm0, %v10365_v1 }
0x1ef4   : > { %v5212_v63 = vpop.f32.mrb[36].mxu1 }
0x1ef5   : > { %v5213_v2 = vadd.f32 %v11467_v31, %v5212_v63  ;;  %v8931_v3 = vpop.f32.mrb[37].mxu1 }
0x1ef7   : > { %v5216_v4 = vadd.f32 %v5213_v2, %v5042_v51 }
0x1ef9   : > { %v5219_v17 = vsel %vm1601_vm1, %v5216_v4, 0.0 }
0x1efa   : > { %5220 = vadd.xlane.f32.xlu0 %v5219_v17 }
0x1f87   : > { %v5221_v5 = vpop.xlane.xlu0 %5220 }
0x1f88   : > { %v5222_v7 = vmul.f32 0.03125, %v5221_v5 }
0x1f8a   : > { %v5223_v10 = vsub.f32 %v5216_v4, %v5222_v7 }
0x1f8c   : > { %v5224_v46 = vmul.f32 %v5223_v10, %v5223_v10 }
0x1f8e   : > { %v5225_v14 = vsel %vm1601_vm1, %v5224_v46, 0.0 }
0x1f8f   : > { %5226 = vadd.xlane.f32.xlu1 %v5225_v14 }
0x201c   : > { %v5227_v16 = vpop.xlane.xlu1 %5226 }
0x201d   : > { %v5228_v18 = vmul.f32 0.03125, %v5227_v16 }
0x201f   : > { %v5229_v28 = vadd.f32 1e-05, %v5228_v18 }
0x2021   : > { %9654 = vrsqrt.f32 %v5229_v28 }
0x202b   : > { %v9655_v26 = vpop.eup %9654 }
0x202c   : > { %v5231_v36 = vmul.f32 %v9655_v26, %v5223_v10 }
0x202e   : > { %v5238_v40 = vmul.f32 %v11473_v44, %v5231_v36 }
0x2030   : > { %v11480_v41 = vadd.f32 %v11476_v39, %v5238_v40 }
0x2032   : > { %8941 = vmatmul.mubr.msk.f32.vlgmr.msra.gmra.mrb[38].mxu0 %vm1601_vm1, %v11480_v41 }
0x2033   : > { %8945 = vmatprep.mubr.msk.f32.mxu0 %vm10364_vm0, %v10365_v1 }
0x2105   : > { %v5315_v43 = vpop.f32.mrb[38].mxu0 }
0x2106   : > { %v11487_v32 = vadd.f32 %v11204_v42, %v5315_v43  ;;  %v8942_v48 = vpop.f32.mrb[39].mxu0 }
0x2108   : > { %5320 = vrot.lane.b32.xlu0 %v11487_v32, %s11943_s5 }
0x210c   : > { %5561 = vrot.lane.b32.xlu0 %v11487_v32, %s11944_s12 }
0x2110   : > { %5559 = vrot.lane.b32.xlu0 %v11487_v32, %s11945_s0 }
0x217a   : > { %v5321_v51 = vpop.permute.xlu0 %5320 }
0x217b   : > { %8944 = vmatpush3.xpose.msk.msra.mxu0 %vm1866_vm2, %v5321_v51 }
0x217c   : > { %8953 = vmatprep.subr.mxu0 %v10365_v1 }
0x217e   : > { %8946 = vmatmul.mubr.msk.f32.vlgmr.msra.gmra.mrb[40].mxu0 %vm1866_vm2, %v11487_v32  ;;  %v5562_v5 = vpop.permute.xlu0 %5561 }
0x217f   : > { %8954 = vmatpush3.msra.mxu0 %v11245_v6  ;;  %8955 = vmatprep.mubr.msk.f32.mxu0 %vm10364_vm0, %v10365_v1 }
0x2180   : > { %8963 = vmatprep.subr.mxu0 %v10365_v1 }
0x2182   : > { %v5560_v10 = vpop.permute.xlu0 %5559 }
0x2251   : > { %v5392_v42 = vpop.f32.mrb[40].mxu0 }
0x2252   : > { %v5396_v52 = vmul.f32 0.35355338, %v5392_v42  ;;  %v8947_v54 = vpop.f32.mrb[41].mxu0 }
0x2254   : > { %v5397_v27 = vadd.f32 %v5396_v52, %v11228_v53 }
0x2256   : > { %v5398_v59 = vsel %vm1866_vm2, %v5397_v27, -inf }
0x2257   : > { %5399 = vmax.xlane.f32.xlu1 %v5398_v59 }
0x22e4   : > { %v5400_v60 = vpop.xlane.xlu1 %5399 }
0x22e5   : > { %v5401_v62 = vsub.f32 %v5397_v27, %v5400_v60 }
0x22e7   : > { %v5402_v63 = vmul.f32 1.442695, %v5401_v62 }
0x22e9   : > { %9656 = vpow2.f32 %v5402_v63 }
0x22f3   : > { %v9657_v2 = vpop.eup %9656 }
0x22f4   : > { %v5404_v6 = vsel %vm1866_vm2, %v9657_v2, 0.0 }
0x22f5   : > { %5405 = vadd.xlane.f32.xlu1 %v5404_v6 }
0x2306   : > { %5409 = vrot.lane.b32.xlu1 %v11487_v32, %s11932_s13  ;;  %s8302_s13 = sshll.u32 %s11958_s11, 3  ;;  %s10379_s11 = smov 12  }
0x2382   : > { %v5406_v3 = vpop.xlane.xlu1 %5405 }
0x2383   : > { %9658 = vrcp.f32 %v5406_v3 }
0x2386   : > { %v5410_v4 = vpop.permute.xlu1 %5409 }
0x2387   : > { %8949 = vmatpush3.msra.mxu1 %v5410_v4 }
0x2388   : > { %8958 = vmatprep.subr.mxu1 %v10365_v1 }
0x238d   : > { %v9659_v17 = vpop.eup %9658 }
0x238e   : > { %v5408_v7 = vmul.f32 %v9659_v17, %v9657_v2 }
0x2390   : > { %8951 = vmatmul.mubr.msk.f32.vlgmr.msra.gmra.mrb[38].mxu1 %vm1866_vm2, %v5408_v7 }
0x2391   : > { %8959 = vmatpush3.xpose.msk.msra.mxu1 %vm1866_vm2, %v5562_v5  ;;  %8960 = vmatprep.mubr.msk.f32.mxu1 %vm10364_vm0, %v10365_v1 }
0x2392   : > { %8968 = vmatprep.subr.mxu1 %v10365_v1 }
0x2394   : > { %8961 = vmatmul.mubr.msk.f32.vlgmr.msra.gmra.mrb[40].mxu1 %vm1866_vm2, %v5560_v10 }
0x2395   : > { %8969 = vmatpush3.msra.mxu1 %v11271_v30  ;;  %8970 = vmatprep.mubr.msk.f32.mxu1 %vm10364_vm0, %v10365_v1 }
0x2396   : > { %8978 = vmatprep.subr.mxu1 %v10365_v1 }
0x2463   : > { %v5481_v46 = vpop.f32.mrb[38].mxu1 }
0x2464   : > { %v8952_v14 = vpop.f32.mrb[39].mxu1  ;;  %8956 = vmatmul.mubr.msk.f32.vlgmr.msra.gmra.mrb[42].mxu0 %vm1866_vm2, %v5481_v46 }
0x2465   : > { %8965 = vmatprep.mubr.msk.f32.mxu0 %vm10364_vm0, %v10365_v1 }
0x2467   : > { %v5633_v16 = vpop.f32.mrb[40].mxu1 }
0x2468   : > { %v5637_v18 = vmul.f32 0.35355338, %v5633_v16  ;;  %v8962_v28 = vpop.f32.mrb[41].mxu1 }
0x246a   : > { %v5638_v26 = vadd.f32 %v5637_v18, %v11228_v53 }
0x246c   : > { %v5639_v36 = vsel %vm1866_vm2, %v5638_v26, -inf }
0x246d   : > { %5640 = vmax.xlane.f32.xlu1 %v5639_v36 }
0x247e   : > { %5802 = vrot.lane.b32.xlu1 %v11487_v32, %s11925_s7 }
0x2482   : > { %5800 = vrot.lane.b32.xlu1 %v11487_v32, %s11926_s28 }
0x24fa   : > { %v5641_v30 = vpop.xlane.xlu1 %5640 }
0x24fb   : > { %v5642_v40 = vsub.f32 %v5638_v26, %v5641_v30 }
0x24fd   : > { %v5643_v43 = vmul.f32 1.442695, %v5642_v40 }
0x24fe   : > { %v5803_v60 = vpop.permute.xlu1 %5802 }
0x24ff   : > { %9660 = vpow2.f32 %v5643_v43 }
0x2502   : > { %v5801_v63 = vpop.permute.xlu1 %5800 }
0x2509   : > { %v9661_v48 = vpop.eup %9660 }
0x250a   : > { %v5645_v51 = vsel %vm1866_vm2, %v9661_v48, 0.0 }
0x250b   : > { %5646 = vadd.xlane.f32.xlu0 %v5645_v51 }
0x2521   : > { %5650 = vrot.lane.b32.xlu0 %v11487_v32, %s11927_s9  ;;  %s11950_s9 = sld [smem:[#allocation78_spill]] }
0x2537   : > { %v5554_v42 = vpop.f32.mrb[42].mxu0 }
0x2538   : > { %v8957_v52 = vpop.f32.mrb[43].mxu0  ;;  %v5558_v28 = vadd.f32 %v11288_v50, %v5554_v42 }
0x2598   : > { %v5647_v54 = vpop.xlane.xlu0 %5646 }
0x2599   : > { %9662 = vrcp.f32 %v5647_v54 }
0x259c   : > { %v5651_v27 = vpop.permute.xlu0 %5650 }
0x259d   : > { %8964 = vmatpush3.msra.mxu0 %v5651_v27 }
0x259e   : > { %8973 = vmatprep.subr.mxu0 %v10365_v1 }
0x25a3   : > { %v9663_v59 = vpop.eup %9662 }
0x25a4   : > { %v5649_v62 = vmul.f32 %v9663_v59, %v9661_v48 }
0x25a6   : > { %8966 = vmatmul.mubr.msk.f32.vlgmr.msra.gmra.mrb[44].mxu0 %vm1866_vm2, %v5649_v62 }
0x25a7   : > { %8974 = vmatpush3.xpose.msk.msra.mxu0 %vm1866_vm2, %v5803_v60  ;;  %8975 = vmatprep.mubr.msk.f32.mxu0 %vm10364_vm0, %v10365_v1 }
0x25a8   : > { %8983 = vmatprep.subr.mxu0 %v10365_v1 }
0x25aa   : > { %8976 = vmatmul.mubr.msk.f32.vlgmr.msra.gmra.mrb[46].mxu0 %vm1866_vm2, %v5801_v63 }
0x25ab   : > { %8984 = vmatpush3.msra.mxu0 %v11300_v61  ;;  %8985 = vmatprep.mubr.msk.f32.mxu0 %vm10364_vm0, %v10365_v1 }
0x25ac   : > { %8993 = vmatprep.subr.mxu0 %v10365_v1 }
0x2679   : > { %v5722_v2 = vpop.f32.mrb[44].mxu0 }
0x267a   : > { %v8967_v6 = vpop.f32.mrb[45].mxu0  ;;  %8971 = vmatmul.mubr.msk.f32.vlgmr.msra.gmra.mrb[42].mxu1 %vm1866_vm2, %v5722_v2 }
0x267b   : > { %8980 = vmatprep.mubr.msk.f32.mxu1 %vm10364_vm0, %v10365_v1 }
0x267d   : > { %v5874_v3 = vpop.f32.mrb[46].mxu0 }
0x267e   : > { %v5878_v4 = vmul.f32 0.35355338, %v5874_v3  ;;  %v8977_v17 = vpop.f32.mrb[47].mxu0 }
0x2680   : > { %v5879_v5 = vadd.f32 %v5878_v4, %v11228_v53 }
0x2682   : > { %v5880_v7 = vsel %vm1866_vm2, %v5879_v5, -inf }
0x2683   : > { %5881 = vmax.xlane.f32.xlu0 %v5880_v7 }
0x2699   : > { %5891 = vrot.lane.b32.xlu0 %v11487_v32, %s11928_s10  ;;  %s11948_s10 = sld [smem:[#allocation73_spill]] }
0x269d   : > { %6041 = vrot.lane.b32.xlu0 %v11487_v32, %s11929_s3 }
0x2710   : > { %v5882_v61 = vpop.xlane.xlu0 %5881 }
0x2711   : > { %v5883_v10 = vsub.f32 %v5879_v5, %v5882_v61 }
0x2713   : > { %v5884_v46 = vmul.f32 1.442695, %v5883_v10 }
0x2714   : > { %v5892_v14 = vpop.permute.xlu0 %5891 }
0x2715   : > { %9664 = vpow2.f32 %v5884_v46  ;;  %8979 = vmatpush3.msra.mxu1 %v5892_v14 }
0x2716   : > { %8988 = vmatprep.subr.mxu1 %v10365_v1 }
0x2718   : > { %v6042_v52 = vpop.permute.xlu0 %6041 }
0x271f   : > { %v9665_v16 = vpop.eup %9664 }
0x2720   : > { %v5886_v18 = vsel %vm1866_vm2, %v9665_v16, 0.0 }
0x2721   : > { %5887 = vadd.xlane.f32.xlu1 %v5886_v18 }
0x2732   : > { %6043 = vrot.lane.b32.xlu1 %v11487_v32, %s11930_s4 }
0x274d   : > { %v5795_v26 = vpop.f32.mrb[42].mxu1 }
0x274e   : > { %v5799_v36 = vadd.f32 %v5795_v26, %v5558_v28  ;;  %v8972_v30 = vpop.f32.mrb[43].mxu1 }
0x27ae   : > { %v5888_v40 = vpop.xlane.xlu1 %5887 }
0x27af   : > { %9666 = vrcp.f32 %v5888_v40 }
0x27b2   : > { %v6044_v51 = vpop.permute.xlu1 %6043 }
0x27b9   : > { %v9667_v43 = vpop.eup %9666 }
0x27ba   : > { %v5890_v48 = vmul.f32 %v9667_v43, %v9665_v16 }
0x27bc   : > { %8981 = vmatmul.mubr.msk.f32.vlgmr.msra.gmra.mrb[44].mxu1 %vm1866_vm2, %v5890_v48 }
0x27bd   : > { %8989 = vmatpush3.xpose.msk.msra.mxu1 %vm1866_vm2, %v6044_v51  ;;  %8990 = vmatprep.mubr.msk.f32.mxu1 %vm10364_vm0, %v10365_v1  ;;  %v9234_v51 = vpack.c.bf16 %v11318_v21, %v11315_v20 }
0x27be   : > { %8998 = vmatprep.subr.mxu1 %v10365_v1 }
0x27c0   : > { %8991 = vmatmul.mubr.msk.f32.vlgmr.msra.gmra.mrb[46].mxu1 %vm1866_vm2, %v6042_v52 }
0x27c1   : > { %8999 = vmatpush3.msra.mxu1 %v11345_v37  ;;  %9000 = vmatprep.mubr.msk.f32.mxu1 %vm10364_vm0, %v10365_v1 }
0x27c2   : > { %9239 = vmatprep.subr.bf16.mxu1 %v10363_v0 }
0x288f   : > { %v5963_v50 = vpop.f32.mrb[44].mxu1 }
0x2890   : > { %v8982_v42 = vpop.f32.mrb[45].mxu1  ;;  %8986 = vmatmul.mubr.msk.f32.vlgmr.msra.gmra.mrb[48].mxu0 %vm1866_vm2, %v5963_v50 }
0x2891   : > { %8995 = vmatprep.mubr.msk.f32.mxu0 %vm10364_vm0, %v10365_v1 }
0x2893   : > { %v6115_v54 = vpop.f32.mrb[46].mxu1 }
0x2894   : > { %v6119_v27 = vmul.f32 0.35355338, %v6115_v54  ;;  %v8992_v59 = vpop.f32.mrb[47].mxu1 }
0x2896   : > { %v6120_v60 = vadd.f32 %v6119_v27, %v11228_v53 }
0x2898   : > { %v6121_v62 = vsel %vm1866_vm2, %v6120_v60, -inf }
0x2899   : > { %6122 = vmax.xlane.f32.xlu1 %v6121_v62 }
0x2926   : > { %v6123_v37 = vpop.xlane.xlu1 %6122 }
0x2927   : > { %v6124_v63 = vsub.f32 %v6120_v60, %v6123_v37 }
0x2929   : > { %v6125_v2 = vmul.f32 1.442695, %v6124_v63 }
0x292b   : > { %9668 = vpow2.f32 %v6125_v2 }
0x2935   : > { %v9669_v6 = vpop.eup %9668 }
0x2936   : > { %v6127_v3 = vsel %vm1866_vm2, %v9669_v6, 0.0 }
0x2937   : > { %6128 = vadd.xlane.f32.xlu0 %v6127_v3 }
0x294d   : > { %6132 = vrot.lane.b32.xlu0 %v11487_v32, %s11933_s14  ;;  %s11946_s14 = sld [smem:[#allocation71_spill]] }
0x2951   : > { %9600 = vrot.lane.b32.xlu0 %v11336_v25, %s11943_s5  ;;  %v9237_v25 = vpack.c.bf16 %v11330_v24, %v11327_v23 }
0x2955   : > { %6384 = vrot.lane.b32.xlu0 %v11342_v35, %s11943_s5 }
0x2963   : > { %v6036_v4 = vpop.f32.mrb[48].mxu0 }
0x2964   : > { %v6040_v17 = vadd.f32 %v6036_v4, %v5799_v36  ;;  %v8987_v5 = vpop.f32.mrb[49].mxu0 }
0x29c4   : > { %v6129_v7 = vpop.xlane.xlu0 %6128 }
0x29c5   : > { %9670 = vrcp.f32 %v6129_v7 }
0x29c8   : > { %v6133_v53 = vpop.permute.xlu0 %6132 }
0x29c9   : > { %8994 = vmatpush3.msra.mxu0 %v6133_v53 }
0x29ca   : > { %9233 = vmatprep.subr.bf16.mxu0 %v10363_v0 }
0x29cc   : > { %v9601_v42 = vpop.permute.xlu0 %9600 }
0x29cd   : > { %v9603_v59 = vunpack.i.h.bf16 %v9601_v42  ;;  %v9602_v62 = vunpack.i.l.bf16 %v9601_v42 }
0x29cf   : > { %v9671_v61 = vpop.eup %9670  ;;  %v9243_v21 = vpack.c.bf16 %v9603_v59, %v9602_v62 }
0x29d0   : > { %v6131_v10 = vmul.f32 %v9671_v61, %v9669_v6  ;;  %v6385_v2 = vpop.permute.xlu0 %6384 }
0x29d2   : > { %8996 = vmatmul.mubr.msk.f32.vlgmr.msra.gmra.mrb[50].mxu0 %vm1866_vm2, %v6131_v10 }
0x29d3   : > { %9011 = vmatprep.mubr.msk.f32.mxu0 %vm10364_vm0, %v10365_v1  ;;  %9235 = vmatpush3.bf16.msra.mxu0 %v9234_v51 }
0x29d4   : > { %9236 = vmatprep.subr.bf16.mxu0 %v10363_v0 }
0x29d7   : > { %9238 = vmatpush3.bf16.msra.mxu0 %v9237_v25 }
0x29d8   : > { %9025 = vmatprep.subr.mxu0 %v10365_v1 }
0x2aa5   : > { %v6204_v46 = vpop.f32.mrb[50].mxu0 }
0x2aa6   : > { %v8997_v14 = vpop.f32.mrb[51].mxu0  ;;  %9001 = vmatmul.mubr.msk.f32.vlgmr.msra.gmra.mrb[48].mxu1 %vm1866_vm2, %v6204_v46 }
0x2aa7   : > { %9022 = vmatprep.mubr.msk.f32.mxu1 %vm10364_vm0, %v10365_v1 }
0x2b79   : > { %v6277_v32 = vpop.f32.mrb[48].mxu1 }
0x2b7a   : > { %v6281_v16 = vadd.f32 %v6277_v32, %v6040_v17  ;;  %v9002_v18 = vpop.f32.mrb[49].mxu1 }
0x2b7c   : > { %v6282_v28 = vadd.f32 %v6281_v16, %v11480_v41 }
0x2b7e   : > { %v6283_v26 = vsel %vm1601_vm1, %v6282_v28, 0.0 }
0x2b7f   : > { %6284 = vadd.xlane.f32.xlu1 %v6283_v26 }
0x2c0c   : > { %v6285_v36 = vpop.xlane.xlu1 %6284 }
0x2c0d   : > { %v6286_v30 = vmul.f32 0.03125, %v6285_v36 }
0x2c0f   : > { %v6287_v40 = vsub.f32 %v6282_v28, %v6286_v30 }
0x2c11   : > { %v6288_v43 = vmul.f32 %v6287_v40, %v6287_v40 }
0x2c13   : > { %v6289_v48 = vsel %vm1601_vm1, %v6288_v43, 0.0 }
0x2c14   : > { %6290 = vadd.xlane.f32.xlu1 %v6289_v48 }
0x2c25   : > { %9595 = vrot.lane.b32.xlu1 %v11322_v22, %s11943_s5 }
0x2ca1   : > { %v6291_v52 = vpop.xlane.xlu1 %6290 }
0x2ca2   : > { %v6292_v50 = vmul.f32 0.03125, %v6291_v52 }
0x2ca4   : > { %v6293_v54 = vadd.f32 1e-05, %v6292_v50 }
0x2ca5   : > { %v9596_v27 = vpop.permute.xlu1 %9595 }
0x2ca6   : > { %9672 = vrsqrt.f32 %v6293_v54  ;;  %v9598_v22 = vunpack.i.h.bf16 %v9596_v27  ;;  %v9597_v60 = vunpack.i.l.bf16 %v9596_v27 }
0x2ca8   : > { %v9240_v20 = vpack.c.bf16 %v9598_v22, %v9597_v60 }
0x2caa   : > { %9241 = vmatpush3.bf16.msra.mxu1 %v9240_v20 }
0x2cab   : > { %9242 = vmatprep.subr.bf16.mxu1 %v10363_v0 }
0x2cae   : > { %9244 = vmatpush3.bf16.msra.mxu1 %v9243_v21 }
0x2caf   : > { %9030 = vmatprep.subr.mxu1 %v10365_v1 }
0x2cb0   : > { %v9673_v23 = vpop.eup %9672 }
0x2cb1   : > { %v6295_v24 = vmul.f32 %v9673_v23, %v6287_v40  ;;  %9023 = vmatmul.mubr.msk.f32.vlgmr.msra.gmra.mrb[50].mxu1 %vm1601_vm1, %v11480_v41 }
0x2cb2   : > { %9032 = vmatprep.mubr.msk.f32.mxu1 %vm10364_vm0, %v10365_v1 }
0x2cb3   : > { %v6296_v37 = vmul.f32 %v11398_v33, %v6295_v24 }
0x2cb5   : > { %v11604_v63 = vadd.f32 %v11402_v57, %v6296_v37 }
0x2cb7   : > { %9012 = vmatmul.mubr.msk.f32.vlgmr.msra.gmra.mrb[52].mxu0 %vm1601_vm1, %v11604_v63 }
0x2cb8   : > { %9027 = vmatprep.mubr.msk.f32.mxu0 %vm10364_vm0, %v10365_v1 }
0x2d84   : > { %v6453_v6 = vpop.f32.mrb[50].mxu1 }
0x2d85   : > { %v11610_v3 = vadd.f32 %v6453_v6, %v6385_v2  ;;  %v9024_v4 = vpop.f32.mrb[51].mxu1 }
0x2d87   : > { %9026 = vmatpush3.xpose.msk.msra.mxu0 %vm1866_vm2, %v11610_v3 }
0x2d88   : > { %9035 = vmatprep.subr.mxu0 %v10365_v1 }
0x2d8a   : > { %v6368_v33 = vpop.f32.mrb[52].mxu0 }
0x2d8b   : > { %v11616_v57 = vadd.f32 %v11342_v35, %v6368_v33  ;;  %v9013_v41 = vpop.f32.mrb[53].mxu0 }
0x2d8d   : > { %9028 = vmatmul.mubr.msk.f32.vlgmr.msra.gmra.mrb[54].mxu0 %vm1866_vm2, %v11616_v57 }
0x2d8e   : > { %9036 = vmatpush3.msra.mxu0 %v11369_v8  ;;  %9037 = vmatprep.mubr.msk.f32.mxu0 %vm10364_vm0, %v10365_v1 }
0x2d8f   : > { %9045 = vmatprep.subr.mxu0 %v10365_v1 }
0x2e60   : > { %v6536_v17 = vpop.f32.mrb[54].mxu0 }
0x2e61   : > { %v6540_v5 = vmul.f32 0.35355338, %v6536_v17  ;;  %v9029_v7 = vpop.f32.mrb[55].mxu0 }
0x2e62   : > { %v6461_v7 = vrot.slane %v11396_v29, %v5011_v55 }
0x2e63   : > { %v6541_v53 = vsel %vm1866_vm2, %v6540_v5, -inf }
0x2e64   : > { %6542 = vmax.xlane.f32.xlu1 %v6541_v53 }
0x2e75   : > { %6704 = vrot.lane.b32.xlu1 %v11610_v3, %s11945_s0 }
0x2e79   : > { %6702 = vrot.lane.b32.xlu1 %v11616_v57, %s11945_s0 }
0x2ef1   : > { %v6543_v35 = vpop.xlane.xlu1 %6542 }
0x2ef2   : > { %v6544_v61 = vsub.f32 %v6540_v5, %v6543_v35 }
0x2ef4   : > { %v6545_v8 = vmul.f32 1.442695, %v6544_v61 }
0x2ef5   : > { %v6705_v18 = vpop.permute.xlu1 %6704 }
0x2ef6   : > { %9674 = vpow2.f32 %v6545_v8 }
0x2ef9   : > { %v6703_v26 = vpop.permute.xlu1 %6702 }
0x2f00   : > { %v9675_v10 = vpop.eup %9674 }
0x2f01   : > { %v6547_v46 = vsel %vm1866_vm2, %v9675_v10, 0.0 }
0x2f02   : > { %6548 = vadd.xlane.f32.xlu0 %v6547_v46 }
0x2f18   : > { %6552 = vrot.lane.b32.xlu0 %v11610_v3, %s11943_s5  ;;  %s11952_s5 = sld [smem:[#allocation76_spill]] }
0x2f8f   : > { %v6549_v14 = vpop.xlane.xlu0 %6548 }
0x2f90   : > { %9676 = vrcp.f32 %v6549_v14 }
0x2f93   : > { %v6553_v32 = vpop.permute.xlu0 %6552 }
0x2f94   : > { %9031 = vmatpush3.msra.mxu1 %v6553_v32 }
0x2f95   : > { %9040 = vmatprep.subr.mxu1 %v10365_v1 }
0x2f9a   : > { %v9677_v16 = vpop.eup %9676 }
0x2f9b   : > { %v6551_v28 = vmul.f32 %v9677_v16, %v9675_v10 }
0x2f9d   : > { %9033 = vmatmul.mubr.msk.f32.vlgmr.msra.gmra.mrb[52].mxu1 %vm1866_vm2, %v6551_v28 }
0x2f9e   : > { %9041 = vmatpush3.xpose.msk.msra.mxu1 %vm1866_vm2, %v6705_v18  ;;  %9042 = vmatprep.mubr.msk.f32.mxu1 %vm10364_vm0, %v10365_v1 }
0x2f9f   : > { %9050 = vmatprep.subr.mxu1 %v10365_v1 }
0x2fa1   : > { %9043 = vmatmul.mubr.msk.f32.vlgmr.msra.gmra.mrb[54].mxu1 %vm1866_vm2, %v6703_v26 }
0x2fa2   : > { %9051 = vmatpush3.msra.mxu1 %v11372_v9  ;;  %9052 = vmatprep.mubr.msk.f32.mxu1 %vm10364_vm0, %v10365_v1 }
0x2fa3   : > { %9060 = vmatprep.subr.mxu1 %v10365_v1 }
0x3070   : > { %v6624_v36 = vpop.f32.mrb[52].mxu1 }
0x3071   : > { %v9034_v30 = vpop.f32.mrb[53].mxu1  ;;  %9038 = vmatmul.mubr.msk.f32.vlgmr.msra.gmra.mrb[56].mxu0 %vm1866_vm2, %v6624_v36 }
0x3072   : > { %9047 = vmatprep.mubr.msk.f32.mxu0 %vm10364_vm0, %v10365_v1 }
0x3074   : > { %v6776_v40 = vpop.f32.mrb[54].mxu1 }
0x3075   : > { %v6780_v43 = vmul.f32 0.35355338, %v6776_v40  ;;  %v9044_v48 = vpop.f32.mrb[55].mxu1 }
0x3077   : > { %v6781_v51 = vsel %vm1866_vm2, %v6780_v43, -inf }
0x3078   : > { %6782 = vmax.xlane.f32.xlu0 %v6781_v51 }
0x308e   : > { %6792 = vrot.lane.b32.xlu0 %v11610_v3, %s11944_s12 }
0x3092   : > { %6942 = vrot.lane.b32.xlu0 %v11616_v57, %s11926_s28 }
0x3105   : > { %v6783_v9 = vpop.xlane.xlu0 %6782 }
0x3106   : > { %v6784_v25 = vsub.f32 %v6780_v43, %v6783_v9 }
0x3108   : > { %v6785_v52 = vmul.f32 1.442695, %v6784_v25 }
0x3109   : > { %v6793_v50 = vpop.permute.xlu0 %6792 }
0x310a   : > { %9678 = vpow2.f32 %v6785_v52  ;;  %9046 = vmatpush3.msra.mxu0 %v6793_v50 }
0x310b   : > { %9055 = vmatprep.subr.mxu0 %v10365_v1 }
0x310d   : > { %v6943_v21 = vpop.permute.xlu0 %6942 }
0x3114   : > { %v9679_v42 = vpop.eup %9678 }
0x3115   : > { %v6787_v54 = vsel %vm1866_vm2, %v9679_v42, 0.0 }
0x3116   : > { %6788 = vadd.xlane.f32.xlu1 %v6787_v54 }
0x3127   : > { %6944 = vrot.lane.b32.xlu1 %v11610_v3, %s11926_s28  ;;  %s11951_s28 = sld [smem:[#allocation75_spill]] }
0x3144   : > { %v6697_v27 = vpop.f32.mrb[56].mxu0 }
0x3145   : > { %v9039_v59 = vpop.f32.mrb[57].mxu0  ;;  %v6701_v53 = vadd.f32 %v6697_v27, %v6461_v7 }
0x31a3   : > { %v6789_v22 = vpop.xlane.xlu1 %6788 }
0x31a4   : > { %9680 = vrcp.f32 %v6789_v22 }
0x31a7   : > { %v6945_v20 = vpop.permute.xlu1 %6944 }
0x31ae   : > { %v9681_v60 = vpop.eup %9680 }
0x31af   : > { %v6791_v62 = vmul.f32 %v9681_v60, %v9679_v42 }
0x31b1   : > { %9048 = vmatmul.mubr.msk.f32.vlgmr.msra.gmra.mrb[58].mxu0 %vm1866_vm2, %v6791_v62 }
0x31b2   : > { %9056 = vmatpush3.xpose.msk.msra.mxu0 %vm1866_vm2, %v6945_v20  ;;  %9057 = vmatprep.mubr.msk.f32.mxu0 %vm10364_vm0, %v10365_v1 }
0x31b3   : > { %9065 = vmatprep.subr.mxu0 %v10365_v1 }
0x31b5   : > { %9058 = vmatmul.mubr.msk.f32.vlgmr.msra.gmra.mrb[60].mxu0 %vm1866_vm2, %v6943_v21 }
0x31b6   : > { %9066 = vmatpush3.msra.mxu0 %v11377_v11  ;;  %9067 = vmatprep.mubr.msk.f32.mxu0 %vm10364_vm0, %v10365_v1 }
0x31b7   : > { %9075 = vmatprep.subr.mxu0 %v10365_v1 }
0x3284   : > { %v6864_v23 = vpop.f32.mrb[58].mxu0 }
0x3285   : > { %v9049_v24 = vpop.f32.mrb[59].mxu0  ;;  %9053 = vmatmul.mubr.msk.f32.vlgmr.msra.gmra.mrb[56].mxu1 %vm1866_vm2, %v6864_v23 }
0x3286   : > { %9062 = vmatprep.mubr.msk.f32.mxu1 %vm10364_vm0, %v10365_v1 }
0x3288   : > { %v7016_v37 = vpop.f32.mrb[60].mxu0 }
0x3289   : > { %v7020_v2 = vmul.f32 0.35355338, %v7016_v37  ;;  %v9059_v6 = vpop.f32.mrb[61].mxu0 }
0x328b   : > { %v7021_v4 = vsel %vm1866_vm2, %v7020_v2, -inf }
0x328c   : > { %7022 = vmax.xlane.f32.xlu1 %v7021_v4 }
0x329d   : > { %7184 = vrot.lane.b32.xlu1 %v11610_v3, %s11929_s3 }
0x32a1   : > { %7182 = vrot.lane.b32.xlu1 %v11616_v57, %s11929_s3  ;;  %s11949_s3 = sld [smem:[#allocation72_spill]] }
0x3319   : > { %v7023_v11 = vpop.xlane.xlu1 %7022 }
0x331a   : > { %v7024_v33 = vsub.f32 %v7020_v2, %v7023_v11 }
0x331c   : > { %v7025_v41 = vmul.f32 1.442695, %v7024_v33 }
0x331d   : > { %v7185_v14 = vpop.permute.xlu1 %7184 }
0x331e   : > { %9682 = vpow2.f32 %v7025_v41 }
0x3321   : > { %v7183_v49 = vpop.permute.xlu1 %7182 }
0x3328   : > { %v9683_v17 = vpop.eup %9682 }
0x3329   : > { %v7027_v5 = vsel %vm1866_vm2, %v9683_v17, 0.0 }
0x332a   : > { %7028 = vadd.xlane.f32.xlu0 %v7027_v5 }
0x3340   : > { %7032 = vrot.lane.b32.xlu0 %v11610_v3, %s11925_s7  ;;  %s1587_s7 = scalar_lea.vmem %s11950_s9, %s8302_s13 }
0x3358   : > { %v6937_v35 = vpop.f32.mrb[56].mxu1 }
0x3359   : > { %v6941_v61 = vadd.f32 %v6937_v35, %v6701_v53  ;;  %v9054_v8 = vpop.f32.mrb[57].mxu1 }
0x335a   : > { %v7602_v8 = vld [vmem:[%s11946_s14 + $0x8] sm:$0xff] }
0x33b7   : > { %v7029_v57 = vpop.xlane.xlu0 %7028 }
0x33b8   : > { %9684 = vrcp.f32 %v7029_v57 }
0x33bb   : > { %v7033_v10 = vpop.permute.xlu0 %7032 }
0x33bc   : > { %9061 = vmatpush3.msra.mxu1 %v7033_v10  ;;  %v7604_v10 = vld [vmem:[%s11946_s14 + $0x18] sm:$0xff] }
0x33bd   : > { %9070 = vmatprep.subr.mxu1 %v10365_v1 }
0x33c2   : > { %v9685_v46 = vpop.eup %9684 }
0x33c3   : > { %v7031_v32 = vmul.f32 %v9685_v46, %v9683_v17 }
0x33c5   : > { %9063 = vmatmul.mubr.msk.f32.vlgmr.msra.gmra.mrb[58].mxu1 %vm1866_vm2, %v7031_v32 }
0x33c6   : > { %9071 = vmatpush3.xpose.msk.msra.mxu1 %vm1866_vm2, %v7185_v14  ;;  %9072 = vmatprep.mubr.msk.f32.mxu1 %vm10364_vm0, %v10365_v1 }
0x33c7   : > { %9080 = vmatprep.subr.mxu1 %v10365_v1 }
0x33c9   : > { %9073 = vmatmul.mubr.msk.f32.vlgmr.msra.gmra.mrb[60].mxu1 %vm1866_vm2, %v7183_v49 }
0x33ca   : > { %9081 = vmatpush3.msra.mxu1 %v11380_v12  ;;  %9082 = vmatprep.mubr.msk.f32.mxu1 %vm10364_vm0, %v10365_v1 }
0x33cb   : > { %9251 = vmatprep.subr.bf16.mxu1 %v10363_v0 }
0x3498   : > { %v7104_v29 = vpop.f32.mrb[58].mxu1 }
0x3499   : > { %v9064_v55 = vpop.f32.mrb[59].mxu1  ;;  %9068 = vmatmul.mubr.msk.f32.vlgmr.msra.gmra.mrb[62].mxu0 %vm1866_vm2, %v7104_v29 }
0x349a   : > { %9077 = vmatprep.mubr.msk.f32.mxu0 %vm10364_vm0, %v10365_v1 }
0x349c   : > { %v7256_v16 = vpop.f32.mrb[60].mxu1 }
0x349d   : > { %v7260_v18 = vmul.f32 0.35355338, %v7256_v16  ;;  %v9074_v28 = vpop.f32.mrb[61].mxu1 }
0x349f   : > { %v7261_v26 = vsel %vm1866_vm2, %v7260_v18, -inf }
0x34a0   : > { %7262 = vmax.xlane.f32.xlu0 %v7261_v26 }
0x34b6   : > { %7272 = vrot.lane.b32.xlu0 %v11610_v3, %s11930_s4  ;;  %s11947_s4 = sld [smem:[#allocation74_spill]] }
0x34bc   : > { %v7687_v16 = vld [vmem:[%s11947_s4] sm:$0xff] }
0x352d   : > { %v7263_v12 = vpop.xlane.xlu0 %7262 }
0x352e   : > { %v7264_v36 = vsub.f32 %v7260_v18, %v7263_v12  ;;  %v7688_v18 = vld [vmem:[%s11947_s4 + $0x8] sm:$0xff] }
0x352f   : > { %v9270_v26 = vpack.c.bf16 %v7688_v18, %v7687_v16 }
0x3530   : > { %v7265_v30 = vmul.f32 1.442695, %v7264_v36  ;;  %v7689_v36 = vld [vmem:[%s11947_s4 + $0x10] sm:$0xff] }
0x3531   : > { %v7273_v40 = vpop.permute.xlu0 %7272 }
0x3532   : > { %9686 = vpow2.f32 %v7265_v30  ;;  %9076 = vmatpush3.msra.mxu0 %v7273_v40  ;;  %v7690_v30 = vld [vmem:[%s11947_s4 + $0x18] sm:$0xff] }
0x3533   : > { %9245 = vmatprep.subr.bf16.mxu0 %v10363_v0  ;;  %v9273_v40 = vpack.c.bf16 %v7690_v30, %v7689_v36 }
0x353c   : > { %v9687_v43 = vpop.eup %9686 }
0x353d   : > { %v7267_v48 = vsel %vm1866_vm2, %v9687_v43, 0.0 }
0x353e   : > { %7268 = vadd.xlane.f32.xlu1 %v7267_v48  ;;  %v7847_v48 = vld [vmem:[%s10593_s8] sm:$0xff] }
0x356c   : > { %v7177_v51 = vpop.f32.mrb[62].mxu0 }
0x356d   : > { %v7181_v9 = vadd.f32 %v7177_v51, %v6941_v61  ;;  %v9069_v25 = vpop.f32.mrb[63].mxu0  ;;  %v7601_v61 = vld [vmem:[%s11946_s14] sm:$0xff]  ;;  %v7848_v51 = vld [vmem:[%s10593_s8 + $0x8] sm:$0xff] }
0x356e   : > { %v9264_v57 = vpack.c.bf16 %v7602_v8, %v7601_v61 }
0x35cb   : > { %v7269_v52 = vpop.xlane.xlu1 %7268 }
0x35cc   : > { %9688 = vrcp.f32 %v7269_v52  ;;  %v9280_v52 = vpack.c.bf16 %v7848_v51, %v7847_v48 }
0x35d6   : > { %v9689_v50 = vpop.eup %9688 }
0x35d7   : > { %v7271_v42 = vmul.f32 %v9689_v50, %v9687_v43 }
0x35d9   : > { %9078 = vmatmul.mubr.msk.f32.vlgmr.msra.gmra.mrb[64].mxu0 %vm1866_vm2, %v7271_v42 }
0x35da   : > { %9247 = vmatpush3.bf16.msra.mxu0 %v11412_v13  ;;  %9093 = vmatprep.mubr.msk.f32.mxu0 %vm10364_vm0, %v10365_v1 }
0x35db   : > { %9248 = vmatprep.subr.bf16.mxu0 %v10363_v0 }
0x35de   : > { %9250 = vmatpush3.bf16.msra.mxu0 %v11418_v15 }
0x35df   : > { %9263 = vmatprep.subr.bf16.mxu0 %v10363_v0 }
0x36ac   : > { %v7344_v3 = vpop.f32.mrb[64].mxu0 }
0x36ad   : > { %v9079_v54 = vpop.f32.mrb[65].mxu0  ;;  %9083 = vmatmul.mubr.msk.f32.vlgmr.msra.gmra.mrb[62].mxu1 %vm1866_vm2, %v7344_v3 }
0x36ae   : > { %9253 = vmatpush3.bf16.msra.mxu1 %v11425_v19  ;;  %9112 = vmatprep.mubr.msk.f32.mxu1 %vm10364_vm0, %v10365_v1 }
0x36af   : > { %9254 = vmatprep.subr.bf16.mxu1 %v10363_v0 }
0x36b2   : > { %9256 = vmatpush3.bf16.msra.mxu1 %v11429_v34 }
0x36b3   : > { %9257 = vmatprep.subr.bf16.mxu1 %v10363_v0 }
0x36b6   : > { %9259 = vmatpush3.bf16.msra.mxu1 %v11435_v38 }
0x36b7   : > { %9260 = vmatprep.subr.bf16.mxu1 %v10363_v0 }
0x36ba   : > { %9262 = vmatpush3.bf16.msra.mxu1 %v11455_v56 }
0x36bb   : > { %9275 = vmatprep.subr.bf16.mxu1 %v10363_v0 }
0x3780   : > { %v7417_v13 = vpop.f32.mrb[62].mxu1 }
0x3781   : > { %v7421_v15 = vadd.f32 %v7417_v13, %v7181_v9  ;;  %v9084_v19 = vpop.f32.mrb[63].mxu1  ;;  %v8419_v9 = vld [vmem:[%s11949_s3] ss:$0 sm:$0xff]  ;;  %v7849_v13 = vld [vmem:[%s10593_s8 + $0x10] sm:$0xff] }
0x3783   : > { %v7422_v27 = vadd.f32 %v7421_v15, %v11604_v63  ;;  %v7850_v15 = vld [vmem:[%s10593_s8 + $0x18] sm:$0xff] }
0x3784   : > { %v9283_v19 = vpack.c.bf16 %v7850_v15, %v7849_v13 }
0x3785   : > { %v7423_v59 = vsel %vm1601_vm1, %v7422_v27, 0.0 }
0x3786   : > { %7424 = vadd.xlane.f32.xlu1 %v7423_v59  ;;  %v8424_v59 = vld [vmem:[%s11951_s28] ss:$0 sm:$0xff] }
0x3813   : > { %v7425_v22 = vpop.xlane.xlu1 %7424 }
0x3814   : > { %v7426_v34 = vmul.f32 0.03125, %v7425_v22 }
0x3816   : > { %v7427_v60 = vsub.f32 %v7422_v27, %v7426_v34 }
0x3818   : > { %v7428_v62 = vmul.f32 %v7427_v60, %v7427_v60 }
0x381a   : > { %v7429_v38 = vsel %vm1601_vm1, %v7428_v62, 0.0  ;;  %v8425_v62 = vld [vmem:[%s11952_s5] ss:$0 sm:$0xff] }
0x381b   : > { %7430 = vadd.xlane.f32.xlu1 %v7429_v38 }
0x38a8   : > { %v7431_v20 = vpop.xlane.xlu1 %7430 }
0x38a9   : > { %v7432_v21 = vmul.f32 0.03125, %v7431_v20 }
0x38ab   : > { %v7433_v56 = vadd.f32 1e-05, %v7432_v21 }
0x38ad   : > { %9690 = vrsqrt.f32 %v7433_v56 }
0x38b7   : > { %v9691_v23 = vpop.eup %9690 }
0x38b8   : > { %v7435_v24 = vmul.f32 %v9691_v23, %v7427_v60 }
0x38ba   : > { %v7436_v37 = vmul.f32 %v11440_v45, %v7435_v24 }
0x38bc   : > { %v7437_v63 = vadd.f32 %v11442_v47, %v7436_v37 }
0x38be   : > { %9094 = vmatmul.mubr.msk.f32.vlgmr.msra.gmra.mrb[66].mxu0 %vm1601_vm1, %v7437_v63 }
0x38bf   : > { %9123 = vmatprep.mubr.msk.f32.mxu0 %vm10364_vm0, %v10365_v1  ;;  %9265 = vmatpush3.bf16.msra.mxu0 %v9264_v57 }
0x38c0   : > { %9266 = vmatprep.subr.bf16.mxu0 %v10363_v0 }
0x3991   : > { %v7507_v2 = vpop.f32.mrb[66].mxu0 }
0x3992   : > { %v7508_v6 = vadd.f32 %v11460_v58, %v7507_v2  ;;  %v9095_v4 = vpop.f32.mrb[67].mxu0 }
0x3994   : > { %v7511_v11 = vmax.f32 %v7508_v6, 0.0 }
0x3996   : > { %9113 = vmatmul.mubr.msk.f32.vlgmr.msra.gmra.mrb[64].mxu1 %vm3610_vm8, %v7511_v11 }
0x3997   : > { %9141 = vmatprep.mubr.msk.f32.mxu1 %vm10364_vm0, %v10365_v1 }
0x3a69   : > { %v7581_v45 = vpop.f32.mrb[64].mxu1 }
0x3a6a   : > { %v7582_v47 = vadd.f32 %v11467_v31, %v7581_v45  ;;  %v9114_v33 = vpop.f32.mrb[65].mxu1  ;;  %v7603_v31 = vld [vmem:[%s11946_s14 + $0x10] sm:$0xff] }
0x3a6b   : > { %v9267_v46 = vpack.c.bf16 %v7604_v10, %v7603_v31 }
0x3a6c   : > { %v7585_v41 = vadd.f32 %v7582_v47, %v7437_v63 }
0x3a6d   : > { %9268 = vmatpush3.bf16.msra.mxu0 %v9267_v46 }
0x3a6e   : > { %v7586_v17 = vsel %vm1601_vm1, %v7585_v41, 0.0  ;;  %9269 = vmatprep.subr.bf16.mxu0 %v10363_v0 }
0x3a6f   : > { %7587 = vadd.xlane.f32.xlu1 %v7586_v17 }
0x3afc   : > { %v7588_v58 = vpop.xlane.xlu1 %7587 }
0x3afd   : > { %v7589_v5 = vmul.f32 0.03125, %v7588_v58 }
0x3aff   : > { %v7590_v7 = vsub.f32 %v7585_v41, %v7589_v5 }
0x3b01   : > { %v7591_v53 = vmul.f32 %v7590_v7, %v7590_v7 }
0x3b03   : > { %v7592_v35 = vsel %vm1601_vm1, %v7591_v53, 0.0 }
0x3b04   : > { %7593 = vadd.xlane.f32.xlu1 %v7592_v35 }
0x3b91   : > { %v7594_v14 = vpop.xlane.xlu1 %7593 }
0x3b92   : > { %v7595_v32 = vmul.f32 0.03125, %v7594_v14 }
0x3b94   : > { %v7596_v49 = vadd.f32 1e-05, %v7595_v32 }
0x3b96   : > { %9692 = vrsqrt.f32 %v7596_v49 }
0x3ba0   : > { %v9693_v29 = vpop.eup %9692 }
0x3ba1   : > { %v7598_v55 = vmul.f32 %v9693_v29, %v7590_v7 }
0x3ba3   : > { %v7599_v28 = vmul.f32 %v11473_v44, %v7598_v55  ;;  %v7685_v44 = vld [vmem:[%s11948_s10] sm:$0xff] }
0x3ba5   : > { %v7600_v12 = vadd.f32 %v11476_v39, %v7599_v28  ;;  %v7686_v39 = vld [vmem:[%s11948_s10 + $0x8] sm:$0xf] }
0x3ba6   : > { %v9276_v43 = vpack.c.bf16 %v7686_v39, %v7685_v44 }
0x3ba7   : > { %9124 = vmatmul.mubr.msk.f32.vlgmr.msra.gmra.mrb[68].mxu0 %vm1601_vm1, %v7600_v12 }
0x3ba8   : > { %9271 = vmatpush3.bf16.msra.mxu0 %v9270_v26  ;;  %9134 = vmatprep.mubr.msk.f32.mxu0 %vm10364_vm0, %v10365_v1 }
0x3ba9   : > { %9272 = vmatprep.subr.bf16.mxu0 %v10363_v0  ;;  %9278 = vmatpush3.bf16.msk.msra.mxu1 %vm9277_vm14, %v9276_v43 }
0x3baa   : > { %9279 = vmatprep.subr.bf16.mxu1 %v10363_v0 }
0x3bac   : > { %9274 = vmatpush3.bf16.msra.mxu0 %v9273_v40 }
0x3baf   : > { %9135 = vmatmul.mubr.msk.f32.vlgmr.msra.gmra.mrb[70].mxu0 %vm1601_vm1, %v7600_v12 }
0x3c7a   : > { %v7681_v25 = vpop.f32.mrb[68].mxu0 }
0x3c7b   : > { %v7682_v50 = vadd.f32 %v8419_v9, %v7681_v25  ;;  %v9125_v42 = vpop.f32.mrb[69].mxu0 }
0x3c7d   : > { %9142 = vmatmul.mubr.msk.f32.vlgmr.msra.gmra.mrb[66].mxu1 %vm7761_vm15, %v7682_v50  ;;  %7931 = vst.msk [vmem:[%s1587_s7] sm:$0xff] %vm7761_vm15, %v7682_v50 }
0x3c7e   : > { %9281 = vmatpush3.bf16.msra.mxu1 %v9280_v52  ;;  %9152 = vmatprep.mubr.msk.f32.mxu1 %vm10364_vm0, %v10365_v1  ;;  %vm7936_vm0 = vcmask 146528  }
0x3c7f   : > { %9282 = vmatprep.subr.bf16.mxu1 %v10363_v0 }
0x3c82   : > { %v7757_v3 = vpop.f32.mrb[70].mxu0  ;;  %9284 = vmatpush3.bf16.msra.mxu1 %v9283_v19 }
0x3c83   : > { %v9136_v54 = vpop.f32.mrb[71].mxu0 }
0x3d50   : > { %v7835_v27 = vpop.f32.mrb[66].mxu1 }
0x3d51   : > { %v7836_v22 = vadd.f32 %v7835_v27, %v7757_v3  ;;  %v9143_v34 = vpop.f32.mrb[67].mxu1 }
0x3d53   : > { %v7846_v60 = vadd.f32 %v8424_v59, %v7836_v22 }
0x3d55   : > { %9153 = vmatmul.mubr.msk.f32.vlgmr.msra.gmra.mrb[68].mxu1 %vm1601_vm1, %v7846_v60 }
0x3e28   : > { %v7927_v38 = vpop.f32.mrb[68].mxu1 }
0x3e29   : > { %v7928_v20 = vadd.f32 %v8425_v62, %v7927_v38  ;;  %v9154_v21 = vpop.f32.mrb[69].mxu1 }
0x3e2b   : > { %7933 = vrot.lane.b32.xlu1 %v7928_v20, %s10379_s11 }
0x3e9d   : > { %v7934_v0 = vpop.permute.xlu1 %7933 }
0x3e9e   : > { %7937 = vst.msk [vmem:[%s1587_s7] sm:$0xff] %vm7936_vm0, %v7934_v0 }
0x3e9f PF: > { %p109_p10 = scmp.ge.s32.totalorder %s10861_s16, 4   ;;  %s11953_s28 = smov %s10290_s1 }
0x3ea0   : > { %s11954_s1 = smov %s10294_s2  ;;  %s11955_s2 = smov %s10873_s6 }
0x3ea1   : > { %s11956_s7 = smov %s10861_s16  ;;  %111 = sbr.rel (!%p109_p10) target bundleno = 99 (0x63), region = 363 }
0x3ea8   :  { %7971 = vsyncpa [#allocation3], 1 }
0x3ea9   :  { %7973 = vsyncpa [#allocation3 + $0x1], 1 }
0x3eaa   :  { %7974 = vsyncpa [#allocation5], 1 }
0x3eab   :  { %7975 = vsyncpa [#allocation8], 1 }
0x3eac   :  { %7976 = vsyncpa [#allocation11], 1 }
0x3ead   :  { %7977 = vsyncpa [#allocation14], 1 }
0x3eae   :  { %7978 = vsyncpa [#allocation17], 1 }
0x3eaf   :  { %7979 = vsyncpa [#allocation20], 1 }
0x3eb0   :  { %7980 = vsyncpa [#allocation23], 1 }
0x3eb1   :  { %7981 = vsyncpa [#allocation26], 1 }
0x3eb2   :  { %7982 = vsyncpa [#allocation29], 1 }

</bundles_post_ra>
